<compile_context>
chip_gen: v6e
topology: v6e:2x2x1
jax: 0.10.0
libtpu: 0.0.40
codegen_flags: <defaults>
</compile_context>

<pallas_src>
import random

import jax
import jax.numpy as jnp
from jax import lax
from jax.experimental import pallas as pl
from jax.experimental.pallas import tpu as pltpu

# ----------------------------- config ("cfg") -------------------------------
VOCABSIZE = 16               # cfg.CHAR.VOCABSIZE
OUTPUT_DIM = VOCABSIZE + 1   # decoder output_dim (src_vocab_size)
EMB_DIM = 16                 # token embedding dim
POKEMON_SIZE = 8             # cfg.POKEMON.SIZE
HID_DIM = 32                 # encoder.hid_dim == decoder.hid_dim
GATES = 4 * HID_DIM          # 128 -> one full lane-width vreg
N_LAYERS = 2
SRC_LEN = 8
BATCH = 4                    # cfg.TRAIN.BATCH_SIZE
PAD_BATCH = 8                # batch padded to one full sublane
LANES = 128                  # lane-padded slab width: [word logits | pokemon emb | 0]

_VMEM = pl.BlockSpec(memory_space=pltpu.MemorySpace.VMEM)


# ------------------------------ fused kernel --------------------------------
def _make_seq2seq_kernel(tf_schedule):
    """Builds the fused encoder+decoder kernel with a static teacher-forcing schedule."""
    tf_schedule = tuple(bool(b) for b in tf_schedule)

    def kernel(enc_pre0_ref, enc_whh0_ref, enc_wih1_ref, enc_whh1_ref, enc_b1_ref,
               teacher_slab_ref, dec_win_ref, dec_whh0_ref, dec_wih1_ref,
               dec_whh1_ref, dec_b1_ref, w_head_ref, b_head_ref, out_ref):
        f32 = jnp.float32
        B, H = PAD_BATCH, HID_DIM

        def dot(a, b):
            return jnp.dot(a, b, preferred_element_type=f32)

        def cell(gates, c):
            # PyTorch gate order (i, f, g, o) at 32-lane offsets of one 128-lane vreg.
            # One sigmoid over the full vreg + one tanh on the g slice (2 EUP pushes)
            # instead of 3 sigmoids + 1 tanh.
            sg = jax.nn.sigmoid(gates)
            i = sg[:, 0 * H:1 * H]
            f = sg[:, 1 * H:2 * H]
            o = sg[:, 3 * H:4 * H]
            g = jnp.tanh(gates[:, 2 * H:3 * H])
            c_new = f * c + i * g
            return o * jnp.tanh(c_new), c_new

        # Hoist all weights out of the time loops (loaded into vregs once).
        enc_whh0 = enc_whh0_ref[...]
        enc_wih1 = enc_wih1_ref[...]
        enc_whh1 = enc_whh1_ref[...]
        enc_b1 = enc_b1_ref[...]

        h0 = jnp.zeros((B, H), f32)
        c0 = jnp.zeros((B, H), f32)
        h1 = jnp.zeros((B, H), f32)
        c1 = jnp.zeros((B, H), f32)

        # ------------------------------ encoder ------------------------------
        # Layer-0 input gates (x @ W_ih0 + b0) precomputed for all timesteps.
        for t in range(SRC_LEN):
            if t == 0:  # initial h/c are zero -> skip the recurrent matmuls
                h0, c0 = cell(enc_pre0_ref[0], c0)
                h1, c1 = cell(dot(h0, enc_wih1) + enc_b1, c1)
            else:
                h0, c0 = cell(enc_pre0_ref[t] + dot(h0, enc_whh0), c0)
                h1, c1 = cell(dot(h0, enc_wih1) + dot(h1, enc_whh1) + enc_b1, c1)

        # ------------------------------ decoder ------------------------------
        # Combined layer-0 input weight (128,128):
        #   rows [0:17)  : one_hot(tok) @ this == dec_emb[tok] @ W_ih0[:E] + b0
        #   rows [17:25) : pokemon-emb part of W_ih0
        #   rows [25:)   : zero
        d_win = dec_win_ref[...]
        d_whh0 = dec_whh0_ref[...]
        d_wih1 = dec_wih1_ref[...]
        d_whh1 = dec_whh1_ref[...]
        d_b1 = dec_b1_ref[...]
        w_head = w_head_ref[...]
        b_head = b_head_ref[...]

        lane128 = lax.broadcasted_iota(jnp.int32, (B, LANES), 1).astype(f32)
        valid = lane128 < float(OUTPUT_DIM)   # word-logit lanes

        # Initial decoder input slab: one-hot(<sos>=VOCABSIZE) in the token lanes,
        # zeros in the pokemon lanes (input_pokemon_emb = 0).
        slab = (lane128 == float(VOCABSIZE)).astype(f32)

        for t in range(SRC_LEN):
            g0 = dot(slab, d_win) + dot(h0, d_whh0)
            h0, c0 = cell(g0, c0)
            g1 = dot(h0, d_wih1) + dot(h1, d_whh1) + d_b1
            h1, c1 = cell(g1, c1)

            # Fused heads, lane-padded: cols [0:17) word logits, [17:25) pokemon emb, rest 0.
            out_full = dot(h1, w_head) + b_head
            out_ref[t] = out_full            # full-sublane, full-lane store

            if t + 1 < SRC_LEN:
                if tf_schedule[t]:           # static (precomputed) teacher-forcing decision
                    slab = teacher_slab_ref[t]
                else:
                    # In-kernel argmax over the 17 valid lanes (first occurrence),
                    # then rebuild the input slab: one-hot token lanes + fed-back
                    # pokemon-emb lanes straight from the output slab.
                    masked = jnp.where(valid, out_full, -1e30)
                    mx = jnp.max(masked, axis=1, keepdims=True)
                    idx = jnp.min(jnp.where(masked == mx, lane128, float(LANES)),
                                  axis=1, keepdims=True)
                    slab = jnp.where(valid, (lane128 == idx).astype(f32), out_full)

    return kernel


# ------------------------------ parameters ----------------------------------
def init_params(key):
    def nrm(k, shape, scale=0.1):
        return scale * jax.random.normal(k, shape, dtype=jnp.float32)

    keys = iter(jax.random.split(key, 32))
    p = {}
    p["enc_emb"] = nrm(next(keys), (VOCABSIZE, EMB_DIM))
    p["dec_emb"] = nrm(next(keys), (VOCABSIZE + 1, EMB_DIM))
    in_dim0 = EMB_DIM + POKEMON_SIZE
    for tag in ("enc", "dec"):
        for layer in range(N_LAYERS):
            d_in = in_dim0 if layer == 0 else HID_DIM
            p[f"{tag}_wih{layer}"] = nrm(next(keys), (d_in, GATES))
            p[f"{tag}_whh{layer}"] = nrm(next(keys), (HID_DIM, GATES))
            p[f"{tag}_b{layer}"] = nrm(next(keys), (1, GATES))
    p["w_word"] = nrm(next(keys), (HID_DIM, OUTPUT_DIM))
    p["b_word"] = nrm(next(keys), (1, OUTPUT_DIM))
    p["w_emb"] = nrm(next(keys), (HID_DIM, POKEMON_SIZE))
    p["b_emb"] = nrm(next(keys), (1, POKEMON_SIZE))
    return p


# ------------------------------ jitted wrapper -------------------------------
def build_forward(tf_schedule):
    kernel = _make_seq2seq_kernel(tf_schedule)

    @jax.jit
    def forward(params, pokemon_words, pokemon_emb):
        f32 = jnp.float32
        S, B = pokemon_words.shape
        words_pad = jnp.pad(pokemon_words, ((0, 0), (0, PAD_BATCH - B)))
        pok_pad = jnp.pad(pokemon_emb.astype(f32), ((0, PAD_BATCH - B), (0, 0)))

        # --- one-time packing / non-recurrent precompute (tiny XLA ops) ---
        # Encoder layer-0 input gates for every timestep (bias folded in).
        x_emb = jnp.take(params["enc_emb"], words_pad, axis=0)                 # (S, PB, E)
        x_pok = jnp.broadcast_to(pok_pad[None], (S, PAD_BATCH, POKEMON_SIZE))  # (S, PB, P)
        x_all = jnp.concatenate([x_emb, x_pok], axis=-1)                       # (S, PB, E+P)
        enc_pre0 = jnp.einsum("sbe,eg->sbg", x_all, params["enc_wih0"]) + params["enc_b0"]

        # Combined decoder layer-0 input weight: token-gate rows (embedding lookup +
        # input matmul + bias fused) in rows [0:17), pokemon-emb weight in rows [17:25).
        dec_tok_rows = params["dec_emb"] @ params["dec_wih0"][:EMB_DIM] + params["dec_b0"]
        dec_win = jnp.zeros((LANES, GATES), f32)
        dec_win = dec_win.at[:OUTPUT_DIM].set(dec_tok_rows)
        dec_win = dec_win.at[OUTPUT_DIM:OUTPUT_DIM + POKEMON_SIZE].set(
            params["dec_wih0"][EMB_DIM:EMB_DIM + POKEMON_SIZE])

        # Teacher-forced input slabs, one per step: one-hot token in lanes [0:17),
        # the (padded) pokemon embedding in lanes [17:25), zeros elsewhere.
        teacher_tok = jax.nn.one_hot(words_pad, LANES, dtype=f32)              # (S, PB, 128)
        pok_lane = jnp.zeros((PAD_BATCH, LANES), f32).at[
            :, OUTPUT_DIM:OUTPUT_DIM + POKEMON_SIZE].set(pok_pad)
        teacher_slab = teacher_tok + pok_lane[None]                            # (S, PB, 128)

        # Fused output heads (word logits | pokemon emb), lane-padded to 128.
        w_head = jnp.zeros((HID_DIM, LANES), f32)
        w_head = w_head.at[:, :OUTPUT_DIM].set(params["w_word"])
        w_head = w_head.at[:, OUTPUT_DIM:OUTPUT_DIM + POKEMON_SIZE].set(params["w_emb"])
        b_head = jnp.zeros((1, LANES), f32)
        b_head = b_head.at[:, :OUTPUT_DIM].set(params["b_word"])
        b_head = b_head.at[:, OUTPUT_DIM:OUTPUT_DIM + POKEMON_SIZE].set(params["b_emb"])
        b_head = jnp.broadcast_to(b_head, (PAD_BATCH, LANES))

        enc_b1 = jnp.broadcast_to(params["enc_b1"], (PAD_BATCH, GATES))
        dec_b1 = jnp.broadcast_to(params["dec_b1"], (PAD_BATCH, GATES))

        out_slab = pl.pallas_call(
            kernel,
            out_shape=jax.ShapeDtypeStruct((SRC_LEN, PAD_BATCH, LANES), f32),
            in_specs=[_VMEM] * 13,
            out_specs=_VMEM,
        )(enc_pre0, params["enc_whh0"], params["enc_wih1"], params["enc_whh1"], enc_b1,
          teacher_slab, dec_win,
          params["dec_whh0"], params["dec_wih1"], params["dec_whh1"], dec_b1,
          w_head, b_head)

        outputs = out_slab[:, :B, :OUTPUT_DIM]                               # (S, B, 17)
        output_emb = out_slab[-1, :B, OUTPUT_DIM:OUTPUT_DIM + POKEMON_SIZE]  # (B, 8)
        return outputs, output_emb

    return forward


# --------------------------- pure-JAX reference ------------------------------
def _lstm_cell_ref(x, h, c, w_ih, w_hh, b):
    gates = x @ w_ih + h @ w_hh + b
    hd = h.shape[-1]
    i = jax.nn.sigmoid(gates[:, :hd])
    f = jax.nn.sigmoid(gates[:, hd:2 * hd])
    g = jnp.tanh(gates[:, 2 * hd:3 * hd])
    o = jax.nn.sigmoid(gates[:, 3 * hd:])
    c_new = f * c + i * g
    return o * jnp.tanh(c_new), c_new


def reference_forward(p, words, pok_emb, tf_schedule):
    S, B = words.shape
    h = [jnp.zeros((B, HID_DIM), jnp.float32) for _ in range(N_LAYERS)]
    c = [jnp.zeros((B, HID_DIM), jnp.float32) for _ in range(N_LAYERS)]
    for t in range(S):
        x = jnp.concatenate([jnp.take(p["enc_emb"], words[t], axis=0), pok_emb], axis=1)
        for l in range(N_LAYERS):
            h[l], c[l] = _lstm_cell_ref(x, h[l], c[l],
                                        p[f"enc_wih{l}"], p[f"enc_whh{l}"], p[f"enc_b{l}"])
            x = h[l]
    inp = jnp.full((B,), VOCABSIZE, jnp.int32)
    pok_in = jnp.zeros((B, POKEMON_SIZE), jnp.float32)
    outs = []
    out_emb = jnp.zeros((B, POKEMON_SIZE), jnp.float32)
    for t in range(S):
        x = jnp.concatenate([jnp.take(p["dec_emb"], inp, axis=0), pok_in], axis=1)
        for l in range(N_LAYERS):
            h[l], c[l] = _lstm_cell_ref(x, h[l], c[l],
                                        p[f"dec_wih{l}"], p[f"dec_whh{l}"], p[f"dec_b{l}"])
            x = h[l]
        out_word = x @ p["w_word"] + p["b_word"]
        out_emb = x @ p["w_emb"] + p["b_emb"]
        outs.append(out_word)
        if tf_schedule[t]:
            inp, pok_in = words[t], pok_emb
        else:
            inp, pok_in = jnp.argmax(out_word, axis=1).astype(jnp.int32), out_emb
    return jnp.stack(outs, 0), out_emb


# --------------------------------- main --------------------------------------
if __name__ == "__main__":
    key = jax.random.PRNGKey(0)
    k_params, k_words, k_emb = jax.random.split(key, 3)

    params = init_params(k_params)
    pokemon_words = jax.random.randint(
        k_words, (SRC_LEN, BATCH), 0, VOCABSIZE, dtype=jnp.int32)
    pokemon_emb = jax.random.normal(
        k_emb, (BATCH, POKEMON_SIZE), dtype=jnp.float32)

    # Teacher-forcing schedule: same deterministic host RNG draws as the original
    # module (random.Random(0)), precomputed so the fused kernel is fully traceable.
    # TODO(synk): the original module draws random.random() per step at runtime;
    # here the draws are precomputed host-side and baked in as static booleans.
    rng = random.Random(0)
    teacher_forcing_ratio = 0.5
    tf_schedule = tuple(rng.random() < teacher_forcing_ratio for _ in range(SRC_LEN))

    forward = build_forward(tf_schedule)
    outputs, output_emb = forward(params, pokemon_words, pokemon_emb)
    jax.block_until_ready(outputs)
    jax.block_until_ready(output_emb)

    assert outputs.shape == (SRC_LEN, BATCH, OUTPUT_DIM)
    assert output_emb.shape == (BATCH, POKEMON_SIZE)
    assert bool(jnp.all(jnp.isfinite(outputs)))

    # Correctness vs. a straightforward pure-JAX implementation of the module.
    ref_out, ref_emb = reference_forward(params, pokemon_words, pokemon_emb, tf_schedule)
    assert jnp.allclose(outputs, ref_out, rtol=1e-4, atol=1e-4), "outputs mismatch vs reference"
    assert jnp.allclose(output_emb, ref_emb, rtol=1e-4, atol=1e-4), "output_emb mismatch vs reference"

    print("KERNEL_OK")
</pallas_src>

<mosaic_0001>
module attributes {stable_mosaic.version = 11 : i64} {
  func.func @kernel(%arg0: memref<8x8x128xf32, #tpu.memory_space<vmem>>, %arg1: memref<32x128xf32, #tpu.memory_space<vmem>>, %arg2: memref<32x128xf32, #tpu.memory_space<vmem>>, %arg3: memref<32x128xf32, #tpu.memory_space<vmem>>, %arg4: memref<8x128xf32, #tpu.memory_space<vmem>>, %arg5: memref<8x8x128xf32, #tpu.memory_space<vmem>>, %arg6: memref<128x128xf32, #tpu.memory_space<vmem>>, %arg7: memref<32x128xf32, #tpu.memory_space<vmem>>, %arg8: memref<32x128xf32, #tpu.memory_space<vmem>>, %arg9: memref<32x128xf32, #tpu.memory_space<vmem>>, %arg10: memref<8x128xf32, #tpu.memory_space<vmem>>, %arg11: memref<32x128xf32, #tpu.memory_space<vmem>>, %arg12: memref<8x128xf32, #tpu.memory_space<vmem>>, %arg13: memref<8x8x128xf32, #tpu.memory_space<vmem>>) attributes {dimension_semantics = [], scalar_prefetch = 0 : i64, scratch_operands = 0 : i64, tpu.core_type = #tpu.core_type<tc>} {
    %c0 = arith.constant 0 : index
    %c0_0 = arith.constant 0 : index
    %0 = vector.load %arg1[%c0, %c0_0] : memref<32x128xf32, #tpu.memory_space<vmem>>, vector<32x128xf32>
    %c0_1 = arith.constant 0 : index
    %c0_2 = arith.constant 0 : index
    %1 = vector.load %arg2[%c0_1, %c0_2] : memref<32x128xf32, #tpu.memory_space<vmem>>, vector<32x128xf32>
    %c0_3 = arith.constant 0 : index
    %c0_4 = arith.constant 0 : index
    %2 = vector.load %arg3[%c0_3, %c0_4] : memref<32x128xf32, #tpu.memory_space<vmem>>, vector<32x128xf32>
    %c0_5 = arith.constant 0 : index
    %c0_6 = arith.constant 0 : index
    %3 = vector.load %arg4[%c0_5, %c0_6] : memref<8x128xf32, #tpu.memory_space<vmem>>, vector<8x128xf32>
    %cst = arith.constant 0.000000e+00 : f32
    %4 = vector.broadcast %cst : f32 to vector<8x32xf32>
    %cst_7 = arith.constant 0.000000e+00 : f32
    %5 = vector.broadcast %cst_7 : f32 to vector<8x32xf32>
    %c0_8 = arith.constant 0 : index
    %c0_9 = arith.constant 0 : index
    %c0_10 = arith.constant 0 : index
    %6 = vector.load %arg0[%c0_8, %c0_9, %c0_10] : memref<8x8x128xf32, #tpu.memory_space<vmem>>, vector<1x8x128xf32>
    %7 = vector.shape_cast %6 : vector<1x8x128xf32> to vector<8x128xf32>
    %8 = arith.negf %7 : vector<8x128xf32>
    %9 = math.exp %8 : vector<8x128xf32>
    %cst_11 = arith.constant 1.000000e+00 : f32
    %10 = vector.broadcast %cst_11 : f32 to vector<8x128xf32>
    %11 = arith.addf %10, %9 : vector<8x128xf32>
    %12 = arith.divf %10, %11 : vector<8x128xf32>
    %13 = vector.extract_strided_slice %12 {offsets = [0, 0], sizes = [8, 32], strides = [1, 1]} : vector<8x128xf32> to vector<8x32xf32>
    %14 = vector.extract_strided_slice %12 {offsets = [0, 32], sizes = [8, 32], strides = [1, 1]} : vector<8x128xf32> to vector<8x32xf32>
    %15 = vector.extract_strided_slice %12 {offsets = [0, 96], sizes = [8, 32], strides = [1, 1]} : vector<8x128xf32> to vector<8x32xf32>
    %16 = vector.extract_strided_slice %7 {offsets = [0, 64], sizes = [8, 32], strides = [1, 1]} : vector<8x128xf32> to vector<8x32xf32>
    %17 = math.tanh %16 : vector<8x32xf32>
    %18 = arith.mulf %14, %4 : vector<8x32xf32>
    %19 = arith.mulf %13, %17 : vector<8x32xf32>
    %20 = arith.addf %18, %19 : vector<8x32xf32>
    %21 = math.tanh %20 : vector<8x32xf32>
    %22 = arith.mulf %15, %21 : vector<8x32xf32>
    %cst_12 = arith.constant dense<0.000000e+00> : vector<8x128xf32>
    %23 = tpu.matmul %22, %1, %cst_12 {dimension_numbers = #tpu.dot_dimension_numbers<[1], [0], [0], [1], [0, 0, 1, 1], [], []>} : vector<8x32xf32>, vector<32x128xf32>, vector<8x128xf32> -> vector<8x128xf32>
    %24 = arith.addf %23, %3 : vector<8x128xf32>
    %25 = arith.negf %24 : vector<8x128xf32>
    %26 = math.exp %25 : vector<8x128xf32>
    %cst_13 = arith.constant 1.000000e+00 : f32
    %27 = vector.broadcast %cst_13 : f32 to vector<8x128xf32>
    %28 = arith.addf %27, %26 : vector<8x128xf32>
    %29 = arith.divf %27, %28 : vector<8x128xf32>
    %30 = vector.extract_strided_slice %29 {offsets = [0, 0], sizes = [8, 32], strides = [1, 1]} : vector<8x128xf32> to vector<8x32xf32>
    %31 = vector.extract_strided_slice %29 {offsets = [0, 32], sizes = [8, 32], strides = [1, 1]} : vector<8x128xf32> to vector<8x32xf32>
    %32 = vector.extract_strided_slice %29 {offsets = [0, 96], sizes = [8, 32], strides = [1, 1]} : vector<8x128xf32> to vector<8x32xf32>
    %33 = vector.extract_strided_slice %24 {offsets = [0, 64], sizes = [8, 32], strides = [1, 1]} : vector<8x128xf32> to vector<8x32xf32>
    %34 = math.tanh %33 : vector<8x32xf32>
    %35 = arith.mulf %31, %5 : vector<8x32xf32>
    %36 = arith.mulf %30, %34 : vector<8x32xf32>
    %37 = arith.addf %35, %36 : vector<8x32xf32>
    %38 = math.tanh %37 : vector<8x32xf32>
    %39 = arith.mulf %32, %38 : vector<8x32xf32>
    %c1 = arith.constant 1 : index
    %c0_14 = arith.constant 0 : index
    %c0_15 = arith.constant 0 : index
    %40 = vector.load %arg0[%c1, %c0_14, %c0_15] : memref<8x8x128xf32, #tpu.memory_space<vmem>>, vector<1x8x128xf32>
    %41 = vector.shape_cast %40 : vector<1x8x128xf32> to vector<8x128xf32>
    %cst_16 = arith.constant dense<0.000000e+00> : vector<8x128xf32>
    %42 = tpu.matmul %22, %0, %cst_16 {dimension_numbers = #tpu.dot_dimension_numbers<[1], [0], [0], [1], [0, 0, 1, 1], [], []>} : vector<8x32xf32>, vector<32x128xf32>, vector<8x128xf32> -> vector<8x128xf32>
    %43 = arith.addf %41, %42 : vector<8x128xf32>
    %44 = arith.negf %43 : vector<8x128xf32>
    %45 = math.exp %44 : vector<8x128xf32>
    %cst_17 = arith.constant 1.000000e+00 : f32
    %46 = vector.broadcast %cst_17 : f32 to vector<8x128xf32>
    %47 = arith.addf %46, %45 : vector<8x128xf32>
    %48 = arith.divf %46, %47 : vector<8x128xf32>
    %49 = vector.extract_strided_slice %48 {offsets = [0, 0], sizes = [8, 32], strides = [1, 1]} : vector<8x128xf32> to vector<8x32xf32>
    %50 = vector.extract_strided_slice %48 {offsets = [0, 32], sizes = [8, 32], strides = [1, 1]} : vector<8x128xf32> to vector<8x32xf32>
    %51 = vector.extract_strided_slice %48 {offsets = [0, 96], sizes = [8, 32], strides = [1, 1]} : vector<8x128xf32> to vector<8x32xf32>
    %52 = vector.extract_strided_slice %43 {offsets = [0, 64], sizes = [8, 32], strides = [1, 1]} : vector<8x128xf32> to vector<8x32xf32>
    %53 = math.tanh %52 : vector<8x32xf32>
    %54 = arith.mulf %50, %20 : vector<8x32xf32>
    %55 = arith.mulf %49, %53 : vector<8x32xf32>
    %56 = arith.addf %54, %55 : vector<8x32xf32>
    %57 = math.tanh %56 : vector<8x32xf32>
    %58 = arith.mulf %51, %57 : vector<8x32xf32>
    %cst_18 = arith.constant dense<0.000000e+00> : vector<8x128xf32>
    %59 = tpu.matmul %58, %1, %cst_18 {dimension_numbers = #tpu.dot_dimension_numbers<[1], [0], [0], [1], [0, 0, 1, 1], [], []>} : vector<8x32xf32>, vector<32x128xf32>, vector<8x128xf32> -> vector<8x128xf32>
    %cst_19 = arith.constant dense<0.000000e+00> : vector<8x128xf32>
    %60 = tpu.matmul %39, %2, %cst_19 {dimension_numbers = #tpu.dot_dimension_numbers<[1], [0], [0], [1], [0, 0, 1, 1], [], []>} : vector<8x32xf32>, vector<32x128xf32>, vector<8x128xf32> -> vector<8x128xf32>
    %61 = arith.addf %59, %60 : vector<8x128xf32>
    %62 = arith.addf %61, %3 : vector<8x128xf32>
    %63 = arith.negf %62 : vector<8x128xf32>
    %64 = math.exp %63 : vector<8x128xf32>
    %cst_20 = arith.constant 1.000000e+00 : f32
    %65 = vector.broadcast %cst_20 : f32 to vector<8x128xf32>
    %66 = arith.addf %65, %64 : vector<8x128xf32>
    %67 = arith.divf %65, %66 : vector<8x128xf32>
    %68 = vector.extract_strided_slice %67 {offsets = [0, 0], sizes = [8, 32], strides = [1, 1]} : vector<8x128xf32> to vector<8x32xf32>
    %69 = vector.extract_strided_slice %67 {offsets = [0, 32], sizes = [8, 32], strides = [1, 1]} : vector<8x128xf32> to vector<8x32xf32>
    %70 = vector.extract_strided_slice %67 {offsets = [0, 96], sizes = [8, 32], strides = [1, 1]} : vector<8x128xf32> to vector<8x32xf32>
    %71 = vector.extract_strided_slice %62 {offsets = [0, 64], sizes = [8, 32], strides = [1, 1]} : vector<8x128xf32> to vector<8x32xf32>
    %72 = math.tanh %71 : vector<8x32xf32>
    %73 = arith.mulf %69, %37 : vector<8x32xf32>
    %74 = arith.mulf %68, %72 : vector<8x32xf32>
    %75 = arith.addf %73, %74 : vector<8x32xf32>
    %76 = math.tanh %75 : vector<8x32xf32>
    %77 = arith.mulf %70, %76 : vector<8x32xf32>
    %c2 = arith.constant 2 : index
    %c0_21 = arith.constant 0 : index
    %c0_22 = arith.constant 0 : index
    %78 = vector.load %arg0[%c2, %c0_21, %c0_22] : memref<8x8x128xf32, #tpu.memory_space<vmem>>, vector<1x8x128xf32>
    %79 = vector.shape_cast %78 : vector<1x8x128xf32> to vector<8x128xf32>
    %cst_23 = arith.constant dense<0.000000e+00> : vector<8x128xf32>
    %80 = tpu.matmul %58, %0, %cst_23 {dimension_numbers = #tpu.dot_dimension_numbers<[1], [0], [0], [1], [0, 0, 1, 1], [], []>} : vector<8x32xf32>, vector<32x128xf32>, vector<8x128xf32> -> vector<8x128xf32>
    %81 = arith.addf %79, %80 : vector<8x128xf32>
    %82 = arith.negf %81 : vector<8x128xf32>
    %83 = math.exp %82 : vector<8x128xf32>
    %cst_24 = arith.constant 1.000000e+00 : f32
    %84 = vector.broadcast %cst_24 : f32 to vector<8x128xf32>
    %85 = arith.addf %84, %83 : vector<8x128xf32>
    %86 = arith.divf %84, %85 : vector<8x128xf32>
    %87 = vector.extract_strided_slice %86 {offsets = [0, 0], sizes = [8, 32], strides = [1, 1]} : vector<8x128xf32> to vector<8x32xf32>
    %88 = vector.extract_strided_slice %86 {offsets = [0, 32], sizes = [8, 32], strides = [1, 1]} : vector<8x128xf32> to vector<8x32xf32>
    %89 = vector.extract_strided_slice %86 {offsets = [0, 96], sizes = [8, 32], strides = [1, 1]} : vector<8x128xf32> to vector<8x32xf32>
    %90 = vector.extract_strided_slice %81 {offsets = [0, 64], sizes = [8, 32], strides = [1, 1]} : vector<8x128xf32> to vector<8x32xf32>
    %91 = math.tanh %90 : vector<8x32xf32>
    %92 = arith.mulf %88, %56 : vector<8x32xf32>
    %93 = arith.mulf %87, %91 : vector<8x32xf32>
    %94 = arith.addf %92, %93 : vector<8x32xf32>
    %95 = math.tanh %94 : vector<8x32xf32>
    %96 = arith.mulf %89, %95 : vector<8x32xf32>
    %cst_25 = arith.constant dense<0.000000e+00> : vector<8x128xf32>
    %97 = tpu.matmul %96, %1, %cst_25 {dimension_numbers = #tpu.dot_dimension_numbers<[1], [0], [0], [1], [0, 0, 1, 1], [], []>} : vector<8x32xf32>, vector<32x128xf32>, vector<8x128xf32> -> vector<8x128xf32>
    %cst_26 = arith.constant dense<0.000000e+00> : vector<8x128xf32>
    %98 = tpu.matmul %77, %2, %cst_26 {dimension_numbers = #tpu.dot_dimension_numbers<[1], [0], [0], [1], [0, 0, 1, 1], [], []>} : vector<8x32xf32>, vector<32x128xf32>, vector<8x128xf32> -> vector<8x128xf32>
    %99 = arith.addf %97, %98 : vector<8x128xf32>
    %100 = arith.addf %99, %3 : vector<8x128xf32>
    %101 = arith.negf %100 : vector<8x128xf32>
    %102 = math.exp %101 : vector<8x128xf32>
    %cst_27 = arith.constant 1.000000e+00 : f32
    %103 = vector.broadcast %cst_27 : f32 to vector<8x128xf32>
    %104 = arith.addf %103, %102 : vector<8x128xf32>
    %105 = arith.divf %103, %104 : vector<8x128xf32>
    %106 = vector.extract_strided_slice %105 {offsets = [0, 0], sizes = [8, 32], strides = [1, 1]} : vector<8x128xf32> to vector<8x32xf32>
    %107 = vector.extract_strided_slice %105 {offsets = [0, 32], sizes = [8, 32], strides = [1, 1]} : vector<8x128xf32> to vector<8x32xf32>
    %108 = vector.extract_strided_slice %105 {offsets = [0, 96], sizes = [8, 32], strides = [1, 1]} : vector<8x128xf32> to vector<8x32xf32>
    %109 = vector.extract_strided_slice %100 {offsets = [0, 64], sizes = [8, 32], strides = [1, 1]} : vector<8x128xf32> to vector<8x32xf32>
    %110 = math.tanh %109 : vector<8x32xf32>
    %111 = arith.mulf %107, %75 : vector<8x32xf32>
    %112 = arith.mulf %106, %110 : vector<8x32xf32>
    %113 = arith.addf %111, %112 : vector<8x32xf32>
    %114 = math.tanh %113 : vector<8x32xf32>
    %115 = arith.mulf %108, %114 : vector<8x32xf32>
    %c3 = arith.constant 3 : index
    %c0_28 = arith.constant 0 : index
    %c0_29 = arith.constant 0 : index
    %116 = vector.load %arg0[%c3, %c0_28, %c0_29] : memref<8x8x128xf32, #tpu.memory_space<vmem>>, vector<1x8x128xf32>
    %117 = vector.shape_cast %116 : vector<1x8x128xf32> to vector<8x128xf32>
    %cst_30 = arith.constant dense<0.000000e+00> : vector<8x128xf32>
    %118 = tpu.matmul %96, %0, %cst_30 {dimension_numbers = #tpu.dot_dimension_numbers<[1], [0], [0], [1], [0, 0, 1, 1], [], []>} : vector<8x32xf32>, vector<32x128xf32>, vector<8x128xf32> -> vector<8x128xf32>
    %119 = arith.addf %117, %118 : vector<8x128xf32>
    %120 = arith.negf %119 : vector<8x128xf32>
    %121 = math.exp %120 : vector<8x128xf32>
    %cst_31 = arith.constant 1.000000e+00 : f32
    %122 = vector.broadcast %cst_31 : f32 to vector<8x128xf32>
    %123 = arith.addf %122, %121 : vector<8x128xf32>
    %124 = arith.divf %122, %123 : vector<8x128xf32>
    %125 = vector.extract_strided_slice %124 {offsets = [0, 0], sizes = [8, 32], strides = [1, 1]} : vector<8x128xf32> to vector<8x32xf32>
    %126 = vector.extract_strided_slice %124 {offsets = [0, 32], sizes = [8, 32], strides = [1, 1]} : vector<8x128xf32> to vector<8x32xf32>
    %127 = vector.extract_strided_slice %124 {offsets = [0, 96], sizes = [8, 32], strides = [1, 1]} : vector<8x128xf32> to vector<8x32xf32>
    %128 = vector.extract_strided_slice %119 {offsets = [0, 64], sizes = [8, 32], strides = [1, 1]} : vector<8x128xf32> to vector<8x32xf32>
    %129 = math.tanh %128 : vector<8x32xf32>
    %130 = arith.mulf %126, %94 : vector<8x32xf32>
    %131 = arith.mulf %125, %129 : vector<8x32xf32>
    %132 = arith.addf %130, %131 : vector<8x32xf32>
    %133 = math.tanh %132 : vector<8x32xf32>
    %134 = arith.mulf %127, %133 : vector<8x32xf32>
    %cst_32 = arith.constant dense<0.000000e+00> : vector<8x128xf32>
    %135 = tpu.matmul %134, %1, %cst_32 {dimension_numbers = #tpu.dot_dimension_numbers<[1], [0], [0], [1], [0, 0, 1, 1], [], []>} : vector<8x32xf32>, vector<32x128xf32>, vector<8x128xf32> -> vector<8x128xf32>
    %cst_33 = arith.constant dense<0.000000e+00> : vector<8x128xf32>
    %136 = tpu.matmul %115, %2, %cst_33 {dimension_numbers = #tpu.dot_dimension_numbers<[1], [0], [0], [1], [0, 0, 1, 1], [], []>} : vector<8x32xf32>, vector<32x128xf32>, vector<8x128xf32> -> vector<8x128xf32>
    %137 = arith.addf %135, %136 : vector<8x128xf32>
    %138 = arith.addf %137, %3 : vector<8x128xf32>
    %139 = arith.negf %138 : vector<8x128xf32>
    %140 = math.exp %139 : vector<8x128xf32>
    %cst_34 = arith.constant 1.000000e+00 : f32
    %141 = vector.broadcast %cst_34 : f32 to vector<8x128xf32>
    %142 = arith.addf %141, %140 : vector<8x128xf32>
    %143 = arith.divf %141, %142 : vector<8x128xf32>
    %144 = vector.extract_strided_slice %143 {offsets = [0, 0], sizes = [8, 32], strides = [1, 1]} : vector<8x128xf32> to vector<8x32xf32>
    %145 = vector.extract_strided_slice %143 {offsets = [0, 32], sizes = [8, 32], strides = [1, 1]} : vector<8x128xf32> to vector<8x32xf32>
    %146 = vector.extract_strided_slice %143 {offsets = [0, 96], sizes = [8, 32], strides = [1, 1]} : vector<8x128xf32> to vector<8x32xf32>
    %147 = vector.extract_strided_slice %138 {offsets = [0, 64], sizes = [8, 32], strides = [1, 1]} : vector<8x128xf32> to vector<8x32xf32>
    %148 = math.tanh %147 : vector<8x32xf32>
    %149 = arith.mulf %145, %113 : vector<8x32xf32>
    %150 = arith.mulf %144, %148 : vector<8x32xf32>
    %151 = arith.addf %149, %150 : vector<8x32xf32>
    %152 = math.tanh %151 : vector<8x32xf32>
    %153 = arith.mulf %146, %152 : vector<8x32xf32>
    %c4 = arith.constant 4 : index
    %c0_35 = arith.constant 0 : index
    %c0_36 = arith.constant 0 : index
    %154 = vector.load %arg0[%c4, %c0_35, %c0_36] : memref<8x8x128xf32, #tpu.memory_space<vmem>>, vector<1x8x128xf32>
    %155 = vector.shape_cast %154 : vector<1x8x128xf32> to vector<8x128xf32>
    %cst_37 = arith.constant dense<0.000000e+00> : vector<8x128xf32>
    %156 = tpu.matmul %134, %0, %cst_37 {dimension_numbers = #tpu.dot_dimension_numbers<[1], [0], [0], [1], [0, 0, 1, 1], [], []>} : vector<8x32xf32>, vector<32x128xf32>, vector<8x128xf32> -> vector<8x128xf32>
    %157 = arith.addf %155, %156 : vector<8x128xf32>
    %158 = arith.negf %157 : vector<8x128xf32>
    %159 = math.exp %158 : vector<8x128xf32>
    %cst_38 = arith.constant 1.000000e+00 : f32
    %160 = vector.broadcast %cst_38 : f32 to vector<8x128xf32>
    %161 = arith.addf %160, %159 : vector<8x128xf32>
    %162 = arith.divf %160, %161 : vector<8x128xf32>
    %163 = vector.extract_strided_slice %162 {offsets = [0, 0], sizes = [8, 32], strides = [1, 1]} : vector<8x128xf32> to vector<8x32xf32>
    %164 = vector.extract_strided_slice %162 {offsets = [0, 32], sizes = [8, 32], strides = [1, 1]} : vector<8x128xf32> to vector<8x32xf32>
    %165 = vector.extract_strided_slice %162 {offsets = [0, 96], sizes = [8, 32], strides = [1, 1]} : vector<8x128xf32> to vector<8x32xf32>
    %166 = vector.extract_strided_slice %157 {offsets = [0, 64], sizes = [8, 32], strides = [1, 1]} : vector<8x128xf32> to vector<8x32xf32>
    %167 = math.tanh %166 : vector<8x32xf32>
    %168 = arith.mulf %164, %132 : vector<8x32xf32>
    %169 = arith.mulf %163, %167 : vector<8x32xf32>
    %170 = arith.addf %168, %169 : vector<8x32xf32>
    %171 = math.tanh %170 : vector<8x32xf32>
    %172 = arith.mulf %165, %171 : vector<8x32xf32>
    %cst_39 = arith.constant dense<0.000000e+00> : vector<8x128xf32>
    %173 = tpu.matmul %172, %1, %cst_39 {dimension_numbers = #tpu.dot_dimension_numbers<[1], [0], [0], [1], [0, 0, 1, 1], [], []>} : vector<8x32xf32>, vector<32x128xf32>, vector<8x128xf32> -> vector<8x128xf32>
    %cst_40 = arith.constant dense<0.000000e+00> : vector<8x128xf32>
    %174 = tpu.matmul %153, %2, %cst_40 {dimension_numbers = #tpu.dot_dimension_numbers<[1], [0], [0], [1], [0, 0, 1, 1], [], []>} : vector<8x32xf32>, vector<32x128xf32>, vector<8x128xf32> -> vector<8x128xf32>
    %175 = arith.addf %173, %174 : vector<8x128xf32>
    %176 = arith.addf %175, %3 : vector<8x128xf32>
    %177 = arith.negf %176 : vector<8x128xf32>
    %178 = math.exp %177 : vector<8x128xf32>
    %cst_41 = arith.constant 1.000000e+00 : f32
    %179 = vector.broadcast %cst_41 : f32 to vector<8x128xf32>
    %180 = arith.addf %179, %178 : vector<8x128xf32>
    %181 = arith.divf %179, %180 : vector<8x128xf32>
    %182 = vector.extract_strided_slice %181 {offsets = [0, 0], sizes = [8, 32], strides = [1, 1]} : vector<8x128xf32> to vector<8x32xf32>
    %183 = vector.extract_strided_slice %181 {offsets = [0, 32], sizes = [8, 32], strides = [1, 1]} : vector<8x128xf32> to vector<8x32xf32>
    %184 = vector.extract_strided_slice %181 {offsets = [0, 96], sizes = [8, 32], strides = [1, 1]} : vector<8x128xf32> to vector<8x32xf32>
    %185 = vector.extract_strided_slice %176 {offsets = [0, 64], sizes = [8, 32], strides = [1, 1]} : vector<8x128xf32> to vector<8x32xf32>
    %186 = math.tanh %185 : vector<8x32xf32>
    %187 = arith.mulf %183, %151 : vector<8x32xf32>
    %188 = arith.mulf %182, %186 : vector<8x32xf32>
    %189 = arith.addf %187, %188 : vector<8x32xf32>
    %190 = math.tanh %189 : vector<8x32xf32>
    %191 = arith.mulf %184, %190 : vector<8x32xf32>
    %c5 = arith.constant 5 : index
    %c0_42 = arith.constant 0 : index
    %c0_43 = arith.constant 0 : index
    %192 = vector.load %arg0[%c5, %c0_42, %c0_43] : memref<8x8x128xf32, #tpu.memory_space<vmem>>, vector<1x8x128xf32>
    %193 = vector.shape_cast %192 : vector<1x8x128xf32> to vector<8x128xf32>
    %cst_44 = arith.constant dense<0.000000e+00> : vector<8x128xf32>
    %194 = tpu.matmul %172, %0, %cst_44 {dimension_numbers = #tpu.dot_dimension_numbers<[1], [0], [0], [1], [0, 0, 1, 1], [], []>} : vector<8x32xf32>, vector<32x128xf32>, vector<8x128xf32> -> vector<8x128xf32>
    %195 = arith.addf %193, %194 : vector<8x128xf32>
    %196 = arith.negf %195 : vector<8x128xf32>
    %197 = math.exp %196 : vector<8x128xf32>
    %cst_45 = arith.constant 1.000000e+00 : f32
    %198 = vector.broadcast %cst_45 : f32 to vector<8x128xf32>
    %199 = arith.addf %198, %197 : vector<8x128xf32>
    %200 = arith.divf %198, %199 : vector<8x128xf32>
    %201 = vector.extract_strided_slice %200 {offsets = [0, 0], sizes = [8, 32], strides = [1, 1]} : vector<8x128xf32> to vector<8x32xf32>
    %202 = vector.extract_strided_slice %200 {offsets = [0, 32], sizes = [8, 32], strides = [1, 1]} : vector<8x128xf32> to vector<8x32xf32>
    %203 = vector.extract_strided_slice %200 {offsets = [0, 96], sizes = [8, 32], strides = [1, 1]} : vector<8x128xf32> to vector<8x32xf32>
    %204 = vector.extract_strided_slice %195 {offsets = [0, 64], sizes = [8, 32], strides = [1, 1]} : vector<8x128xf32> to vector<8x32xf32>
    %205 = math.tanh %204 : vector<8x32xf32>
    %206 = arith.mulf %202, %170 : vector<8x32xf32>
    %207 = arith.mulf %201, %205 : vector<8x32xf32>
    %208 = arith.addf %206, %207 : vector<8x32xf32>
    %209 = math.tanh %208 : vector<8x32xf32>
    %210 = arith.mulf %203, %209 : vector<8x32xf32>
    %cst_46 = arith.constant dense<0.000000e+00> : vector<8x128xf32>
    %211 = tpu.matmul %210, %1, %cst_46 {dimension_numbers = #tpu.dot_dimension_numbers<[1], [0], [0], [1], [0, 0, 1, 1], [], []>} : vector<8x32xf32>, vector<32x128xf32>, vector<8x128xf32> -> vector<8x128xf32>
    %cst_47 = arith.constant dense<0.000000e+00> : vector<8x128xf32>
    %212 = tpu.matmul %191, %2, %cst_47 {dimension_numbers = #tpu.dot_dimension_numbers<[1], [0], [0], [1], [0, 0, 1, 1], [], []>} : vector<8x32xf32>, vector<32x128xf32>, vector<8x128xf32> -> vector<8x128xf32>
    %213 = arith.addf %211, %212 : vector<8x128xf32>
    %214 = arith.addf %213, %3 : vector<8x128xf32>
    %215 = arith.negf %214 : vector<8x128xf32>
    %216 = math.exp %215 : vector<8x128xf32>
    %cst_48 = arith.constant 1.000000e+00 : f32
    %217 = vector.broadcast %cst_48 : f32 to vector<8x128xf32>
    %218 = arith.addf %217, %216 : vector<8x128xf32>
    %219 = arith.divf %217, %218 : vector<8x128xf32>
    %220 = vector.extract_strided_slice %219 {offsets = [0, 0], sizes = [8, 32], strides = [1, 1]} : vector<8x128xf32> to vector<8x32xf32>
    %221 = vector.extract_strided_slice %219 {offsets = [0, 32], sizes = [8, 32], strides = [1, 1]} : vector<8x128xf32> to vector<8x32xf32>
    %222 = vector.extract_strided_slice %219 {offsets = [0, 96], sizes = [8, 32], strides = [1, 1]} : vector<8x128xf32> to vector<8x32xf32>
    %223 = vector.extract_strided_slice %214 {offsets = [0, 64], sizes = [8, 32], strides = [1, 1]} : vector<8x128xf32> to vector<8x32xf32>
    %224 = math.tanh %223 : vector<8x32xf32>
    %225 = arith.mulf %221, %189 : vector<8x32xf32>
    %226 = arith.mulf %220, %224 : vector<8x32xf32>
    %227 = arith.addf %225, %226 : vector<8x32xf32>
    %228 = math.tanh %227 : vector<8x32xf32>
    %229 = arith.mulf %222, %228 : vector<8x32xf32>
    %c6 = arith.constant 6 : index
    %c0_49 = arith.constant 0 : index
    %c0_50 = arith.constant 0 : index
    %230 = vector.load %arg0[%c6, %c0_49, %c0_50] : memref<8x8x128xf32, #tpu.memory_space<vmem>>, vector<1x8x128xf32>
    %231 = vector.shape_cast %230 : vector<1x8x128xf32> to vector<8x128xf32>
    %cst_51 = arith.constant dense<0.000000e+00> : vector<8x128xf32>
    %232 = tpu.matmul %210, %0, %cst_51 {dimension_numbers = #tpu.dot_dimension_numbers<[1], [0], [0], [1], [0, 0, 1, 1], [], []>} : vector<8x32xf32>, vector<32x128xf32>, vector<8x128xf32> -> vector<8x128xf32>
    %233 = arith.addf %231, %232 : vector<8x128xf32>
    %234 = arith.negf %233 : vector<8x128xf32>
    %235 = math.exp %234 : vector<8x128xf32>
    %cst_52 = arith.constant 1.000000e+00 : f32
    %236 = vector.broadcast %cst_52 : f32 to vector<8x128xf32>
    %237 = arith.addf %236, %235 : vector<8x128xf32>
    %238 = arith.divf %236, %237 : vector<8x128xf32>
    %239 = vector.extract_strided_slice %238 {offsets = [0, 0], sizes = [8, 32], strides = [1, 1]} : vector<8x128xf32> to vector<8x32xf32>
    %240 = vector.extract_strided_slice %238 {offsets = [0, 32], sizes = [8, 32], strides = [1, 1]} : vector<8x128xf32> to vector<8x32xf32>
    %241 = vector.extract_strided_slice %238 {offsets = [0, 96], sizes = [8, 32], strides = [1, 1]} : vector<8x128xf32> to vector<8x32xf32>
    %242 = vector.extract_strided_slice %233 {offsets = [0, 64], sizes = [8, 32], strides = [1, 1]} : vector<8x128xf32> to vector<8x32xf32>
    %243 = math.tanh %242 : vector<8x32xf32>
    %244 = arith.mulf %240, %208 : vector<8x32xf32>
    %245 = arith.mulf %239, %243 : vector<8x32xf32>
    %246 = arith.addf %244, %245 : vector<8x32xf32>
    %247 = math.tanh %246 : vector<8x32xf32>
    %248 = arith.mulf %241, %247 : vector<8x32xf32>
    %cst_53 = arith.constant dense<0.000000e+00> : vector<8x128xf32>
    %249 = tpu.matmul %248, %1, %cst_53 {dimension_numbers = #tpu.dot_dimension_numbers<[1], [0], [0], [1], [0, 0, 1, 1], [], []>} : vector<8x32xf32>, vector<32x128xf32>, vector<8x128xf32> -> vector<8x128xf32>
    %cst_54 = arith.constant dense<0.000000e+00> : vector<8x128xf32>
    %250 = tpu.matmul %229, %2, %cst_54 {dimension_numbers = #tpu.dot_dimension_numbers<[1], [0], [0], [1], [0, 0, 1, 1], [], []>} : vector<8x32xf32>, vector<32x128xf32>, vector<8x128xf32> -> vector<8x128xf32>
    %251 = arith.addf %249, %250 : vector<8x128xf32>
    %252 = arith.addf %251, %3 : vector<8x128xf32>
    %253 = arith.negf %252 : vector<8x128xf32>
    %254 = math.exp %253 : vector<8x128xf32>
    %cst_55 = arith.constant 1.000000e+00 : f32
    %255 = vector.broadcast %cst_55 : f32 to vector<8x128xf32>
    %256 = arith.addf %255, %254 : vector<8x128xf32>
    %257 = arith.divf %255, %256 : vector<8x128xf32>
    %258 = vector.extract_strided_slice %257 {offsets = [0, 0], sizes = [8, 32], strides = [1, 1]} : vector<8x128xf32> to vector<8x32xf32>
    %259 = vector.extract_strided_slice %257 {offsets = [0, 32], sizes = [8, 32], strides = [1, 1]} : vector<8x128xf32> to vector<8x32xf32>
    %260 = vector.extract_strided_slice %257 {offsets = [0, 96], sizes = [8, 32], strides = [1, 1]} : vector<8x128xf32> to vector<8x32xf32>
    %261 = vector.extract_strided_slice %252 {offsets = [0, 64], sizes = [8, 32], strides = [1, 1]} : vector<8x128xf32> to vector<8x32xf32>
    %262 = math.tanh %261 : vector<8x32xf32>
    %263 = arith.mulf %259, %227 : vector<8x32xf32>
    %264 = arith.mulf %258, %262 : vector<8x32xf32>
    %265 = arith.addf %263, %264 : vector<8x32xf32>
    %266 = math.tanh %265 : vector<8x32xf32>
    %267 = arith.mulf %260, %266 : vector<8x32xf32>
    %c7 = arith.constant 7 : index
    %c0_56 = arith.constant 0 : index
    %c0_57 = arith.constant 0 : index
    %268 = vector.load %arg0[%c7, %c0_56, %c0_57] : memref<8x8x128xf32, #tpu.memory_space<vmem>>, vector<1x8x128xf32>
    %269 = vector.shape_cast %268 : vector<1x8x128xf32> to vector<8x128xf32>
    %cst_58 = arith.constant dense<0.000000e+00> : vector<8x128xf32>
    %270 = tpu.matmul %248, %0, %cst_58 {dimension_numbers = #tpu.dot_dimension_numbers<[1], [0], [0], [1], [0, 0, 1, 1], [], []>} : vector<8x32xf32>, vector<32x128xf32>, vector<8x128xf32> -> vector<8x128xf32>
    %271 = arith.addf %269, %270 : vector<8x128xf32>
    %272 = arith.negf %271 : vector<8x128xf32>
    %273 = math.exp %272 : vector<8x128xf32>
    %cst_59 = arith.constant 1.000000e+00 : f32
    %274 = vector.broadcast %cst_59 : f32 to vector<8x128xf32>
    %275 = arith.addf %274, %273 : vector<8x128xf32>
    %276 = arith.divf %274, %275 : vector<8x128xf32>
    %277 = vector.extract_strided_slice %276 {offsets = [0, 0], sizes = [8, 32], strides = [1, 1]} : vector<8x128xf32> to vector<8x32xf32>
    %278 = vector.extract_strided_slice %276 {offsets = [0, 32], sizes = [8, 32], strides = [1, 1]} : vector<8x128xf32> to vector<8x32xf32>
    %279 = vector.extract_strided_slice %276 {offsets = [0, 96], sizes = [8, 32], strides = [1, 1]} : vector<8x128xf32> to vector<8x32xf32>
    %280 = vector.extract_strided_slice %271 {offsets = [0, 64], sizes = [8, 32], strides = [1, 1]} : vector<8x128xf32> to vector<8x32xf32>
    %281 = math.tanh %280 : vector<8x32xf32>
    %282 = arith.mulf %278, %246 : vector<8x32xf32>
    %283 = arith.mulf %277, %281 : vector<8x32xf32>
    %284 = arith.addf %282, %283 : vector<8x32xf32>
    %285 = math.tanh %284 : vector<8x32xf32>
    %286 = arith.mulf %279, %285 : vector<8x32xf32>
    %cst_60 = arith.constant dense<0.000000e+00> : vector<8x128xf32>
    %287 = tpu.matmul %286, %1, %cst_60 {dimension_numbers = #tpu.dot_dimension_numbers<[1], [0], [0], [1], [0, 0, 1, 1], [], []>} : vector<8x32xf32>, vector<32x128xf32>, vector<8x128xf32> -> vector<8x128xf32>
    %cst_61 = arith.constant dense<0.000000e+00> : vector<8x128xf32>
    %288 = tpu.matmul %267, %2, %cst_61 {dimension_numbers = #tpu.dot_dimension_numbers<[1], [0], [0], [1], [0, 0, 1, 1], [], []>} : vector<8x32xf32>, vector<32x128xf32>, vector<8x128xf32> -> vector<8x128xf32>
    %289 = arith.addf %287, %288 : vector<8x128xf32>
    %290 = arith.addf %289, %3 : vector<8x128xf32>
    %291 = arith.negf %290 : vector<8x128xf32>
    %292 = math.exp %291 : vector<8x128xf32>
    %cst_62 = arith.constant 1.000000e+00 : f32
    %293 = vector.broadcast %cst_62 : f32 to vector<8x128xf32>
    %294 = arith.addf %293, %292 : vector<8x128xf32>
    %295 = arith.divf %293, %294 : vector<8x128xf32>
    %296 = vector.extract_strided_slice %295 {offsets = [0, 0], sizes = [8, 32], strides = [1, 1]} : vector<8x128xf32> to vector<8x32xf32>
    %297 = vector.extract_strided_slice %295 {offsets = [0, 32], sizes = [8, 32], strides = [1, 1]} : vector<8x128xf32> to vector<8x32xf32>
    %298 = vector.extract_strided_slice %295 {offsets = [0, 96], sizes = [8, 32], strides = [1, 1]} : vector<8x128xf32> to vector<8x32xf32>
    %299 = vector.extract_strided_slice %290 {offsets = [0, 64], sizes = [8, 32], strides = [1, 1]} : vector<8x128xf32> to vector<8x32xf32>
    %300 = math.tanh %299 : vector<8x32xf32>
    %301 = arith.mulf %297, %265 : vector<8x32xf32>
    %302 = arith.mulf %296, %300 : vector<8x32xf32>
    %303 = arith.addf %301, %302 : vector<8x32xf32>
    %304 = math.tanh %303 : vector<8x32xf32>
    %305 = arith.mulf %298, %304 : vector<8x32xf32>
    %c0_63 = arith.constant 0 : index
    %c0_64 = arith.constant 0 : index
    %306 = vector.load %arg6[%c0_63, %c0_64] : memref<128x128xf32, #tpu.memory_space<vmem>>, vector<128x128xf32>
    %c0_65 = arith.constant 0 : index
    %c0_66 = arith.constant 0 : index
    %307 = vector.load %arg7[%c0_65, %c0_66] : memref<32x128xf32, #tpu.memory_space<vmem>>, vector<32x128xf32>
    %c0_67 = arith.constant 0 : index
    %c0_68 = arith.constant 0 : index
    %308 = vector.load %arg8[%c0_67, %c0_68] : memref<32x128xf32, #tpu.memory_space<vmem>>, vector<32x128xf32>
    %c0_69 = arith.constant 0 : index
    %c0_70 = arith.constant 0 : index
    %309 = vector.load %arg9[%c0_69, %c0_70] : memref<32x128xf32, #tpu.memory_space<vmem>>, vector<32x128xf32>
    %c0_71 = arith.constant 0 : index
    %c0_72 = arith.constant 0 : index
    %310 = vector.load %arg10[%c0_71, %c0_72] : memref<8x128xf32, #tpu.memory_space<vmem>>, vector<8x128xf32>
    %c0_73 = arith.constant 0 : index
    %c0_74 = arith.constant 0 : index
    %311 = vector.load %arg11[%c0_73, %c0_74] : memref<32x128xf32, #tpu.memory_space<vmem>>, vector<32x128xf32>
    %c0_75 = arith.constant 0 : index
    %c0_76 = arith.constant 0 : index
    %312 = vector.load %arg12[%c0_75, %c0_76] : memref<8x128xf32, #tpu.memory_space<vmem>>, vector<8x128xf32>
    %313 = tpu.iota {dimensions = array<i32: 1>} : vector<8x128xi32>
    %314 = arith.sitofp %313 : vector<8x128xi32> to vector<8x128xf32>
    %cst_77 = arith.constant 1.700000e+01 : f32
    %315 = vector.broadcast %cst_77 : f32 to vector<8x128xf32>
    %316 = arith.cmpf olt, %314, %315 : vector<8x128xf32>
    %cst_78 = arith.constant 1.600000e+01 : f32
    %317 = vector.broadcast %cst_78 : f32 to vector<8x128xf32>
    %318 = arith.cmpf oeq, %314, %317 : vector<8x128xf32>
    %319 = arith.extui %318 : vector<8x128xi1> to vector<8x128xi32>
    %320 = arith.sitofp %319 : vector<8x128xi32> to vector<8x128xf32>
    %cst_79 = arith.constant dense<0.000000e+00> : vector<8x128xf32>
    %321 = tpu.matmul %320, %306, %cst_79 {dimension_numbers = #tpu.dot_dimension_numbers<[1], [0], [0], [1], [0, 0, 1, 1], [], []>} : vector<8x128xf32>, vector<128x128xf32>, vector<8x128xf32> -> vector<8x128xf32>
    %cst_80 = arith.constant dense<0.000000e+00> : vector<8x128xf32>
    %322 = tpu.matmul %286, %307, %cst_80 {dimension_numbers = #tpu.dot_dimension_numbers<[1], [0], [0], [1], [0, 0, 1, 1], [], []>} : vector<8x32xf32>, vector<32x128xf32>, vector<8x128xf32> -> vector<8x128xf32>
    %323 = arith.addf %321, %322 : vector<8x128xf32>
    %324 = arith.negf %323 : vector<8x128xf32>
    %325 = math.exp %324 : vector<8x128xf32>
    %cst_81 = arith.constant 1.000000e+00 : f32
    %326 = vector.broadcast %cst_81 : f32 to vector<8x128xf32>
    %327 = arith.addf %326, %325 : vector<8x128xf32>
    %328 = arith.divf %326, %327 : vector<8x128xf32>
    %329 = vector.extract_strided_slice %328 {offsets = [0, 0], sizes = [8, 32], strides = [1, 1]} : vector<8x128xf32> to vector<8x32xf32>
    %330 = vector.extract_strided_slice %328 {offsets = [0, 32], sizes = [8, 32], strides = [1, 1]} : vector<8x128xf32> to vector<8x32xf32>
    %331 = vector.extract_strided_slice %328 {offsets = [0, 96], sizes = [8, 32], strides = [1, 1]} : vector<8x128xf32> to vector<8x32xf32>
    %332 = vector.extract_strided_slice %323 {offsets = [0, 64], sizes = [8, 32], strides = [1, 1]} : vector<8x128xf32> to vector<8x32xf32>
    %333 = math.tanh %332 : vector<8x32xf32>
    %334 = arith.mulf %330, %284 : vector<8x32xf32>
    %335 = arith.mulf %329, %333 : vector<8x32xf32>
    %336 = arith.addf %334, %335 : vector<8x32xf32>
    %337 = math.tanh %336 : vector<8x32xf32>
    %338 = arith.mulf %331, %337 : vector<8x32xf32>
    %cst_82 = arith.constant dense<0.000000e+00> : vector<8x128xf32>
    %339 = tpu.matmul %338, %308, %cst_82 {dimension_numbers = #tpu.dot_dimension_numbers<[1], [0], [0], [1], [0, 0, 1, 1], [], []>} : vector<8x32xf32>, vector<32x128xf32>, vector<8x128xf32> -> vector<8x128xf32>
    %cst_83 = arith.constant dense<0.000000e+00> : vector<8x128xf32>
    %340 = tpu.matmul %305, %309, %cst_83 {dimension_numbers = #tpu.dot_dimension_numbers<[1], [0], [0], [1], [0, 0, 1, 1], [], []>} : vector<8x32xf32>, vector<32x128xf32>, vector<8x128xf32> -> vector<8x128xf32>
    %341 = arith.addf %339, %340 : vector<8x128xf32>
    %342 = arith.addf %341, %310 : vector<8x128xf32>
    %343 = arith.negf %342 : vector<8x128xf32>
    %344 = math.exp %343 : vector<8x128xf32>
    %cst_84 = arith.constant 1.000000e+00 : f32
    %345 = vector.broadcast %cst_84 : f32 to vector<8x128xf32>
    %346 = arith.addf %345, %344 : vector<8x128xf32>
    %347 = arith.divf %345, %346 : vector<8x128xf32>
    %348 = vector.extract_strided_slice %347 {offsets = [0, 0], sizes = [8, 32], strides = [1, 1]} : vector<8x128xf32> to vector<8x32xf32>
    %349 = vector.extract_strided_slice %347 {offsets = [0, 32], sizes = [8, 32], strides = [1, 1]} : vector<8x128xf32> to vector<8x32xf32>
    %350 = vector.extract_strided_slice %347 {offsets = [0, 96], sizes = [8, 32], strides = [1, 1]} : vector<8x128xf32> to vector<8x32xf32>
    %351 = vector.extract_strided_slice %342 {offsets = [0, 64], sizes = [8, 32], strides = [1, 1]} : vector<8x128xf32> to vector<8x32xf32>
    %352 = math.tanh %351 : vector<8x32xf32>
    %353 = arith.mulf %349, %303 : vector<8x32xf32>
    %354 = arith.mulf %348, %352 : vector<8x32xf32>
    %355 = arith.addf %353, %354 : vector<8x32xf32>
    %356 = math.tanh %355 : vector<8x32xf32>
    %357 = arith.mulf %350, %356 : vector<8x32xf32>
    %cst_85 = arith.constant dense<0.000000e+00> : vector<8x128xf32>
    %358 = tpu.matmul %357, %311, %cst_85 {dimension_numbers = #tpu.dot_dimension_numbers<[1], [0], [0], [1], [0, 0, 1, 1], [], []>} : vector<8x32xf32>, vector<32x128xf32>, vector<8x128xf32> -> vector<8x128xf32>
    %359 = arith.addf %358, %312 : vector<8x128xf32>
    %c0_86 = arith.constant 0 : index
    %c0_87 = arith.constant 0 : index
    %c0_88 = arith.constant 0 : index
    %360 = vector.load %arg13[%c0_86, %c0_87, %c0_88] : memref<8x8x128xf32, #tpu.memory_space<vmem>>, vector<1x8x128xf32>
    %361 = vector.shape_cast %360 : vector<1x8x128xf32> to vector<8x128xf32>
    %362 = vector.shape_cast %359 : vector<8x128xf32> to vector<1x8x128xf32>
    tpu.vector_store %arg13[%c0_86, %c0_87, %c0_88], %362 {strides = array<i32>} : memref<8x8x128xf32, #tpu.memory_space<vmem>>, vector<1x8x128xf32>,
    %cst_89 = arith.constant -1.000000e+30 : f32
    %363 = vector.broadcast %cst_89 : f32 to vector<8x128xf32>
    %364 = arith.select %316, %359, %363 : vector<8x128xi1>, vector<8x128xf32>
    %cst_90 = arith.constant dense<0xFF800000> : vector<8xf32>
    %365 = vector.multi_reduction <maximumf>, %364, %cst_90 [1] : vector<8x128xf32> to vector<8xf32>
    %366 = vector.shape_cast %365 : vector<8xf32> to vector<8x1xf32>
    %367 = vector.broadcast %366 : vector<8x1xf32> to vector<8x128xf32>
    %368 = arith.cmpf oeq, %364, %367 : vector<8x128xf32>
    %cst_91 = arith.constant 1.280000e+02 : f32
    %369 = vector.broadcast %cst_91 : f32 to vector<8x128xf32>
    %370 = arith.select %368, %314, %369 : vector<8x128xi1>, vector<8x128xf32>
    %cst_92 = arith.constant dense<0x7F800000> : vector<8xf32>
    %371 = vector.multi_reduction <minimumf>, %370, %cst_92 [1] : vector<8x128xf32> to vector<8xf32>
    %372 = vector.shape_cast %371 : vector<8xf32> to vector<8x1xf32>
    %373 = vector.broadcast %372 : vector<8x1xf32> to vector<8x128xf32>
    %374 = arith.cmpf oeq, %314, %373 : vector<8x128xf32>
    %375 = arith.extui %374 : vector<8x128xi1> to vector<8x128xi32>
    %376 = arith.sitofp %375 : vector<8x128xi32> to vector<8x128xf32>
    %377 = arith.select %316, %376, %359 : vector<8x128xi1>, vector<8x128xf32>
    %cst_93 = arith.constant dense<0.000000e+00> : vector<8x128xf32>
    %378 = tpu.matmul %377, %306, %cst_93 {dimension_numbers = #tpu.dot_dimension_numbers<[1], [0], [0], [1], [0, 0, 1, 1], [], []>} : vector<8x128xf32>, vector<128x128xf32>, vector<8x128xf32> -> vector<8x128xf32>
    %cst_94 = arith.constant dense<0.000000e+00> : vector<8x128xf32>
    %379 = tpu.matmul %338, %307, %cst_94 {dimension_numbers = #tpu.dot_dimension_numbers<[1], [0], [0], [1], [0, 0, 1, 1], [], []>} : vector<8x32xf32>, vector<32x128xf32>, vector<8x128xf32> -> vector<8x128xf32>
    %380 = arith.addf %378, %379 : vector<8x128xf32>
    %381 = arith.negf %380 : vector<8x128xf32>
    %382 = math.exp %381 : vector<8x128xf32>
    %cst_95 = arith.constant 1.000000e+00 : f32
    %383 = vector.broadcast %cst_95 : f32 to vector<8x128xf32>
    %384 = arith.addf %383, %382 : vector<8x128xf32>
    %385 = arith.divf %383, %384 : vector<8x128xf32>
    %386 = vector.extract_strided_slice %385 {offsets = [0, 0], sizes = [8, 32], strides = [1, 1]} : vector<8x128xf32> to vector<8x32xf32>
    %387 = vector.extract_strided_slice %385 {offsets = [0, 32], sizes = [8, 32], strides = [1, 1]} : vector<8x128xf32> to vector<8x32xf32>
    %388 = vector.extract_strided_slice %385 {offsets = [0, 96], sizes = [8, 32], strides = [1, 1]} : vector<8x128xf32> to vector<8x32xf32>
    %389 = vector.extract_strided_slice %380 {offsets = [0, 64], sizes = [8, 32], strides = [1, 1]} : vector<8x128xf32> to vector<8x32xf32>
    %390 = math.tanh %389 : vector<8x32xf32>
    %391 = arith.mulf %387, %336 : vector<8x32xf32>
    %392 = arith.mulf %386, %390 : vector<8x32xf32>
    %393 = arith.addf %391, %392 : vector<8x32xf32>
    %394 = math.tanh %393 : vector<8x32xf32>
    %395 = arith.mulf %388, %394 : vector<8x32xf32>
    %cst_96 = arith.constant dense<0.000000e+00> : vector<8x128xf32>
    %396 = tpu.matmul %395, %308, %cst_96 {dimension_numbers = #tpu.dot_dimension_numbers<[1], [0], [0], [1], [0, 0, 1, 1], [], []>} : vector<8x32xf32>, vector<32x128xf32>, vector<8x128xf32> -> vector<8x128xf32>
    %cst_97 = arith.constant dense<0.000000e+00> : vector<8x128xf32>
    %397 = tpu.matmul %357, %309, %cst_97 {dimension_numbers = #tpu.dot_dimension_numbers<[1], [0], [0], [1], [0, 0, 1, 1], [], []>} : vector<8x32xf32>, vector<32x128xf32>, vector<8x128xf32> -> vector<8x128xf32>
    %398 = arith.addf %396, %397 : vector<8x128xf32>
    %399 = arith.addf %398, %310 : vector<8x128xf32>
    %400 = arith.negf %399 : vector<8x128xf32>
    %401 = math.exp %400 : vector<8x128xf32>
    %cst_98 = arith.constant 1.000000e+00 : f32
    %402 = vector.broadcast %cst_98 : f32 to vector<8x128xf32>
    %403 = arith.addf %402, %401 : vector<8x128xf32>
    %404 = arith.divf %402, %403 : vector<8x128xf32>
    %405 = vector.extract_strided_slice %404 {offsets = [0, 0], sizes = [8, 32], strides = [1, 1]} : vector<8x128xf32> to vector<8x32xf32>
    %406 = vector.extract_strided_slice %404 {offsets = [0, 32], sizes = [8, 32], strides = [1, 1]} : vector<8x128xf32> to vector<8x32xf32>
    %407 = vector.extract_strided_slice %404 {offsets = [0, 96], sizes = [8, 32], strides = [1, 1]} : vector<8x128xf32> to vector<8x32xf32>
    %408 = vector.extract_strided_slice %399 {offsets = [0, 64], sizes = [8, 32], strides = [1, 1]} : vector<8x128xf32> to vector<8x32xf32>
    %409 = math.tanh %408 : vector<8x32xf32>
    %410 = arith.mulf %406, %355 : vector<8x32xf32>
    %411 = arith.mulf %405, %409 : vector<8x32xf32>
    %412 = arith.addf %410, %411 : vector<8x32xf32>
    %413 = math.tanh %412 : vector<8x32xf32>
    %414 = arith.mulf %407, %413 : vector<8x32xf32>
    %cst_99 = arith.constant dense<0.000000e+00> : vector<8x128xf32>
    %415 = tpu.matmul %414, %311, %cst_99 {dimension_numbers = #tpu.dot_dimension_numbers<[1], [0], [0], [1], [0, 0, 1, 1], [], []>} : vector<8x32xf32>, vector<32x128xf32>, vector<8x128xf32> -> vector<8x128xf32>
    %416 = arith.addf %415, %312 : vector<8x128xf32>
    %c1_100 = arith.constant 1 : index
    %c0_101 = arith.constant 0 : index
    %c0_102 = arith.constant 0 : index
    %417 = vector.load %arg13[%c1_100, %c0_101, %c0_102] : memref<8x8x128xf32, #tpu.memory_space<vmem>>, vector<1x8x128xf32>
    %418 = vector.shape_cast %417 : vector<1x8x128xf32> to vector<8x128xf32>
    %419 = vector.shape_cast %416 : vector<8x128xf32> to vector<1x8x128xf32>
    tpu.vector_store %arg13[%c1_100, %c0_101, %c0_102], %419 {strides = array<i32>} : memref<8x8x128xf32, #tpu.memory_space<vmem>>, vector<1x8x128xf32>,
    %cst_103 = arith.constant -1.000000e+30 : f32
    %420 = vector.broadcast %cst_103 : f32 to vector<8x128xf32>
    %421 = arith.select %316, %416, %420 : vector<8x128xi1>, vector<8x128xf32>
    %cst_104 = arith.constant dense<0xFF800000> : vector<8xf32>
    %422 = vector.multi_reduction <maximumf>, %421, %cst_104 [1] : vector<8x128xf32> to vector<8xf32>
    %423 = vector.shape_cast %422 : vector<8xf32> to vector<8x1xf32>
    %424 = vector.broadcast %423 : vector<8x1xf32> to vector<8x128xf32>
    %425 = arith.cmpf oeq, %421, %424 : vector<8x128xf32>
    %cst_105 = arith.constant 1.280000e+02 : f32
    %426 = vector.broadcast %cst_105 : f32 to vector<8x128xf32>
    %427 = arith.select %425, %314, %426 : vector<8x128xi1>, vector<8x128xf32>
    %cst_106 = arith.constant dense<0x7F800000> : vector<8xf32>
    %428 = vector.multi_reduction <minimumf>, %427, %cst_106 [1] : vector<8x128xf32> to vector<8xf32>
    %429 = vector.shape_cast %428 : vector<8xf32> to vector<8x1xf32>
    %430 = vector.broadcast %429 : vector<8x1xf32> to vector<8x128xf32>
    %431 = arith.cmpf oeq, %314, %430 : vector<8x128xf32>
    %432 = arith.extui %431 : vector<8x128xi1> to vector<8x128xi32>
    %433 = arith.sitofp %432 : vector<8x128xi32> to vector<8x128xf32>
    %434 = arith.select %316, %433, %416 : vector<8x128xi1>, vector<8x128xf32>
    %cst_107 = arith.constant dense<0.000000e+00> : vector<8x128xf32>
    %435 = tpu.matmul %434, %306, %cst_107 {dimension_numbers = #tpu.dot_dimension_numbers<[1], [0], [0], [1], [0, 0, 1, 1], [], []>} : vector<8x128xf32>, vector<128x128xf32>, vector<8x128xf32> -> vector<8x128xf32>
    %cst_108 = arith.constant dense<0.000000e+00> : vector<8x128xf32>
    %436 = tpu.matmul %395, %307, %cst_108 {dimension_numbers = #tpu.dot_dimension_numbers<[1], [0], [0], [1], [0, 0, 1, 1], [], []>} : vector<8x32xf32>, vector<32x128xf32>, vector<8x128xf32> -> vector<8x128xf32>
    %437 = arith.addf %435, %436 : vector<8x128xf32>
    %438 = arith.negf %437 : vector<8x128xf32>
    %439 = math.exp %438 : vector<8x128xf32>
    %cst_109 = arith.constant 1.000000e+00 : f32
    %440 = vector.broadcast %cst_109 : f32 to vector<8x128xf32>
    %441 = arith.addf %440, %439 : vector<8x128xf32>
    %442 = arith.divf %440, %441 : vector<8x128xf32>
    %443 = vector.extract_strided_slice %442 {offsets = [0, 0], sizes = [8, 32], strides = [1, 1]} : vector<8x128xf32> to vector<8x32xf32>
    %444 = vector.extract_strided_slice %442 {offsets = [0, 32], sizes = [8, 32], strides = [1, 1]} : vector<8x128xf32> to vector<8x32xf32>
    %445 = vector.extract_strided_slice %442 {offsets = [0, 96], sizes = [8, 32], strides = [1, 1]} : vector<8x128xf32> to vector<8x32xf32>
    %446 = vector.extract_strided_slice %437 {offsets = [0, 64], sizes = [8, 32], strides = [1, 1]} : vector<8x128xf32> to vector<8x32xf32>
    %447 = math.tanh %446 : vector<8x32xf32>
    %448 = arith.mulf %444, %393 : vector<8x32xf32>
    %449 = arith.mulf %443, %447 : vector<8x32xf32>
    %450 = arith.addf %448, %449 : vector<8x32xf32>
    %451 = math.tanh %450 : vector<8x32xf32>
    %452 = arith.mulf %445, %451 : vector<8x32xf32>
    %cst_110 = arith.constant dense<0.000000e+00> : vector<8x128xf32>
    %453 = tpu.matmul %452, %308, %cst_110 {dimension_numbers = #tpu.dot_dimension_numbers<[1], [0], [0], [1], [0, 0, 1, 1], [], []>} : vector<8x32xf32>, vector<32x128xf32>, vector<8x128xf32> -> vector<8x128xf32>
    %cst_111 = arith.constant dense<0.000000e+00> : vector<8x128xf32>
    %454 = tpu.matmul %414, %309, %cst_111 {dimension_numbers = #tpu.dot_dimension_numbers<[1], [0], [0], [1], [0, 0, 1, 1], [], []>} : vector<8x32xf32>, vector<32x128xf32>, vector<8x128xf32> -> vector<8x128xf32>
    %455 = arith.addf %453, %454 : vector<8x128xf32>
    %456 = arith.addf %455, %310 : vector<8x128xf32>
    %457 = arith.negf %456 : vector<8x128xf32>
    %458 = math.exp %457 : vector<8x128xf32>
    %cst_112 = arith.constant 1.000000e+00 : f32
    %459 = vector.broadcast %cst_112 : f32 to vector<8x128xf32>
    %460 = arith.addf %459, %458 : vector<8x128xf32>
    %461 = arith.divf %459, %460 : vector<8x128xf32>
    %462 = vector.extract_strided_slice %461 {offsets = [0, 0], sizes = [8, 32], strides = [1, 1]} : vector<8x128xf32> to vector<8x32xf32>
    %463 = vector.extract_strided_slice %461 {offsets = [0, 32], sizes = [8, 32], strides = [1, 1]} : vector<8x128xf32> to vector<8x32xf32>
    %464 = vector.extract_strided_slice %461 {offsets = [0, 96], sizes = [8, 32], strides = [1, 1]} : vector<8x128xf32> to vector<8x32xf32>
    %465 = vector.extract_strided_slice %456 {offsets = [0, 64], sizes = [8, 32], strides = [1, 1]} : vector<8x128xf32> to vector<8x32xf32>
    %466 = math.tanh %465 : vector<8x32xf32>
    %467 = arith.mulf %463, %412 : vector<8x32xf32>
    %468 = arith.mulf %462, %466 : vector<8x32xf32>
    %469 = arith.addf %467, %468 : vector<8x32xf32>
    %470 = math.tanh %469 : vector<8x32xf32>
    %471 = arith.mulf %464, %470 : vector<8x32xf32>
    %cst_113 = arith.constant dense<0.000000e+00> : vector<8x128xf32>
    %472 = tpu.matmul %471, %311, %cst_113 {dimension_numbers = #tpu.dot_dimension_numbers<[1], [0], [0], [1], [0, 0, 1, 1], [], []>} : vector<8x32xf32>, vector<32x128xf32>, vector<8x128xf32> -> vector<8x128xf32>
    %473 = arith.addf %472, %312 : vector<8x128xf32>
    %c2_114 = arith.constant 2 : index
    %c0_115 = arith.constant 0 : index
    %c0_116 = arith.constant 0 : index
    %474 = vector.load %arg13[%c2_114, %c0_115, %c0_116] : memref<8x8x128xf32, #tpu.memory_space<vmem>>, vector<1x8x128xf32>
    %475 = vector.shape_cast %474 : vector<1x8x128xf32> to vector<8x128xf32>
    %476 = vector.shape_cast %473 : vector<8x128xf32> to vector<1x8x128xf32>
    tpu.vector_store %arg13[%c2_114, %c0_115, %c0_116], %476 {strides = array<i32>} : memref<8x8x128xf32, #tpu.memory_space<vmem>>, vector<1x8x128xf32>,
    %c2_117 = arith.constant 2 : index
    %c0_118 = arith.constant 0 : index
    %c0_119 = arith.constant 0 : index
    %477 = vector.load %arg5[%c2_117, %c0_118, %c0_119] : memref<8x8x128xf32, #tpu.memory_space<vmem>>, vector<1x8x128xf32>
    %478 = vector.shape_cast %477 : vector<1x8x128xf32> to vector<8x128xf32>
    %cst_120 = arith.constant dense<0.000000e+00> : vector<8x128xf32>
    %479 = tpu.matmul %478, %306, %cst_120 {dimension_numbers = #tpu.dot_dimension_numbers<[1], [0], [0], [1], [0, 0, 1, 1], [], []>} : vector<8x128xf32>, vector<128x128xf32>, vector<8x128xf32> -> vector<8x128xf32>
    %cst_121 = arith.constant dense<0.000000e+00> : vector<8x128xf32>
    %480 = tpu.matmul %452, %307, %cst_121 {dimension_numbers = #tpu.dot_dimension_numbers<[1], [0], [0], [1], [0, 0, 1, 1], [], []>} : vector<8x32xf32>, vector<32x128xf32>, vector<8x128xf32> -> vector<8x128xf32>
    %481 = arith.addf %479, %480 : vector<8x128xf32>
    %482 = arith.negf %481 : vector<8x128xf32>
    %483 = math.exp %482 : vector<8x128xf32>
    %cst_122 = arith.constant 1.000000e+00 : f32
    %484 = vector.broadcast %cst_122 : f32 to vector<8x128xf32>
    %485 = arith.addf %484, %483 : vector<8x128xf32>
    %486 = arith.divf %484, %485 : vector<8x128xf32>
    %487 = vector.extract_strided_slice %486 {offsets = [0, 0], sizes = [8, 32], strides = [1, 1]} : vector<8x128xf32> to vector<8x32xf32>
    %488 = vector.extract_strided_slice %486 {offsets = [0, 32], sizes = [8, 32], strides = [1, 1]} : vector<8x128xf32> to vector<8x32xf32>
    %489 = vector.extract_strided_slice %486 {offsets = [0, 96], sizes = [8, 32], strides = [1, 1]} : vector<8x128xf32> to vector<8x32xf32>
    %490 = vector.extract_strided_slice %481 {offsets = [0, 64], sizes = [8, 32], strides = [1, 1]} : vector<8x128xf32> to vector<8x32xf32>
    %491 = math.tanh %490 : vector<8x32xf32>
    %492 = arith.mulf %488, %450 : vector<8x32xf32>
    %493 = arith.mulf %487, %491 : vector<8x32xf32>
    %494 = arith.addf %492, %493 : vector<8x32xf32>
    %495 = math.tanh %494 : vector<8x32xf32>
    %496 = arith.mulf %489, %495 : vector<8x32xf32>
    %cst_123 = arith.constant dense<0.000000e+00> : vector<8x128xf32>
    %497 = tpu.matmul %496, %308, %cst_123 {dimension_numbers = #tpu.dot_dimension_numbers<[1], [0], [0], [1], [0, 0, 1, 1], [], []>} : vector<8x32xf32>, vector<32x128xf32>, vector<8x128xf32> -> vector<8x128xf32>
    %cst_124 = arith.constant dense<0.000000e+00> : vector<8x128xf32>
    %498 = tpu.matmul %471, %309, %cst_124 {dimension_numbers = #tpu.dot_dimension_numbers<[1], [0], [0], [1], [0, 0, 1, 1], [], []>} : vector<8x32xf32>, vector<32x128xf32>, vector<8x128xf32> -> vector<8x128xf32>
    %499 = arith.addf %497, %498 : vector<8x128xf32>
    %500 = arith.addf %499, %310 : vector<8x128xf32>
    %501 = arith.negf %500 : vector<8x128xf32>
    %502 = math.exp %501 : vector<8x128xf32>
    %cst_125 = arith.constant 1.000000e+00 : f32
    %503 = vector.broadcast %cst_125 : f32 to vector<8x128xf32>
    %504 = arith.addf %503, %502 : vector<8x128xf32>
    %505 = arith.divf %503, %504 : vector<8x128xf32>
    %506 = vector.extract_strided_slice %505 {offsets = [0, 0], sizes = [8, 32], strides = [1, 1]} : vector<8x128xf32> to vector<8x32xf32>
    %507 = vector.extract_strided_slice %505 {offsets = [0, 32], sizes = [8, 32], strides = [1, 1]} : vector<8x128xf32> to vector<8x32xf32>
    %508 = vector.extract_strided_slice %505 {offsets = [0, 96], sizes = [8, 32], strides = [1, 1]} : vector<8x128xf32> to vector<8x32xf32>
    %509 = vector.extract_strided_slice %500 {offsets = [0, 64], sizes = [8, 32], strides = [1, 1]} : vector<8x128xf32> to vector<8x32xf32>
    %510 = math.tanh %509 : vector<8x32xf32>
    %511 = arith.mulf %507, %469 : vector<8x32xf32>
    %512 = arith.mulf %506, %510 : vector<8x32xf32>
    %513 = arith.addf %511, %512 : vector<8x32xf32>
    %514 = math.tanh %513 : vector<8x32xf32>
    %515 = arith.mulf %508, %514 : vector<8x32xf32>
    %cst_126 = arith.constant dense<0.000000e+00> : vector<8x128xf32>
    %516 = tpu.matmul %515, %311, %cst_126 {dimension_numbers = #tpu.dot_dimension_numbers<[1], [0], [0], [1], [0, 0, 1, 1], [], []>} : vector<8x32xf32>, vector<32x128xf32>, vector<8x128xf32> -> vector<8x128xf32>
    %517 = arith.addf %516, %312 : vector<8x128xf32>
    %c3_127 = arith.constant 3 : index
    %c0_128 = arith.constant 0 : index
    %c0_129 = arith.constant 0 : index
    %518 = vector.load %arg13[%c3_127, %c0_128, %c0_129] : memref<8x8x128xf32, #tpu.memory_space<vmem>>, vector<1x8x128xf32>
    %519 = vector.shape_cast %518 : vector<1x8x128xf32> to vector<8x128xf32>
    %520 = vector.shape_cast %517 : vector<8x128xf32> to vector<1x8x128xf32>
    tpu.vector_store %arg13[%c3_127, %c0_128, %c0_129], %520 {strides = array<i32>} : memref<8x8x128xf32, #tpu.memory_space<vmem>>, vector<1x8x128xf32>,
    %c3_130 = arith.constant 3 : index
    %c0_131 = arith.constant 0 : index
    %c0_132 = arith.constant 0 : index
    %521 = vector.load %arg5[%c3_130, %c0_131, %c0_132] : memref<8x8x128xf32, #tpu.memory_space<vmem>>, vector<1x8x128xf32>
    %522 = vector.shape_cast %521 : vector<1x8x128xf32> to vector<8x128xf32>
    %cst_133 = arith.constant dense<0.000000e+00> : vector<8x128xf32>
    %523 = tpu.matmul %522, %306, %cst_133 {dimension_numbers = #tpu.dot_dimension_numbers<[1], [0], [0], [1], [0, 0, 1, 1], [], []>} : vector<8x128xf32>, vector<128x128xf32>, vector<8x128xf32> -> vector<8x128xf32>
    %cst_134 = arith.constant dense<0.000000e+00> : vector<8x128xf32>
    %524 = tpu.matmul %496, %307, %cst_134 {dimension_numbers = #tpu.dot_dimension_numbers<[1], [0], [0], [1], [0, 0, 1, 1], [], []>} : vector<8x32xf32>, vector<32x128xf32>, vector<8x128xf32> -> vector<8x128xf32>
    %525 = arith.addf %523, %524 : vector<8x128xf32>
    %526 = arith.negf %525 : vector<8x128xf32>
    %527 = math.exp %526 : vector<8x128xf32>
    %cst_135 = arith.constant 1.000000e+00 : f32
    %528 = vector.broadcast %cst_135 : f32 to vector<8x128xf32>
    %529 = arith.addf %528, %527 : vector<8x128xf32>
    %530 = arith.divf %528, %529 : vector<8x128xf32>
    %531 = vector.extract_strided_slice %530 {offsets = [0, 0], sizes = [8, 32], strides = [1, 1]} : vector<8x128xf32> to vector<8x32xf32>
    %532 = vector.extract_strided_slice %530 {offsets = [0, 32], sizes = [8, 32], strides = [1, 1]} : vector<8x128xf32> to vector<8x32xf32>
    %533 = vector.extract_strided_slice %530 {offsets = [0, 96], sizes = [8, 32], strides = [1, 1]} : vector<8x128xf32> to vector<8x32xf32>
    %534 = vector.extract_strided_slice %525 {offsets = [0, 64], sizes = [8, 32], strides = [1, 1]} : vector<8x128xf32> to vector<8x32xf32>
    %535 = math.tanh %534 : vector<8x32xf32>
    %536 = arith.mulf %532, %494 : vector<8x32xf32>
    %537 = arith.mulf %531, %535 : vector<8x32xf32>
    %538 = arith.addf %536, %537 : vector<8x32xf32>
    %539 = math.tanh %538 : vector<8x32xf32>
    %540 = arith.mulf %533, %539 : vector<8x32xf32>
    %cst_136 = arith.constant dense<0.000000e+00> : vector<8x128xf32>
    %541 = tpu.matmul %540, %308, %cst_136 {dimension_numbers = #tpu.dot_dimension_numbers<[1], [0], [0], [1], [0, 0, 1, 1], [], []>} : vector<8x32xf32>, vector<32x128xf32>, vector<8x128xf32> -> vector<8x128xf32>
    %cst_137 = arith.constant dense<0.000000e+00> : vector<8x128xf32>
    %542 = tpu.matmul %515, %309, %cst_137 {dimension_numbers = #tpu.dot_dimension_numbers<[1], [0], [0], [1], [0, 0, 1, 1], [], []>} : vector<8x32xf32>, vector<32x128xf32>, vector<8x128xf32> -> vector<8x128xf32>
    %543 = arith.addf %541, %542 : vector<8x128xf32>
    %544 = arith.addf %543, %310 : vector<8x128xf32>
    %545 = arith.negf %544 : vector<8x128xf32>
    %546 = math.exp %545 : vector<8x128xf32>
    %cst_138 = arith.constant 1.000000e+00 : f32
    %547 = vector.broadcast %cst_138 : f32 to vector<8x128xf32>
    %548 = arith.addf %547, %546 : vector<8x128xf32>
    %549 = arith.divf %547, %548 : vector<8x128xf32>
    %550 = vector.extract_strided_slice %549 {offsets = [0, 0], sizes = [8, 32], strides = [1, 1]} : vector<8x128xf32> to vector<8x32xf32>
    %551 = vector.extract_strided_slice %549 {offsets = [0, 32], sizes = [8, 32], strides = [1, 1]} : vector<8x128xf32> to vector<8x32xf32>
    %552 = vector.extract_strided_slice %549 {offsets = [0, 96], sizes = [8, 32], strides = [1, 1]} : vector<8x128xf32> to vector<8x32xf32>
    %553 = vector.extract_strided_slice %544 {offsets = [0, 64], sizes = [8, 32], strides = [1, 1]} : vector<8x128xf32> to vector<8x32xf32>
    %554 = math.tanh %553 : vector<8x32xf32>
    %555 = arith.mulf %551, %513 : vector<8x32xf32>
    %556 = arith.mulf %550, %554 : vector<8x32xf32>
    %557 = arith.addf %555, %556 : vector<8x32xf32>
    %558 = math.tanh %557 : vector<8x32xf32>
    %559 = arith.mulf %552, %558 : vector<8x32xf32>
    %cst_139 = arith.constant dense<0.000000e+00> : vector<8x128xf32>
    %560 = tpu.matmul %559, %311, %cst_139 {dimension_numbers = #tpu.dot_dimension_numbers<[1], [0], [0], [1], [0, 0, 1, 1], [], []>} : vector<8x32xf32>, vector<32x128xf32>, vector<8x128xf32> -> vector<8x128xf32>
    %561 = arith.addf %560, %312 : vector<8x128xf32>
    %c4_140 = arith.constant 4 : index
    %c0_141 = arith.constant 0 : index
    %c0_142 = arith.constant 0 : index
    %562 = vector.load %arg13[%c4_140, %c0_141, %c0_142] : memref<8x8x128xf32, #tpu.memory_space<vmem>>, vector<1x8x128xf32>
    %563 = vector.shape_cast %562 : vector<1x8x128xf32> to vector<8x128xf32>
    %564 = vector.shape_cast %561 : vector<8x128xf32> to vector<1x8x128xf32>
    tpu.vector_store %arg13[%c4_140, %c0_141, %c0_142], %564 {strides = array<i32>} : memref<8x8x128xf32, #tpu.memory_space<vmem>>, vector<1x8x128xf32>,
    %cst_143 = arith.constant -1.000000e+30 : f32
    %565 = vector.broadcast %cst_143 : f32 to vector<8x128xf32>
    %566 = arith.select %316, %561, %565 : vector<8x128xi1>, vector<8x128xf32>
    %cst_144 = arith.constant dense<0xFF800000> : vector<8xf32>
    %567 = vector.multi_reduction <maximumf>, %566, %cst_144 [1] : vector<8x128xf32> to vector<8xf32>
    %568 = vector.shape_cast %567 : vector<8xf32> to vector<8x1xf32>
    %569 = vector.broadcast %568 : vector<8x1xf32> to vector<8x128xf32>
    %570 = arith.cmpf oeq, %566, %569 : vector<8x128xf32>
    %cst_145 = arith.constant 1.280000e+02 : f32
    %571 = vector.broadcast %cst_145 : f32 to vector<8x128xf32>
    %572 = arith.select %570, %314, %571 : vector<8x128xi1>, vector<8x128xf32>
    %cst_146 = arith.constant dense<0x7F800000> : vector<8xf32>
    %573 = vector.multi_reduction <minimumf>, %572, %cst_146 [1] : vector<8x128xf32> to vector<8xf32>
    %574 = vector.shape_cast %573 : vector<8xf32> to vector<8x1xf32>
    %575 = vector.broadcast %574 : vector<8x1xf32> to vector<8x128xf32>
    %576 = arith.cmpf oeq, %314, %575 : vector<8x128xf32>
    %577 = arith.extui %576 : vector<8x128xi1> to vector<8x128xi32>
    %578 = arith.sitofp %577 : vector<8x128xi32> to vector<8x128xf32>
    %579 = arith.select %316, %578, %561 : vector<8x128xi1>, vector<8x128xf32>
    %cst_147 = arith.constant dense<0.000000e+00> : vector<8x128xf32>
    %580 = tpu.matmul %579, %306, %cst_147 {dimension_numbers = #tpu.dot_dimension_numbers<[1], [0], [0], [1], [0, 0, 1, 1], [], []>} : vector<8x128xf32>, vector<128x128xf32>, vector<8x128xf32> -> vector<8x128xf32>
    %cst_148 = arith.constant dense<0.000000e+00> : vector<8x128xf32>
    %581 = tpu.matmul %540, %307, %cst_148 {dimension_numbers = #tpu.dot_dimension_numbers<[1], [0], [0], [1], [0, 0, 1, 1], [], []>} : vector<8x32xf32>, vector<32x128xf32>, vector<8x128xf32> -> vector<8x128xf32>
    %582 = arith.addf %580, %581 : vector<8x128xf32>
    %583 = arith.negf %582 : vector<8x128xf32>
    %584 = math.exp %583 : vector<8x128xf32>
    %cst_149 = arith.constant 1.000000e+00 : f32
    %585 = vector.broadcast %cst_149 : f32 to vector<8x128xf32>
    %586 = arith.addf %585, %584 : vector<8x128xf32>
    %587 = arith.divf %585, %586 : vector<8x128xf32>
    %588 = vector.extract_strided_slice %587 {offsets = [0, 0], sizes = [8, 32], strides = [1, 1]} : vector<8x128xf32> to vector<8x32xf32>
    %589 = vector.extract_strided_slice %587 {offsets = [0, 32], sizes = [8, 32], strides = [1, 1]} : vector<8x128xf32> to vector<8x32xf32>
    %590 = vector.extract_strided_slice %587 {offsets = [0, 96], sizes = [8, 32], strides = [1, 1]} : vector<8x128xf32> to vector<8x32xf32>
    %591 = vector.extract_strided_slice %582 {offsets = [0, 64], sizes = [8, 32], strides = [1, 1]} : vector<8x128xf32> to vector<8x32xf32>
    %592 = math.tanh %591 : vector<8x32xf32>
    %593 = arith.mulf %589, %538 : vector<8x32xf32>
    %594 = arith.mulf %588, %592 : vector<8x32xf32>
    %595 = arith.addf %593, %594 : vector<8x32xf32>
    %596 = math.tanh %595 : vector<8x32xf32>
    %597 = arith.mulf %590, %596 : vector<8x32xf32>
    %cst_150 = arith.constant dense<0.000000e+00> : vector<8x128xf32>
    %598 = tpu.matmul %597, %308, %cst_150 {dimension_numbers = #tpu.dot_dimension_numbers<[1], [0], [0], [1], [0, 0, 1, 1], [], []>} : vector<8x32xf32>, vector<32x128xf32>, vector<8x128xf32> -> vector<8x128xf32>
    %cst_151 = arith.constant dense<0.000000e+00> : vector<8x128xf32>
    %599 = tpu.matmul %559, %309, %cst_151 {dimension_numbers = #tpu.dot_dimension_numbers<[1], [0], [0], [1], [0, 0, 1, 1], [], []>} : vector<8x32xf32>, vector<32x128xf32>, vector<8x128xf32> -> vector<8x128xf32>
    %600 = arith.addf %598, %599 : vector<8x128xf32>
    %601 = arith.addf %600, %310 : vector<8x128xf32>
    %602 = arith.negf %601 : vector<8x128xf32>
    %603 = math.exp %602 : vector<8x128xf32>
    %cst_152 = arith.constant 1.000000e+00 : f32
    %604 = vector.broadcast %cst_152 : f32 to vector<8x128xf32>
    %605 = arith.addf %604, %603 : vector<8x128xf32>
    %606 = arith.divf %604, %605 : vector<8x128xf32>
    %607 = vector.extract_strided_slice %606 {offsets = [0, 0], sizes = [8, 32], strides = [1, 1]} : vector<8x128xf32> to vector<8x32xf32>
    %608 = vector.extract_strided_slice %606 {offsets = [0, 32], sizes = [8, 32], strides = [1, 1]} : vector<8x128xf32> to vector<8x32xf32>
    %609 = vector.extract_strided_slice %606 {offsets = [0, 96], sizes = [8, 32], strides = [1, 1]} : vector<8x128xf32> to vector<8x32xf32>
    %610 = vector.extract_strided_slice %601 {offsets = [0, 64], sizes = [8, 32], strides = [1, 1]} : vector<8x128xf32> to vector<8x32xf32>
    %611 = math.tanh %610 : vector<8x32xf32>
    %612 = arith.mulf %608, %557 : vector<8x32xf32>
    %613 = arith.mulf %607, %611 : vector<8x32xf32>
    %614 = arith.addf %612, %613 : vector<8x32xf32>
    %615 = math.tanh %614 : vector<8x32xf32>
    %616 = arith.mulf %609, %615 : vector<8x32xf32>
    %cst_153 = arith.constant dense<0.000000e+00> : vector<8x128xf32>
    %617 = tpu.matmul %616, %311, %cst_153 {dimension_numbers = #tpu.dot_dimension_numbers<[1], [0], [0], [1], [0, 0, 1, 1], [], []>} : vector<8x32xf32>, vector<32x128xf32>, vector<8x128xf32> -> vector<8x128xf32>
    %618 = arith.addf %617, %312 : vector<8x128xf32>
    %c5_154 = arith.constant 5 : index
    %c0_155 = arith.constant 0 : index
    %c0_156 = arith.constant 0 : index
    %619 = vector.load %arg13[%c5_154, %c0_155, %c0_156] : memref<8x8x128xf32, #tpu.memory_space<vmem>>, vector<1x8x128xf32>
    %620 = vector.shape_cast %619 : vector<1x8x128xf32> to vector<8x128xf32>
    %621 = vector.shape_cast %618 : vector<8x128xf32> to vector<1x8x128xf32>
    tpu.vector_store %arg13[%c5_154, %c0_155, %c0_156], %621 {strides = array<i32>} : memref<8x8x128xf32, #tpu.memory_space<vmem>>, vector<1x8x128xf32>,
    %c5_157 = arith.constant 5 : index
    %c0_158 = arith.constant 0 : index
    %c0_159 = arith.constant 0 : index
    %622 = vector.load %arg5[%c5_157, %c0_158, %c0_159] : memref<8x8x128xf32, #tpu.memory_space<vmem>>, vector<1x8x128xf32>
    %623 = vector.shape_cast %622 : vector<1x8x128xf32> to vector<8x128xf32>
    %cst_160 = arith.constant dense<0.000000e+00> : vector<8x128xf32>
    %624 = tpu.matmul %623, %306, %cst_160 {dimension_numbers = #tpu.dot_dimension_numbers<[1], [0], [0], [1], [0, 0, 1, 1], [], []>} : vector<8x128xf32>, vector<128x128xf32>, vector<8x128xf32> -> vector<8x128xf32>
    %cst_161 = arith.constant dense<0.000000e+00> : vector<8x128xf32>
    %625 = tpu.matmul %597, %307, %cst_161 {dimension_numbers = #tpu.dot_dimension_numbers<[1], [0], [0], [1], [0, 0, 1, 1], [], []>} : vector<8x32xf32>, vector<32x128xf32>, vector<8x128xf32> -> vector<8x128xf32>
    %626 = arith.addf %624, %625 : vector<8x128xf32>
    %627 = arith.negf %626 : vector<8x128xf32>
    %628 = math.exp %627 : vector<8x128xf32>
    %cst_162 = arith.constant 1.000000e+00 : f32
    %629 = vector.broadcast %cst_162 : f32 to vector<8x128xf32>
    %630 = arith.addf %629, %628 : vector<8x128xf32>
    %631 = arith.divf %629, %630 : vector<8x128xf32>
    %632 = vector.extract_strided_slice %631 {offsets = [0, 0], sizes = [8, 32], strides = [1, 1]} : vector<8x128xf32> to vector<8x32xf32>
    %633 = vector.extract_strided_slice %631 {offsets = [0, 32], sizes = [8, 32], strides = [1, 1]} : vector<8x128xf32> to vector<8x32xf32>
    %634 = vector.extract_strided_slice %631 {offsets = [0, 96], sizes = [8, 32], strides = [1, 1]} : vector<8x128xf32> to vector<8x32xf32>
    %635 = vector.extract_strided_slice %626 {offsets = [0, 64], sizes = [8, 32], strides = [1, 1]} : vector<8x128xf32> to vector<8x32xf32>
    %636 = math.tanh %635 : vector<8x32xf32>
    %637 = arith.mulf %633, %595 : vector<8x32xf32>
    %638 = arith.mulf %632, %636 : vector<8x32xf32>
    %639 = arith.addf %637, %638 : vector<8x32xf32>
    %640 = math.tanh %639 : vector<8x32xf32>
    %641 = arith.mulf %634, %640 : vector<8x32xf32>
    %cst_163 = arith.constant dense<0.000000e+00> : vector<8x128xf32>
    %642 = tpu.matmul %641, %308, %cst_163 {dimension_numbers = #tpu.dot_dimension_numbers<[1], [0], [0], [1], [0, 0, 1, 1], [], []>} : vector<8x32xf32>, vector<32x128xf32>, vector<8x128xf32> -> vector<8x128xf32>
    %cst_164 = arith.constant dense<0.000000e+00> : vector<8x128xf32>
    %643 = tpu.matmul %616, %309, %cst_164 {dimension_numbers = #tpu.dot_dimension_numbers<[1], [0], [0], [1], [0, 0, 1, 1], [], []>} : vector<8x32xf32>, vector<32x128xf32>, vector<8x128xf32> -> vector<8x128xf32>
    %644 = arith.addf %642, %643 : vector<8x128xf32>
    %645 = arith.addf %644, %310 : vector<8x128xf32>
    %646 = arith.negf %645 : vector<8x128xf32>
    %647 = math.exp %646 : vector<8x128xf32>
    %cst_165 = arith.constant 1.000000e+00 : f32
    %648 = vector.broadcast %cst_165 : f32 to vector<8x128xf32>
    %649 = arith.addf %648, %647 : vector<8x128xf32>
    %650 = arith.divf %648, %649 : vector<8x128xf32>
    %651 = vector.extract_strided_slice %650 {offsets = [0, 0], sizes = [8, 32], strides = [1, 1]} : vector<8x128xf32> to vector<8x32xf32>
    %652 = vector.extract_strided_slice %650 {offsets = [0, 32], sizes = [8, 32], strides = [1, 1]} : vector<8x128xf32> to vector<8x32xf32>
    %653 = vector.extract_strided_slice %650 {offsets = [0, 96], sizes = [8, 32], strides = [1, 1]} : vector<8x128xf32> to vector<8x32xf32>
    %654 = vector.extract_strided_slice %645 {offsets = [0, 64], sizes = [8, 32], strides = [1, 1]} : vector<8x128xf32> to vector<8x32xf32>
    %655 = math.tanh %654 : vector<8x32xf32>
    %656 = arith.mulf %652, %614 : vector<8x32xf32>
    %657 = arith.mulf %651, %655 : vector<8x32xf32>
    %658 = arith.addf %656, %657 : vector<8x32xf32>
    %659 = math.tanh %658 : vector<8x32xf32>
    %660 = arith.mulf %653, %659 : vector<8x32xf32>
    %cst_166 = arith.constant dense<0.000000e+00> : vector<8x128xf32>
    %661 = tpu.matmul %660, %311, %cst_166 {dimension_numbers = #tpu.dot_dimension_numbers<[1], [0], [0], [1], [0, 0, 1, 1], [], []>} : vector<8x32xf32>, vector<32x128xf32>, vector<8x128xf32> -> vector<8x128xf32>
    %662 = arith.addf %661, %312 : vector<8x128xf32>
    %c6_167 = arith.constant 6 : index
    %c0_168 = arith.constant 0 : index
    %c0_169 = arith.constant 0 : index
    %663 = vector.load %arg13[%c6_167, %c0_168, %c0_169] : memref<8x8x128xf32, #tpu.memory_space<vmem>>, vector<1x8x128xf32>
    %664 = vector.shape_cast %663 : vector<1x8x128xf32> to vector<8x128xf32>
    %665 = vector.shape_cast %662 : vector<8x128xf32> to vector<1x8x128xf32>
    tpu.vector_store %arg13[%c6_167, %c0_168, %c0_169], %665 {strides = array<i32>} : memref<8x8x128xf32, #tpu.memory_space<vmem>>, vector<1x8x128xf32>,
    %cst_170 = arith.constant -1.000000e+30 : f32
    %666 = vector.broadcast %cst_170 : f32 to vector<8x128xf32>
    %667 = arith.select %316, %662, %666 : vector<8x128xi1>, vector<8x128xf32>
    %cst_171 = arith.constant dense<0xFF800000> : vector<8xf32>
    %668 = vector.multi_reduction <maximumf>, %667, %cst_171 [1] : vector<8x128xf32> to vector<8xf32>
    %669 = vector.shape_cast %668 : vector<8xf32> to vector<8x1xf32>
    %670 = vector.broadcast %669 : vector<8x1xf32> to vector<8x128xf32>
    %671 = arith.cmpf oeq, %667, %670 : vector<8x128xf32>
    %cst_172 = arith.constant 1.280000e+02 : f32
    %672 = vector.broadcast %cst_172 : f32 to vector<8x128xf32>
    %673 = arith.select %671, %314, %672 : vector<8x128xi1>, vector<8x128xf32>
    %cst_173 = arith.constant dense<0x7F800000> : vector<8xf32>
    %674 = vector.multi_reduction <minimumf>, %673, %cst_173 [1] : vector<8x128xf32> to vector<8xf32>
    %675 = vector.shape_cast %674 : vector<8xf32> to vector<8x1xf32>
    %676 = vector.broadcast %675 : vector<8x1xf32> to vector<8x128xf32>
    %677 = arith.cmpf oeq, %314, %676 : vector<8x128xf32>
    %678 = arith.extui %677 : vector<8x128xi1> to vector<8x128xi32>
    %679 = arith.sitofp %678 : vector<8x128xi32> to vector<8x128xf32>
    %680 = arith.select %316, %679, %662 : vector<8x128xi1>, vector<8x128xf32>
    %cst_174 = arith.constant dense<0.000000e+00> : vector<8x128xf32>
    %681 = tpu.matmul %680, %306, %cst_174 {dimension_numbers = #tpu.dot_dimension_numbers<[1], [0], [0], [1], [0, 0, 1, 1], [], []>} : vector<8x128xf32>, vector<128x128xf32>, vector<8x128xf32> -> vector<8x128xf32>
    %cst_175 = arith.constant dense<0.000000e+00> : vector<8x128xf32>
    %682 = tpu.matmul %641, %307, %cst_175 {dimension_numbers = #tpu.dot_dimension_numbers<[1], [0], [0], [1], [0, 0, 1, 1], [], []>} : vector<8x32xf32>, vector<32x128xf32>, vector<8x128xf32> -> vector<8x128xf32>
    %683 = arith.addf %681, %682 : vector<8x128xf32>
    %684 = arith.negf %683 : vector<8x128xf32>
    %685 = math.exp %684 : vector<8x128xf32>
    %cst_176 = arith.constant 1.000000e+00 : f32
    %686 = vector.broadcast %cst_176 : f32 to vector<8x128xf32>
    %687 = arith.addf %686, %685 : vector<8x128xf32>
    %688 = arith.divf %686, %687 : vector<8x128xf32>
    %689 = vector.extract_strided_slice %688 {offsets = [0, 0], sizes = [8, 32], strides = [1, 1]} : vector<8x128xf32> to vector<8x32xf32>
    %690 = vector.extract_strided_slice %688 {offsets = [0, 32], sizes = [8, 32], strides = [1, 1]} : vector<8x128xf32> to vector<8x32xf32>
    %691 = vector.extract_strided_slice %688 {offsets = [0, 96], sizes = [8, 32], strides = [1, 1]} : vector<8x128xf32> to vector<8x32xf32>
    %692 = vector.extract_strided_slice %683 {offsets = [0, 64], sizes = [8, 32], strides = [1, 1]} : vector<8x128xf32> to vector<8x32xf32>
    %693 = math.tanh %692 : vector<8x32xf32>
    %694 = arith.mulf %690, %639 : vector<8x32xf32>
    %695 = arith.mulf %689, %693 : vector<8x32xf32>
    %696 = arith.addf %694, %695 : vector<8x32xf32>
    %697 = math.tanh %696 : vector<8x32xf32>
    %698 = arith.mulf %691, %697 : vector<8x32xf32>
    %cst_177 = arith.constant dense<0.000000e+00> : vector<8x128xf32>
    %699 = tpu.matmul %698, %308, %cst_177 {dimension_numbers = #tpu.dot_dimension_numbers<[1], [0], [0], [1], [0, 0, 1, 1], [], []>} : vector<8x32xf32>, vector<32x128xf32>, vector<8x128xf32> -> vector<8x128xf32>
    %cst_178 = arith.constant dense<0.000000e+00> : vector<8x128xf32>
    %700 = tpu.matmul %660, %309, %cst_178 {dimension_numbers = #tpu.dot_dimension_numbers<[1], [0], [0], [1], [0, 0, 1, 1], [], []>} : vector<8x32xf32>, vector<32x128xf32>, vector<8x128xf32> -> vector<8x128xf32>
    %701 = arith.addf %699, %700 : vector<8x128xf32>
    %702 = arith.addf %701, %310 : vector<8x128xf32>
    %703 = arith.negf %702 : vector<8x128xf32>
    %704 = math.exp %703 : vector<8x128xf32>
    %cst_179 = arith.constant 1.000000e+00 : f32
    %705 = vector.broadcast %cst_179 : f32 to vector<8x128xf32>
    %706 = arith.addf %705, %704 : vector<8x128xf32>
    %707 = arith.divf %705, %706 : vector<8x128xf32>
    %708 = vector.extract_strided_slice %707 {offsets = [0, 0], sizes = [8, 32], strides = [1, 1]} : vector<8x128xf32> to vector<8x32xf32>
    %709 = vector.extract_strided_slice %707 {offsets = [0, 32], sizes = [8, 32], strides = [1, 1]} : vector<8x128xf32> to vector<8x32xf32>
    %710 = vector.extract_strided_slice %707 {offsets = [0, 96], sizes = [8, 32], strides = [1, 1]} : vector<8x128xf32> to vector<8x32xf32>
    %711 = vector.extract_strided_slice %702 {offsets = [0, 64], sizes = [8, 32], strides = [1, 1]} : vector<8x128xf32> to vector<8x32xf32>
    %712 = math.tanh %711 : vector<8x32xf32>
    %713 = arith.mulf %709, %658 : vector<8x32xf32>
    %714 = arith.mulf %708, %712 : vector<8x32xf32>
    %715 = arith.addf %713, %714 : vector<8x32xf32>
    %716 = math.tanh %715 : vector<8x32xf32>
    %717 = arith.mulf %710, %716 : vector<8x32xf32>
    %cst_180 = arith.constant dense<0.000000e+00> : vector<8x128xf32>
    %718 = tpu.matmul %717, %311, %cst_180 {dimension_numbers = #tpu.dot_dimension_numbers<[1], [0], [0], [1], [0, 0, 1, 1], [], []>} : vector<8x32xf32>, vector<32x128xf32>, vector<8x128xf32> -> vector<8x128xf32>
    %719 = arith.addf %718, %312 : vector<8x128xf32>
    %c7_181 = arith.constant 7 : index
    %c0_182 = arith.constant 0 : index
    %c0_183 = arith.constant 0 : index
    %720 = vector.load %arg13[%c7_181, %c0_182, %c0_183] : memref<8x8x128xf32, #tpu.memory_space<vmem>>, vector<1x8x128xf32>
    %721 = vector.shape_cast %720 : vector<1x8x128xf32> to vector<8x128xf32>
    %722 = vector.shape_cast %719 : vector<8x128xf32> to vector<1x8x128xf32>
    tpu.vector_store %arg13[%c7_181, %c0_182, %c0_183], %722 {strides = array<i32>} : memref<8x8x128xf32, #tpu.memory_space<vmem>>, vector<1x8x128xf32>,
    return
  }
}

</mosaic_0001>

<bundles_post_ra>
// kernel: forward.1
= control target key start
LH: loop header
LB: loop body
LE: loop exit
PB: predicated region body
PF: predicated region fallthrough
CT: control target
= control target key end

     0   :  { %s7166_s27 = smov 64   ;;  %s7167_s28 = smov 32   ;;  %v7168_v11 = vmov 0.0   ;;  %vm7169_vm0 = vmmov 0   ;;  %vm85_vm1 = vcmask 261120   ;;  %s8915_s0 = inlined_call_operand.vmem [shape: f32[8,8,128], index: 0, kind: input, shape index: {}]   ;;  %s8916_s2 = inlined_call_operand.vmem [shape: f32[32,128], index: 2, kind: input, shape index: {}]   ;;  %s8917_s1 = inlined_call_operand.vmem [shape: f32[32,128], index: 1, kind: input, shape index: {}]   ;;  %s8918_s4 = inlined_call_operand.vmem [shape: f32[8,128], index: 4, kind: input, shape index: {}]   ;;  %s8919_s3 = inlined_call_operand.vmem [shape: f32[32,128], index: 3, kind: input, shape index: {}]   ;;  %s8920_s7 = inlined_call_operand.vmem [shape: f32[32,128], index: 7, kind: input, shape index: {}]   ;;  %s8921_s6 = inlined_call_operand.vmem [shape: f32[128,128], index: 6, kind: input, shape index: {}]   ;;  %s8922_s9 = inlined_call_operand.vmem [shape: f32[32,128], index: 9, kind: input, shape index: {}]   ;;  %s8923_s8 = inlined_call_operand.vmem [shape: f32[32,128], index: 8, kind: input, shape index: {}]   ;;  %s8924_s10 = inlined_call_operand.vmem [shape: f32[8,128], index: 10, kind: input, shape index: {}]   ;;  %s8925_s11 = inlined_call_operand.vmem [shape: f32[32,128], index: 11, kind: input, shape index: {}]   ;;  %s8926_s12 = inlined_call_operand.vmem [shape: f32[8,128], index: 12, kind: input, shape index: {}]   ;;  %s8927_s13 = inlined_call_operand.vmem [shape: f32[8,8,128], index: 13, kind: output, shape index: {}]   ;;  %s8928_s5 = inlined_call_operand.vmem [shape: f32[8,8,128], index: 5, kind: input, shape index: {}]  }
   0x1   :  { %v57_v0 = vld [vmem:[%s8915_s0] sm:$0xff]  ;;  %5988 = vmatprep.subr.mxu0 %v7168_v11  ;;  %5999 = vmatprep.subr.mxu1 %v7168_v11  ;;  %v7254_v12 = vld [vmem:[%s8916_s2 + $0x18] sm:$0xff]  ;;  %v7264_v14 = vld [vmem:[%s8916_s2 + $0x10] sm:$0xff] }
   0x2   :  { %6867 = vtanh.f32 %v57_v0  ;;  %v5473_v2 = vmul.f32 -1.442695, %v57_v0  ;;  %v7259_v13 = vld [vmem:[%s8917_s1 + $0x18] sm:$0xff]  ;;  %5989 = vmatpush3.msra.mxu0 %v7254_v12  ;;  %v7271_v15 = vld [vmem:[%s8917_s1 + $0x10] sm:$0xff]  ;;  %v7278_v16 = vld [vmem:[%s8916_s2 + $0x8] sm:$0xff]  ;;  %5996 = vmatprep.mubr.msk.f32.mxu0 %vm7169_vm0, %v7168_v11 }
   0x3   :  { %6000 = vmatpush3.msra.mxu1 %v7259_v13  ;;  %5990 = vmatprep.subr.mxu0 %v7168_v11  ;;  %v7283_v17 = vld [vmem:[%s8917_s1 + $0x8] sm:$0xff]  ;;  %v7292_v18 = vld [vmem:[%s8916_s2] sm:$0xff]  ;;  %v7350_v52 = vld [vmem:[%s8919_s3 + $0x18] sm:$0xff] }
   0x4   :  { %6869 = vpow2.f32 %v5473_v2  ;;  %6001 = vmatprep.subr.mxu1 %v7168_v11  ;;  %5991 = vmatpush3.msra.mxu0 %v7264_v14  ;;  %v7299_v19 = vld [vmem:[%s8917_s1] sm:$0xff]  ;;  %v5476_v25 = vld [vmem:[%s8915_s0 + $0x8] sm:$0xff]  ;;  %v7355_v53 = vld [vmem:[%s8919_s3 + $0x10] sm:$0xff] }
   0x5   :  { %6002 = vmatpush3.msra.mxu1 %v7271_v15  ;;  %5992 = vmatprep.subr.mxu0 %v7168_v11  ;;  %v7330_v24 = vld [vmem:[%s8918_s4] sm:$0xff]  ;;  %v7362_v54 = vld [vmem:[%s8919_s3 + $0x8] sm:$0xff] }
   0x6   :  { %6003 = vmatprep.subr.mxu1 %v7168_v11  ;;  %5993 = vmatpush3.msra.mxu0 %v7278_v16  ;;  %v7369_v55 = vld [vmem:[%s8919_s3] sm:$0xff] }
   0x7   :  { %6004 = vmatpush3.msra.mxu1 %v7283_v17  ;;  %5994 = vmatprep.subr.mxu0 %v7168_v11 }
   0x8   :  { %6005 = vmatprep.subr.mxu1 %v7168_v11  ;;  %5995 = vmatpush3.msra.mxu0 %v7292_v18 }
   0x9   :  { %6006 = vmatpush3.msra.mxu1 %v7299_v19  ;;  %6007 = vmatprep.mubr.msk.f32.mxu1 %vm7169_vm0, %v7168_v11 }
   0xa   :  { %6010 = vmatprep.subr.mxu0 %v7168_v11  ;;  %6021 = vmatprep.subr.mxu1 %v7168_v11 }
   0xf   :  { %v6868_v1 = vpop.eup %6867 }
  0x10   :  { %67 = vrot.lane.b32.xlu0 %v6868_v1, %s7166_s27 }
  0x11   :  { %v6870_v3 = vpop.eup %6869 }
  0x12   :  { %v61_v4 = vadd.f32 1.0, %v6870_v3 }
  0x14   :  { %6871 = vrcp.f32 %v61_v4 }
  0x21   :  { %v6872_v5 = vpop.eup %6871 }
  0x22   :  { %v65_v8 = vmul.f32 0.0, %v6872_v5 }
  0x82   :  { %v68_v6 = vpop.permute.xlu0 %67 }
  0x83   :  { %v70_v7 = vmul.f32 %v6872_v5, %v68_v6  ;;  %v5482_v6 = vld [vmem:[%s8915_s0 + $0x10] sm:$0xff] }
  0x85   :  { %72 = vrot.lane.b32.xlu0 %v70_v7, %s7167_s28 }
  0xf7   :  { %v73_v9 = vpop.permute.xlu0 %72 }
  0xf8   :  { %v7246_v10 = vadd.f32 %v73_v9, %v65_v8 }
  0xfa   :  { %6873 = vtanh.f32 %v7246_v10 }
 0x107   :  { %v6874_v20 = vpop.eup %6873 }
 0x108   :  { %78 = vrot.lane.b32.xlu1 %v6874_v20, %s7166_s27 }
 0x17a   :  { %v79_v21 = vpop.permute.xlu1 %78 }
 0x17b   :  { %v81_v22 = vmul.f32 %v6872_v5, %v79_v21 }
 0x17d   :  { %83 = vrot.lane.b32.xlu1 %v81_v22, %s7167_s28 }
 0x1ef   :  { %v84_v23 = vpop.permute.xlu1 %83 }
 0x1f0   :  { %5997 = vmatmul.mubr.msk.f32.vlgmr.msra.gmra.mxu0 %vm85_vm1, %v84_v23  ;;  %6008 = vmatmul.mubr.msk.f32.vlgmr.msra.gmra.mxu1 %vm85_vm1, %v84_v23 }
 0x1f1   :  { %6022 = vmatpush3.msra.mxu1 %v7254_v12  ;;  %6029 = vmatprep.mubr.msk.f32.mxu1 %vm7169_vm0, %v7168_v11 }
 0x1f2   :  { %6023 = vmatprep.subr.mxu1 %v7168_v11  ;;  %6018 = vmatprep.mubr.msk.f32.mxu0 %vm7169_vm0, %v7168_v11 }
 0x1f3   :  { %6024 = vmatpush3.msra.mxu1 %v7264_v14  ;;  %6011 = vmatpush3.msra.mxu0 %v7350_v52 }
 0x1f4   :  { %6025 = vmatprep.subr.mxu1 %v7168_v11  ;;  %6012 = vmatprep.subr.mxu0 %v7168_v11 }
 0x1f5   :  { %6026 = vmatpush3.msra.mxu1 %v7278_v16  ;;  %6013 = vmatpush3.msra.mxu0 %v7355_v53 }
 0x1f6   :  { %6027 = vmatprep.subr.mxu1 %v7168_v11  ;;  %6014 = vmatprep.subr.mxu0 %v7168_v11 }
 0x1f7   :  { %6028 = vmatpush3.msra.mxu1 %v7292_v18  ;;  %6015 = vmatpush3.msra.mxu0 %v7362_v54 }
 0x1f8   :  { %6043 = vmatprep.subr.mxu1 %v7168_v11  ;;  %6016 = vmatprep.subr.mxu0 %v7168_v11 }
 0x1f9   :  { %6017 = vmatpush3.msra.mxu0 %v7369_v55 }
 0x1fa   :  { %6032 = vmatprep.subr.mxu0 %v7168_v11 }
 0x2b0   :  { %v154_v26 = vpop.f32.mrf.mxu0  ;;  %v250_v27 = vpop.f32.mrf.mxu1 }
 0x2b1   :  { %v155_v28 = vadd.f32 %v154_v26, %v7330_v24  ;;  %v254_v29 = vadd.f32 %v5476_v25, %v250_v27 }
 0x2b2   :  { %v5998_v30 = vpop.f32.mrf.mxu0  ;;  %v6009_v31 = vpop.f32.mrf.mxu1 }
 0x2b3   :  { %6875 = vtanh.f32 %v155_v28  ;;  %v5475_v34 = vmul.f32 -1.442695, %v155_v28  ;;  %v5478_v35 = vmul.f32 -1.442695, %v254_v29 }
 0x2b4   :  { %6877 = vtanh.f32 %v254_v29 }
 0x2b5   :  { %6879 = vpow2.f32 %v5475_v34 }
 0x2b6   :  { %6881 = vpow2.f32 %v5478_v35 }
 0x2c0   :  { %v6876_v32 = vpop.eup %6875 }
 0x2c1   :  { %v6878_v33 = vpop.eup %6877  ;;  %167 = vrot.lane.b32.xlu0 %v6876_v32, %s7166_s27 }
 0x2c2   :  { %264 = vrot.lane.b32.xlu1 %v6878_v33, %s7166_s27  ;;  %v6880_v36 = vpop.eup %6879 }
 0x2c3   :  { %v6882_v37 = vpop.eup %6881  ;;  %v161_v38 = vadd.f32 1.0, %v6880_v36 }
 0x2c4   :  { %v258_v39 = vadd.f32 1.0, %v6882_v37 }
 0x2c5   :  { %6883 = vrcp.f32 %v161_v38 }
 0x2c6   :  { %6885 = vrcp.f32 %v258_v39 }
 0x2d2   :  { %v6884_v40 = vpop.eup %6883 }
 0x2d3   :  { %v6886_v42 = vpop.eup %6885  ;;  %v165_v46 = vmul.f32 0.0, %v6884_v40 }
 0x2d4   :  { %v262_v47 = vmul.f32 %v6886_v42, %v7246_v10 }
 0x333   :  { %v168_v41 = vpop.permute.xlu0 %167 }
 0x334   :  { %v265_v43 = vpop.permute.xlu1 %264  ;;  %v170_v44 = vmul.f32 %v6884_v40, %v168_v41 }
 0x335   :  { %v267_v45 = vmul.f32 %v6886_v42, %v265_v43 }
 0x336   :  { %172 = vrot.lane.b32.xlu0 %v170_v44, %s7167_s28 }
 0x337   :  { %269 = vrot.lane.b32.xlu1 %v267_v45, %s7167_s28 }
 0x3a8   :  { %v173_v48 = vpop.permute.xlu0 %172 }
 0x3a9   :  { %v270_v49 = vpop.permute.xlu1 %269  ;;  %v7341_v50 = vadd.f32 %v173_v48, %v165_v46 }
 0x3aa   :  { %v7343_v51 = vadd.f32 %v270_v49, %v262_v47 }
 0x3ab   :  { %6887 = vtanh.f32 %v7341_v50 }
 0x3ac   :  { %6889 = vtanh.f32 %v7343_v51 }
 0x3b8   :  { %v6888_v56 = vpop.eup %6887 }
 0x3b9   :  { %v6890_v57 = vpop.eup %6889  ;;  %178 = vrot.lane.b32.xlu0 %v6888_v56, %s7166_s27  ;;  %v5488_v56 = vld [vmem:[%s8915_s0 + $0x18] sm:$0xff] }
 0x3ba   :  { %275 = vrot.lane.b32.xlu1 %v6890_v57, %s7166_s27 }
 0x42b   :  { %v179_v58 = vpop.permute.xlu0 %178 }
 0x42c   :  { %v276_v59 = vpop.permute.xlu1 %275  ;;  %v181_v60 = vmul.f32 %v6884_v40, %v179_v58 }
 0x42d   :  { %v278_v61 = vmul.f32 %v6886_v42, %v276_v59 }
 0x42e   :  { %280 = vrot.lane.b32.xlu0 %v181_v60, %s7167_s28 }
 0x42f   :  { %355 = vrot.lane.b32.xlu1 %v278_v61, %s7167_s28 }
 0x4a0   :  { %v281_v62 = vpop.permute.xlu0 %280 }
 0x4a1   :  { %v356_v63 = vpop.permute.xlu1 %355  ;;  %6019 = vmatmul.mubr.msk.f32.vlgmr.msra.gmra.mxu0 %vm85_vm1, %v281_v62 }
 0x4a2   :  { %6030 = vmatmul.mubr.msk.f32.vlgmr.msra.gmra.mxu1 %vm85_vm1, %v356_v63  ;;  %6033 = vmatpush3.msra.mxu0 %v7259_v13 }
 0x4a3   :  { %6034 = vmatprep.subr.mxu0 %v7168_v11  ;;  %6040 = vmatprep.mubr.msk.f32.mxu0 %vm7169_vm0, %v7168_v11 }
 0x4a4   :  { %6035 = vmatpush3.msra.mxu0 %v7271_v15  ;;  %6044 = vmatpush3.msra.mxu1 %v7350_v52 }
 0x4a5   :  { %6036 = vmatprep.subr.mxu0 %v7168_v11  ;;  %6045 = vmatprep.subr.mxu1 %v7168_v11 }
 0x4a6   :  { %6037 = vmatpush3.msra.mxu0 %v7283_v17  ;;  %6046 = vmatpush3.msra.mxu1 %v7355_v53 }
 0x4a7   :  { %6038 = vmatprep.subr.mxu0 %v7168_v11  ;;  %6047 = vmatprep.subr.mxu1 %v7168_v11 }
 0x4a8   :  { %6039 = vmatpush3.msra.mxu0 %v7299_v19  ;;  %6048 = vmatpush3.msra.mxu1 %v7362_v54 }
 0x4a9   :  { %6041 = vmatmul.mubr.msk.f32.vlgmr.msra.gmra.mxu0 %vm85_vm1, %v356_v63  ;;  %6049 = vmatprep.subr.mxu1 %v7168_v11 }
 0x4aa   :  { %6054 = vmatprep.subr.mxu0 %v7168_v11  ;;  %6050 = vmatpush3.msra.mxu1 %v7369_v55 }
 0x4ab   :  { %6055 = vmatpush3.msra.mxu0 %v7254_v12  ;;  %6051 = vmatprep.mubr.msk.f32.mxu1 %vm7169_vm0, %v7168_v11 }
 0x4ac   :  { %6056 = vmatprep.subr.mxu0 %v7168_v11  ;;  %6065 = vmatprep.subr.mxu1 %v7168_v11 }
 0x4ad   :  { %6057 = vmatpush3.msra.mxu0 %v7264_v14  ;;  %6062 = vmatprep.mubr.msk.f32.mxu0 %vm7169_vm0, %v7168_v11 }
 0x4ae   :  { %6058 = vmatprep.subr.mxu0 %v7168_v11 }
 0x4af   :  { %6059 = vmatpush3.msra.mxu0 %v7278_v16 }
 0x4b0   :  { %6060 = vmatprep.subr.mxu0 %v7168_v11 }
 0x4b1   :  { %6061 = vmatpush3.msra.mxu0 %v7292_v18 }
 0x4b2   :  { %6076 = vmatprep.subr.mxu0 %v7168_v11 }
 0x561   :  { %v350_v0 = vpop.f32.mrf.mxu0 }
 0x562   :  { %v425_v1 = vpop.f32.mrf.mxu1 }
 0x563   :  { %v426_v2 = vadd.f32 %v425_v1, %v350_v0  ;;  %v6020_v3 = vpop.f32.mrf.mxu0 }
 0x564   :  { %v6031_v4 = vpop.f32.mrf.mxu1 }
 0x565   :  { %v429_v5 = vadd.f32 %v426_v2, %v7330_v24 }
 0x567   :  { %6891 = vtanh.f32 %v429_v5  ;;  %v5481_v21 = vmul.f32 -1.442695, %v429_v5 }
 0x569   :  { %v522_v7 = vpop.f32.mrf.mxu0 }
 0x56a   :  { %v526_v8 = vadd.f32 %v5482_v6, %v522_v7 }
 0x56b   :  { %v6042_v9 = vpop.f32.mrf.mxu0 }
 0x56c   :  { %6893 = vtanh.f32 %v526_v8  ;;  %v5484_v22 = vmul.f32 -1.442695, %v526_v8 }
 0x56d   :  { %6895 = vpow2.f32 %v5481_v21 }
 0x56e   :  { %6897 = vpow2.f32 %v5484_v22 }
 0x574   :  { %v6892_v10 = vpop.eup %6891 }
 0x575   :  { %439 = vrot.lane.b32.xlu0 %v6892_v10, %s7166_s27 }
 0x579   :  { %v6894_v20 = vpop.eup %6893 }
 0x57a   :  { %536 = vrot.lane.b32.xlu1 %v6894_v20, %s7166_s27  ;;  %v6896_v23 = vpop.eup %6895 }
 0x57b   :  { %v433_v25 = vadd.f32 1.0, %v6896_v23  ;;  %v6898_v26 = vpop.eup %6897 }
 0x57c   :  { %v530_v27 = vadd.f32 1.0, %v6898_v26 }
 0x57d   :  { %6899 = vrcp.f32 %v433_v25 }
 0x57e   :  { %6901 = vrcp.f32 %v530_v27 }
 0x58a   :  { %v6900_v28 = vpop.eup %6899 }
 0x58b   :  { %v6902_v31 = vpop.eup %6901  ;;  %v437_v34 = vmul.f32 %v6900_v28, %v7341_v50 }
 0x58c   :  { %v534_v37 = vmul.f32 %v6902_v31, %v7343_v51 }
 0x5e7   :  { %v440_v29 = vpop.permute.xlu0 %439 }
 0x5e8   :  { %v442_v30 = vmul.f32 %v6900_v28, %v440_v29 }
 0x5ea   :  { %444 = vrot.lane.b32.xlu0 %v442_v30, %s7167_s28 }
 0x5ec   :  { %v537_v32 = vpop.permute.xlu1 %536 }
 0x5ed   :  { %v539_v33 = vmul.f32 %v6902_v31, %v537_v32 }
 0x5ef   :  { %541 = vrot.lane.b32.xlu1 %v539_v33, %s7167_s28 }
 0x65c   :  { %v445_v35 = vpop.permute.xlu0 %444 }
 0x65d   :  { %v7421_v36 = vadd.f32 %v445_v35, %v437_v34 }
 0x65f   :  { %6903 = vtanh.f32 %v7421_v36 }
 0x661   :  { %v542_v38 = vpop.permute.xlu1 %541 }
 0x662   :  { %v7425_v39 = vadd.f32 %v542_v38, %v534_v37 }
 0x664   :  { %6905 = vtanh.f32 %v7425_v39 }
 0x66c   :  { %v6904_v40 = vpop.eup %6903 }
 0x66d   :  { %450 = vrot.lane.b32.xlu0 %v6904_v40, %s7166_s27 }
 0x671   :  { %v6906_v41 = vpop.eup %6905 }
 0x672   :  { %547 = vrot.lane.b32.xlu1 %v6906_v41, %s7166_s27 }
 0x6df   :  { %v451_v42 = vpop.permute.xlu0 %450 }
 0x6e0   :  { %v453_v43 = vmul.f32 %v6900_v28, %v451_v42  ;;  %v5494_v42 = vld [vmem:[%s8915_s0 + $0x20] sm:$0xff] }
 0x6e2   :  { %552 = vrot.lane.b32.xlu0 %v453_v43, %s7167_s28 }
 0x6e4   :  { %v548_v44 = vpop.permute.xlu1 %547 }
 0x6e5   :  { %v550_v45 = vmul.f32 %v6902_v31, %v548_v44 }
 0x6e7   :  { %627 = vrot.lane.b32.xlu1 %v550_v45, %s7167_s28 }
 0x754   :  { %v553_v46 = vpop.permute.xlu0 %552 }
 0x755   :  { %6052 = vmatmul.mubr.msk.f32.vlgmr.msra.gmra.mxu1 %vm85_vm1, %v553_v46 }
 0x756   :  { %6066 = vmatpush3.msra.mxu1 %v7259_v13  ;;  %6073 = vmatprep.mubr.msk.f32.mxu1 %vm7169_vm0, %v7168_v11 }
 0x757   :  { %6067 = vmatprep.subr.mxu1 %v7168_v11 }
 0x758   :  { %6068 = vmatpush3.msra.mxu1 %v7271_v15 }
 0x759   :  { %6069 = vmatprep.subr.mxu1 %v7168_v11  ;;  %v628_v47 = vpop.permute.xlu1 %627 }
 0x75a   :  { %6070 = vmatpush3.msra.mxu1 %v7283_v17  ;;  %6063 = vmatmul.mubr.msk.f32.vlgmr.msra.gmra.mxu0 %vm85_vm1, %v628_v47 }
 0x75b   :  { %6071 = vmatprep.subr.mxu1 %v7168_v11  ;;  %6077 = vmatpush3.msra.mxu0 %v7350_v52 }
 0x75c   :  { %6072 = vmatpush3.msra.mxu1 %v7299_v19  ;;  %6078 = vmatprep.subr.mxu0 %v7168_v11 }
 0x75d   :  { %6074 = vmatmul.mubr.msk.f32.vlgmr.msra.gmra.mxu1 %vm85_vm1, %v628_v47  ;;  %6087 = vmatprep.subr.mxu1 %v7168_v11 }
 0x75e   :  { %6088 = vmatpush3.msra.mxu1 %v7254_v12  ;;  %6079 = vmatpush3.msra.mxu0 %v7355_v53 }
 0x75f   :  { %6089 = vmatprep.subr.mxu1 %v7168_v11  ;;  %6080 = vmatprep.subr.mxu0 %v7168_v11 }
 0x760   :  { %6090 = vmatpush3.msra.mxu1 %v7264_v14  ;;  %6081 = vmatpush3.msra.mxu0 %v7362_v54 }
 0x761   :  { %6091 = vmatprep.subr.mxu1 %v7168_v11  ;;  %6082 = vmatprep.subr.mxu0 %v7168_v11 }
 0x762   :  { %6092 = vmatpush3.msra.mxu1 %v7278_v16  ;;  %6083 = vmatpush3.msra.mxu0 %v7369_v55 }
 0x763   :  { %6093 = vmatprep.subr.mxu1 %v7168_v11  ;;  %6095 = vmatprep.mubr.msk.f32.mxu1 %vm7169_vm0, %v7168_v11 }
 0x764   :  { %6094 = vmatpush3.msra.mxu1 %v7292_v18  ;;  %6084 = vmatprep.mubr.msk.f32.mxu0 %vm7169_vm0, %v7168_v11 }
 0x765   :  { %6098 = vmatprep.subr.mxu0 %v7168_v11  ;;  %6109 = vmatprep.subr.mxu1 %v7168_v11 }
 0x815   :  { %v622_v48 = vpop.f32.mrf.mxu1 }
 0x817   :  { %v6053_v49 = vpop.f32.mrf.mxu1 }
 0x81a   :  { %v697_v50 = vpop.f32.mrf.mxu0 }
 0x81b   :  { %v698_v51 = vadd.f32 %v697_v50, %v622_v48 }
 0x81c   :  { %v6064_v57 = vpop.f32.mrf.mxu0 }
 0x81d   :  { %v701_v58 = vadd.f32 %v698_v51, %v7330_v24  ;;  %v794_v59 = vpop.f32.mrf.mxu1 }
 0x81e   :  { %v798_v60 = vadd.f32 %v5488_v56, %v794_v59 }
 0x81f   :  { %6907 = vtanh.f32 %v701_v58  ;;  %v6075_v61 = vpop.f32.mrf.mxu1  ;;  %v5487_v0 = vmul.f32 -1.442695, %v701_v58 }
 0x820   :  { %6909 = vtanh.f32 %v798_v60  ;;  %v5490_v1 = vmul.f32 -1.442695, %v798_v60 }
 0x821   :  { %6911 = vpow2.f32 %v5487_v0 }
 0x822   :  { %6913 = vpow2.f32 %v5490_v1 }
 0x82c   :  { %v6908_v62 = vpop.eup %6907 }
 0x82d   :  { %v6910_v63 = vpop.eup %6909  ;;  %711 = vrot.lane.b32.xlu0 %v6908_v62, %s7166_s27 }
 0x82e   :  { %808 = vrot.lane.b32.xlu1 %v6910_v63, %s7166_s27  ;;  %v6912_v2 = vpop.eup %6911 }
 0x82f   :  { %v6914_v3 = vpop.eup %6913  ;;  %v705_v4 = vadd.f32 1.0, %v6912_v2 }
 0x830   :  { %v802_v5 = vadd.f32 1.0, %v6914_v3 }
 0x831   :  { %6915 = vrcp.f32 %v705_v4 }
 0x832   :  { %6917 = vrcp.f32 %v802_v5 }
 0x83e   :  { %v6916_v6 = vpop.eup %6915 }
 0x83f   :  { %v6918_v8 = vpop.eup %6917  ;;  %v709_v21 = vmul.f32 %v6916_v6, %v7421_v36 }
 0x840   :  { %v806_v22 = vmul.f32 %v6918_v8, %v7425_v39 }
 0x89f   :  { %v712_v7 = vpop.permute.xlu0 %711 }
 0x8a0   :  { %v809_v9 = vpop.permute.xlu1 %808  ;;  %v714_v10 = vmul.f32 %v6916_v6, %v712_v7 }
 0x8a1   :  { %v811_v20 = vmul.f32 %v6918_v8, %v809_v9 }
 0x8a2   :  { %716 = vrot.lane.b32.xlu0 %v714_v10, %s7167_s28 }
 0x8a3   :  { %813 = vrot.lane.b32.xlu1 %v811_v20, %s7167_s28 }
 0x914   :  { %v717_v23 = vpop.permute.xlu0 %716 }
 0x915   :  { %v814_v25 = vpop.permute.xlu1 %813  ;;  %v7475_v26 = vadd.f32 %v717_v23, %v709_v21 }
 0x916   :  { %v7477_v27 = vadd.f32 %v814_v25, %v806_v22 }
 0x917   :  { %6919 = vtanh.f32 %v7475_v26 }
 0x918   :  { %6921 = vtanh.f32 %v7477_v27 }
 0x924   :  { %v6920_v28 = vpop.eup %6919 }
 0x925   :  { %v6922_v29 = vpop.eup %6921  ;;  %722 = vrot.lane.b32.xlu0 %v6920_v28, %s7166_s27  ;;  %v5500_v28 = vld [vmem:[%s8915_s0 + $0x28] sm:$0xff] }
 0x926   :  { %819 = vrot.lane.b32.xlu1 %v6922_v29, %s7166_s27 }
 0x997   :  { %v723_v30 = vpop.permute.xlu0 %722 }
 0x998   :  { %v820_v31 = vpop.permute.xlu1 %819  ;;  %v725_v32 = vmul.f32 %v6916_v6, %v723_v30 }
 0x999   :  { %v822_v33 = vmul.f32 %v6918_v8, %v820_v31 }
 0x99a   :  { %824 = vrot.lane.b32.xlu0 %v725_v32, %s7167_s28 }
 0x99b   :  { %899 = vrot.lane.b32.xlu1 %v822_v33, %s7167_s28 }
 0xa0c   :  { %v825_v34 = vpop.permute.xlu0 %824 }
 0xa0d   :  { %v900_v35 = vpop.permute.xlu1 %899  ;;  %6085 = vmatmul.mubr.msk.f32.vlgmr.msra.gmra.mxu0 %vm85_vm1, %v825_v34 }
 0xa0e   :  { %6096 = vmatmul.mubr.msk.f32.vlgmr.msra.gmra.mxu1 %vm85_vm1, %v900_v35  ;;  %6099 = vmatpush3.msra.mxu0 %v7259_v13 }
 0xa0f   :  { %6100 = vmatprep.subr.mxu0 %v7168_v11  ;;  %6106 = vmatprep.mubr.msk.f32.mxu0 %vm7169_vm0, %v7168_v11 }
 0xa10   :  { %6101 = vmatpush3.msra.mxu0 %v7271_v15  ;;  %6110 = vmatpush3.msra.mxu1 %v7350_v52 }
 0xa11   :  { %6102 = vmatprep.subr.mxu0 %v7168_v11  ;;  %6111 = vmatprep.subr.mxu1 %v7168_v11 }
 0xa12   :  { %6103 = vmatpush3.msra.mxu0 %v7283_v17  ;;  %6112 = vmatpush3.msra.mxu1 %v7355_v53 }
 0xa13   :  { %6104 = vmatprep.subr.mxu0 %v7168_v11  ;;  %6113 = vmatprep.subr.mxu1 %v7168_v11 }
 0xa14   :  { %6105 = vmatpush3.msra.mxu0 %v7299_v19  ;;  %6114 = vmatpush3.msra.mxu1 %v7362_v54 }
 0xa15   :  { %6107 = vmatmul.mubr.msk.f32.vlgmr.msra.gmra.mxu0 %vm85_vm1, %v900_v35  ;;  %6115 = vmatprep.subr.mxu1 %v7168_v11 }
 0xa16   :  { %6120 = vmatprep.subr.mxu0 %v7168_v11  ;;  %6116 = vmatpush3.msra.mxu1 %v7369_v55 }
 0xa17   :  { %6121 = vmatpush3.msra.mxu0 %v7254_v12  ;;  %6117 = vmatprep.mubr.msk.f32.mxu1 %vm7169_vm0, %v7168_v11 }
 0xa18   :  { %6122 = vmatprep.subr.mxu0 %v7168_v11  ;;  %6131 = vmatprep.subr.mxu1 %v7168_v11 }
 0xa19   :  { %6123 = vmatpush3.msra.mxu0 %v7264_v14  ;;  %6128 = vmatprep.mubr.msk.f32.mxu0 %vm7169_vm0, %v7168_v11 }
 0xa1a   :  { %6124 = vmatprep.subr.mxu0 %v7168_v11 }
 0xa1b   :  { %6125 = vmatpush3.msra.mxu0 %v7278_v16 }
 0xa1c   :  { %6126 = vmatprep.subr.mxu0 %v7168_v11 }
 0xa1d   :  { %6127 = vmatpush3.msra.mxu0 %v7292_v18 }
 0xa1e   :  { %6142 = vmatprep.subr.mxu0 %v7168_v11 }
 0xacd   :  { %v894_v36 = vpop.f32.mrf.mxu0 }
 0xace   :  { %v969_v37 = vpop.f32.mrf.mxu1 }
 0xacf   :  { %v970_v38 = vadd.f32 %v969_v37, %v894_v36  ;;  %v6086_v39 = vpop.f32.mrf.mxu0 }
 0xad0   :  { %v6097_v40 = vpop.f32.mrf.mxu1 }
 0xad1   :  { %v973_v41 = vadd.f32 %v970_v38, %v7330_v24 }
 0xad3   :  { %6923 = vtanh.f32 %v973_v41  ;;  %v5493_v48 = vmul.f32 -1.442695, %v973_v41 }
 0xad5   :  { %v1066_v43 = vpop.f32.mrf.mxu0 }
 0xad6   :  { %v1070_v44 = vadd.f32 %v5494_v42, %v1066_v43 }
 0xad7   :  { %v6108_v45 = vpop.f32.mrf.mxu0 }
 0xad8   :  { %6925 = vtanh.f32 %v1070_v44  ;;  %v5496_v49 = vmul.f32 -1.442695, %v1070_v44 }
 0xad9   :  { %6927 = vpow2.f32 %v5493_v48 }
 0xada   :  { %6929 = vpow2.f32 %v5496_v49 }
 0xae0   :  { %v6924_v46 = vpop.eup %6923 }
 0xae1   :  { %983 = vrot.lane.b32.xlu0 %v6924_v46, %s7166_s27 }
 0xae5   :  { %v6926_v47 = vpop.eup %6925 }
 0xae6   :  { %1080 = vrot.lane.b32.xlu1 %v6926_v47, %s7166_s27  ;;  %v6928_v50 = vpop.eup %6927 }
 0xae7   :  { %v977_v51 = vadd.f32 1.0, %v6928_v50  ;;  %v6930_v56 = vpop.eup %6929 }
 0xae8   :  { %v1074_v57 = vadd.f32 1.0, %v6930_v56 }
 0xae9   :  { %6931 = vrcp.f32 %v977_v51 }
 0xaea   :  { %6933 = vrcp.f32 %v1074_v57 }
 0xaf6   :  { %v6932_v58 = vpop.eup %6931 }
 0xaf7   :  { %v6934_v61 = vpop.eup %6933  ;;  %v981_v0 = vmul.f32 %v6932_v58, %v7475_v26 }
 0xaf8   :  { %v1078_v3 = vmul.f32 %v6934_v61, %v7477_v27 }
 0xb53   :  { %v984_v59 = vpop.permute.xlu0 %983 }
 0xb54   :  { %v986_v60 = vmul.f32 %v6932_v58, %v984_v59 }
 0xb56   :  { %988 = vrot.lane.b32.xlu0 %v986_v60, %s7167_s28 }
 0xb58   :  { %v1081_v62 = vpop.permute.xlu1 %1080 }
 0xb59   :  { %v1083_v63 = vmul.f32 %v6934_v61, %v1081_v62 }
 0xb5b   :  { %1085 = vrot.lane.b32.xlu1 %v1083_v63, %s7167_s28 }
 0xbc8   :  { %v989_v1 = vpop.permute.xlu0 %988 }
 0xbc9   :  { %v7527_v2 = vadd.f32 %v989_v1, %v981_v0 }
 0xbcb   :  { %6935 = vtanh.f32 %v7527_v2 }
 0xbcd   :  { %v1086_v4 = vpop.permute.xlu1 %1085 }
 0xbce   :  { %v7531_v5 = vadd.f32 %v1086_v4, %v1078_v3 }
 0xbd0   :  { %6937 = vtanh.f32 %v7531_v5 }
 0xbd8   :  { %v6936_v6 = vpop.eup %6935 }
 0xbd9   :  { %994 = vrot.lane.b32.xlu0 %v6936_v6, %s7166_s27 }
 0xbdd   :  { %v6938_v7 = vpop.eup %6937 }
 0xbde   :  { %1091 = vrot.lane.b32.xlu1 %v6938_v7, %s7166_s27 }
 0xc4b   :  { %v995_v8 = vpop.permute.xlu0 %994 }
 0xc4c   :  { %v997_v9 = vmul.f32 %v6932_v58, %v995_v8 }
 0xc4e   :  { %1096 = vrot.lane.b32.xlu0 %v997_v9, %s7167_s28 }
 0xc50   :  { %v1092_v10 = vpop.permute.xlu1 %1091 }
 0xc51   :  { %v1094_v20 = vmul.f32 %v6934_v61, %v1092_v10 }
 0xc53   :  { %1171 = vrot.lane.b32.xlu1 %v1094_v20, %s7167_s28 }
 0xcc0   :  { %v1097_v21 = vpop.permute.xlu0 %1096 }
 0xcc1   :  { %6118 = vmatmul.mubr.msk.f32.vlgmr.msra.gmra.mxu1 %vm85_vm1, %v1097_v21 }
 0xcc2   :  { %6132 = vmatpush3.msra.mxu1 %v7259_v13  ;;  %6139 = vmatprep.mubr.msk.f32.mxu1 %vm7169_vm0, %v7168_v11 }
 0xcc3   :  { %6133 = vmatprep.subr.mxu1 %v7168_v11 }
 0xcc4   :  { %6134 = vmatpush3.msra.mxu1 %v7271_v15 }
 0xcc5   :  { %6135 = vmatprep.subr.mxu1 %v7168_v11  ;;  %v1172_v22 = vpop.permute.xlu1 %1171 }
 0xcc6   :  { %6136 = vmatpush3.msra.mxu1 %v7283_v17  ;;  %6129 = vmatmul.mubr.msk.f32.vlgmr.msra.gmra.mxu0 %vm85_vm1, %v1172_v22 }
 0xcc7   :  { %6137 = vmatprep.subr.mxu1 %v7168_v11  ;;  %6143 = vmatpush3.msra.mxu0 %v7350_v52 }
 0xcc8   :  { %6138 = vmatpush3.msra.mxu1 %v7299_v19  ;;  %6144 = vmatprep.subr.mxu0 %v7168_v11 }
 0xcc9   :  { %6140 = vmatmul.mubr.msk.f32.vlgmr.msra.gmra.mxu1 %vm85_vm1, %v1172_v22  ;;  %6153 = vmatprep.subr.mxu1 %v7168_v11 }
 0xcca   :  { %6154 = vmatpush3.msra.mxu1 %v7254_v12  ;;  %6145 = vmatpush3.msra.mxu0 %v7355_v53 }
 0xccb   :  { %6155 = vmatprep.subr.mxu1 %v7168_v11  ;;  %6146 = vmatprep.subr.mxu0 %v7168_v11 }
 0xccc   :  { %6156 = vmatpush3.msra.mxu1 %v7264_v14  ;;  %6147 = vmatpush3.msra.mxu0 %v7362_v54 }
 0xccd   :  { %6157 = vmatprep.subr.mxu1 %v7168_v11  ;;  %6148 = vmatprep.subr.mxu0 %v7168_v11 }
 0xcce   :  { %6158 = vmatpush3.msra.mxu1 %v7278_v16  ;;  %6149 = vmatpush3.msra.mxu0 %v7369_v55 }
 0xccf   :  { %6159 = vmatprep.subr.mxu1 %v7168_v11  ;;  %6161 = vmatprep.mubr.msk.f32.mxu1 %vm7169_vm0, %v7168_v11 }
 0xcd0   :  { %6160 = vmatpush3.msra.mxu1 %v7292_v18  ;;  %6150 = vmatprep.mubr.msk.f32.mxu0 %vm7169_vm0, %v7168_v11 }
 0xcd1   :  { %6164 = vmatprep.subr.mxu0 %v7168_v11  ;;  %6175 = vmatprep.subr.mxu1 %v7168_v11 }
 0xd81   :  { %v1166_v23 = vpop.f32.mrf.mxu1 }
 0xd83   :  { %v6119_v25 = vpop.f32.mrf.mxu1 }
 0xd86   :  { %v1241_v26 = vpop.f32.mrf.mxu0 }
 0xd87   :  { %v1242_v27 = vadd.f32 %v1241_v26, %v1166_v23 }
 0xd88   :  { %v6130_v29 = vpop.f32.mrf.mxu0 }
 0xd89   :  { %v1245_v30 = vadd.f32 %v1242_v27, %v7330_v24  ;;  %v1338_v31 = vpop.f32.mrf.mxu1 }
 0xd8a   :  { %v1342_v32 = vadd.f32 %v5500_v28, %v1338_v31 }
 0xd8b   :  { %6939 = vtanh.f32 %v1245_v30  ;;  %v6141_v33 = vpop.f32.mrf.mxu1  ;;  %v5499_v36 = vmul.f32 -1.442695, %v1245_v30 }
 0xd8c   :  { %6941 = vtanh.f32 %v1342_v32  ;;  %v5502_v37 = vmul.f32 -1.442695, %v1342_v32 }
 0xd8d   :  { %6943 = vpow2.f32 %v5499_v36 }
 0xd8e   :  { %6945 = vpow2.f32 %v5502_v37 }
 0xd98   :  { %v6940_v34 = vpop.eup %6939 }
 0xd99   :  { %v6942_v35 = vpop.eup %6941  ;;  %1255 = vrot.lane.b32.xlu0 %v6940_v34, %s7166_s27 }
 0xd9a   :  { %1352 = vrot.lane.b32.xlu1 %v6942_v35, %s7166_s27  ;;  %v6944_v38 = vpop.eup %6943 }
 0xd9b   :  { %v6946_v39 = vpop.eup %6945  ;;  %v1249_v40 = vadd.f32 1.0, %v6944_v38 }
 0xd9c   :  { %v1346_v41 = vadd.f32 1.0, %v6946_v39 }
 0xd9d   :  { %6947 = vrcp.f32 %v1249_v40  ;;  %v7123_v40 = vld [vmem:[%s8917_s1 + $0x18] sm:$0xff] }
 0xd9e   :  { %6949 = vrcp.f32 %v1346_v41  ;;  %v7124_v41 = vld [vmem:[%s8917_s1 + $0x10] sm:$0xff] }
 0xdaa   :  { %v6948_v42 = vpop.eup %6947 }
 0xdab   :  { %v6950_v44 = vpop.eup %6949  ;;  %v1253_v48 = vmul.f32 %v6948_v42, %v7527_v2  ;;  %v5506_v2 = vld [vmem:[%s8915_s0 + $0x30] sm:$0xff] }
 0xdac   :  { %v1350_v49 = vmul.f32 %v6950_v44, %v7531_v5 }
 0xe0b   :  { %v1256_v43 = vpop.permute.xlu0 %1255 }
 0xe0c   :  { %v1353_v45 = vpop.permute.xlu1 %1352  ;;  %v1258_v46 = vmul.f32 %v6948_v42, %v1256_v43  ;;  %v7125_v43 = vld [vmem:[%s8917_s1 + $0x8] sm:$0xff] }
 0xe0d   :  { %v1355_v47 = vmul.f32 %v6950_v44, %v1353_v45  ;;  %v7127_v45 = vld [vmem:[%s8916_s2 + $0x18] sm:$0xff] }
 0xe0e   :  { %1260 = vrot.lane.b32.xlu0 %v1258_v46, %s7167_s28  ;;  %v7129_v46 = vld [vmem:[%s8916_s2 + $0x8] sm:$0xff] }
 0xe0f   :  { %1357 = vrot.lane.b32.xlu1 %v1355_v47, %s7167_s28 }
 0xe80   :  { %v1261_v50 = vpop.permute.xlu0 %1260 }
 0xe81   :  { %v1358_v51 = vpop.permute.xlu1 %1357  ;;  %v7581_v56 = vadd.f32 %v1261_v50, %v1253_v48 }
 0xe82   :  { %v7583_v57 = vadd.f32 %v1358_v51, %v1350_v49  ;;  %v5512_v49 = vld [vmem:[%s8915_s0 + $0x38] sm:$0xff]  ;;  %v7699_v51 = vld [vmem:[%s8918_s4] sm:$0xff] }
 0xe83   :  { %6951 = vtanh.f32 %v7581_v56 }
 0xe84   :  { %6953 = vtanh.f32 %v7583_v57 }
 0xe90   :  { %v6952_v58 = vpop.eup %6951 }
 0xe91   :  { %v6954_v59 = vpop.eup %6953  ;;  %1266 = vrot.lane.b32.xlu0 %v6952_v58, %s7166_s27 }
 0xe92   :  { %1363 = vrot.lane.b32.xlu1 %v6954_v59, %s7166_s27 }
 0xf03   :  { %v1267_v60 = vpop.permute.xlu0 %1266 }
 0xf04   :  { %v1364_v61 = vpop.permute.xlu1 %1363  ;;  %v1269_v62 = vmul.f32 %v6948_v42, %v1267_v60 }
 0xf05   :  { %v1366_v63 = vmul.f32 %v6950_v44, %v1364_v61  ;;  %v7126_v44 = vld [vmem:[%s8917_s1] sm:$0xff] }
 0xf06   :  { %1368 = vrot.lane.b32.xlu0 %v1269_v62, %s7167_s28 }
 0xf07   :  { %1443 = vrot.lane.b32.xlu1 %v1366_v63, %s7167_s28 }
 0xf78   :  { %v1369_v0 = vpop.permute.xlu0 %1368 }
 0xf79   :  { %v1444_v1 = vpop.permute.xlu1 %1443  ;;  %6151 = vmatmul.mubr.msk.f32.vlgmr.msra.gmra.mxu0 %vm85_vm1, %v1369_v0 }
 0xf7a   :  { %6162 = vmatmul.mubr.msk.f32.vlgmr.msra.gmra.mxu1 %vm85_vm1, %v1444_v1  ;;  %6165 = vmatpush3.msra.mxu0 %v7259_v13 }
 0xf7b   :  { %6166 = vmatprep.subr.mxu0 %v7168_v11  ;;  %6172 = vmatprep.mubr.msk.f32.mxu0 %vm7169_vm0, %v7168_v11 }
 0xf7c   :  { %6167 = vmatpush3.msra.mxu0 %v7271_v15  ;;  %6176 = vmatpush3.msra.mxu1 %v7350_v52 }
 0xf7d   :  { %6168 = vmatprep.subr.mxu0 %v7168_v11  ;;  %6177 = vmatprep.subr.mxu1 %v7168_v11 }
 0xf7e   :  { %6169 = vmatpush3.msra.mxu0 %v7283_v17  ;;  %6178 = vmatpush3.msra.mxu1 %v7355_v53 }
 0xf7f   :  { %6170 = vmatprep.subr.mxu0 %v7168_v11  ;;  %6179 = vmatprep.subr.mxu1 %v7168_v11 }
 0xf80   :  { %6171 = vmatpush3.msra.mxu0 %v7299_v19  ;;  %6180 = vmatpush3.msra.mxu1 %v7362_v54 }
 0xf81   :  { %6173 = vmatmul.mubr.msk.f32.vlgmr.msra.gmra.mxu0 %vm85_vm1, %v1444_v1  ;;  %6181 = vmatprep.subr.mxu1 %v7168_v11 }
 0xf82   :  { %6186 = vmatprep.subr.mxu0 %v7168_v11  ;;  %6182 = vmatpush3.msra.mxu1 %v7369_v55 }
 0xf83   :  { %6187 = vmatpush3.msra.mxu0 %v7254_v12  ;;  %6183 = vmatprep.mubr.msk.f32.mxu1 %vm7169_vm0, %v7168_v11 }
 0xf84   :  { %6188 = vmatprep.subr.mxu0 %v7168_v11  ;;  %6197 = vmatprep.subr.mxu1 %v7168_v11 }
 0xf85   :  { %6189 = vmatpush3.msra.mxu0 %v7264_v14  ;;  %6194 = vmatprep.mubr.msk.f32.mxu0 %vm7169_vm0, %v7168_v11 }
 0xf86   :  { %6190 = vmatprep.subr.mxu0 %v7168_v11 }
 0xf87   :  { %6191 = vmatpush3.msra.mxu0 %v7278_v16 }
 0xf88   :  { %6192 = vmatprep.subr.mxu0 %v7168_v11 }
 0xf89   :  { %6193 = vmatpush3.msra.mxu0 %v7292_v18 }
 0xf8a   :  { %6208 = vmatprep.subr.mxu0 %v7168_v11 }
0x1039   :  { %v1438_v12 = vpop.f32.mrf.mxu0 }
0x103a   :  { %v1513_v13 = vpop.f32.mrf.mxu1 }
0x103b   :  { %v1514_v15 = vadd.f32 %v1513_v13, %v1438_v12  ;;  %v6152_v17 = vpop.f32.mrf.mxu0 }
0x103c   :  { %v6163_v19 = vpop.f32.mrf.mxu1 }
0x103d   :  { %v1517_v14 = vadd.f32 %v1514_v15, %v7330_v24 }
0x103f   :  { %6955 = vtanh.f32 %v1517_v14  ;;  %v5505_v6 = vmul.f32 -1.442695, %v1517_v14 }
0x1041   :  { %v1610_v3 = vpop.f32.mrf.mxu0 }
0x1042   :  { %v1614_v16 = vadd.f32 %v5506_v2, %v1610_v3 }
0x1043   :  { %v6174_v4 = vpop.f32.mrf.mxu0 }
0x1044   :  { %6957 = vtanh.f32 %v1614_v16  ;;  %v5508_v7 = vmul.f32 -1.442695, %v1614_v16 }
0x1045   :  { %6959 = vpow2.f32 %v5505_v6 }
0x1046   :  { %6961 = vpow2.f32 %v5508_v7 }
0x104c   :  { %v6956_v5 = vpop.eup %6955 }
0x104d   :  { %1527 = vrot.lane.b32.xlu0 %v6956_v5, %s7166_s27 }
0x1051   :  { %v6958_v18 = vpop.eup %6957 }
0x1052   :  { %1624 = vrot.lane.b32.xlu1 %v6958_v18, %s7166_s27  ;;  %v6960_v24 = vpop.eup %6959 }
0x1053   :  { %v1521_v8 = vadd.f32 1.0, %v6960_v24  ;;  %v6962_v9 = vpop.eup %6961 }
0x1054   :  { %v1618_v10 = vadd.f32 1.0, %v6962_v9 }
0x1055   :  { %6963 = vrcp.f32 %v1521_v8 }
0x1056   :  { %6965 = vrcp.f32 %v1618_v10 }
0x1062   :  { %v6964_v20 = vpop.eup %6963 }
0x1063   :  { %v6966_v23 = vpop.eup %6965  ;;  %v1525_v27 = vmul.f32 %v6964_v20, %v7581_v56 }
0x1064   :  { %v1622_v30 = vmul.f32 %v6966_v23, %v7583_v57 }
0x10bf   :  { %v1528_v21 = vpop.permute.xlu0 %1527 }
0x10c0   :  { %v1530_v22 = vmul.f32 %v6964_v20, %v1528_v21 }
0x10c2   :  { %1532 = vrot.lane.b32.xlu0 %v1530_v22, %s7167_s28  ;;  %v7721_v22 = vld [vmem:[%s8920_s7 + $0x18] sm:$0xff] }
0x10c4   :  { %v1625_v25 = vpop.permute.xlu1 %1624 }
0x10c5   :  { %v1627_v26 = vmul.f32 %v6966_v23, %v1625_v25  ;;  %v7726_v25 = vld [vmem:[%s8921_s6 + $0x78] sm:$0xff] }
0x10c7   :  { %1629 = vrot.lane.b32.xlu1 %v1627_v26, %s7167_s28 }
0x1134   :  { %v1533_v28 = vpop.permute.xlu0 %1532 }
0x1135   :  { %v7633_v29 = vadd.f32 %v1533_v28, %v1525_v27  ;;  %v7732_v27 = vld [vmem:[%s8920_s7 + $0x10] sm:$0xff] }
0x1136   :  { %v7739_v28 = vld [vmem:[%s8921_s6 + $0x70] sm:$0xff] }
0x1137   :  { %6967 = vtanh.f32 %v7633_v29 }
0x1139   :  { %v1630_v31 = vpop.permute.xlu1 %1629 }
0x113a   :  { %v7637_v32 = vadd.f32 %v1630_v31, %v1622_v30  ;;  %v7753_v30 = vld [vmem:[%s8921_s6 + $0x68] sm:$0xff]  ;;  %v7760_v31 = vld [vmem:[%s8920_s7] sm:$0xff] }
0x113c   :  { %6969 = vtanh.f32 %v7637_v32 }
0x1144   :  { %v6968_v33 = vpop.eup %6967 }
0x1145   :  { %1538 = vrot.lane.b32.xlu0 %v6968_v33, %s7166_s27  ;;  %v7776_v33 = vld [vmem:[%s8921_s6 + $0x58] sm:$0xff] }
0x1149   :  { %v6970_v34 = vpop.eup %6969 }
0x114a   :  { %1635 = vrot.lane.b32.xlu1 %v6970_v34, %s7166_s27  ;;  %v7786_v34 = vld [vmem:[%s8921_s6 + $0x50] sm:$0xff] }
0x11b7   :  { %v1539_v35 = vpop.permute.xlu0 %1538 }
0x11b8   :  { %v1541_v36 = vmul.f32 %v6964_v20, %v1539_v35  ;;  %v7795_v35 = vld [vmem:[%s8921_s6 + $0x48] sm:$0xff] }
0x11ba   :  { %1640 = vrot.lane.b32.xlu0 %v1541_v36, %s7167_s28  ;;  %v7805_v36 = vld [vmem:[%s8921_s6 + $0x40] sm:$0xff] }
0x11bc   :  { %v1636_v37 = vpop.permute.xlu1 %1635 }
0x11bd   :  { %v1638_v38 = vmul.f32 %v6966_v23, %v1636_v37  ;;  %v7812_v37 = vld [vmem:[%s8921_s6 + $0x38] sm:$0xff] }
0x11bf   :  { %1715 = vrot.lane.b32.xlu1 %v1638_v38, %s7167_s28  ;;  %v7819_v38 = vld [vmem:[%s8921_s6 + $0x30] sm:$0xff] }
0x122c   :  { %v1641_v39 = vpop.permute.xlu0 %1640 }
0x122d   :  { %6184 = vmatmul.mubr.msk.f32.vlgmr.msra.gmra.mxu1 %vm85_vm1, %v1641_v39  ;;  %v2120_v39 = vlaneseq }
0x122e   :  { %6198 = vmatpush3.msra.mxu1 %v7123_v40  ;;  %6205 = vmatprep.mubr.msk.f32.mxu1 %vm7169_vm0, %v7168_v11  ;;  %v7826_v40 = vld [vmem:[%s8921_s6 + $0x28] sm:$0xff] }
0x122f   :  { %6199 = vmatprep.subr.mxu1 %v7168_v11 }
0x1230   :  { %6200 = vmatpush3.msra.mxu1 %v7124_v41  ;;  %v7833_v41 = vld [vmem:[%s8921_s6 + $0x20] sm:$0xff] }
0x1231   :  { %6201 = vmatprep.subr.mxu1 %v7168_v11  ;;  %v1716_v42 = vpop.permute.xlu1 %1715 }
0x1232   :  { %6202 = vmatpush3.msra.mxu1 %v7125_v43  ;;  %6195 = vmatmul.mubr.msk.f32.vlgmr.msra.gmra.mxu0 %vm85_vm1, %v1716_v42  ;;  %v7840_v43 = vld [vmem:[%s8921_s6 + $0x18] sm:$0xff] }
0x1233   :  { %6203 = vmatprep.subr.mxu1 %v7168_v11  ;;  %6209 = vmatpush3.msra.mxu0 %v7350_v52  ;;  %v7128_v52 = vld [vmem:[%s8916_s2 + $0x10] sm:$0xff] }
0x1234   :  { %6204 = vmatpush3.msra.mxu1 %v7126_v44  ;;  %6210 = vmatprep.subr.mxu0 %v7168_v11  ;;  %v7847_v44 = vld [vmem:[%s8921_s6 + $0x10] sm:$0xff] }
0x1235   :  { %6206 = vmatmul.mubr.msk.f32.vlgmr.msra.gmra.mxu1 %vm85_vm1, %v1716_v42  ;;  %6219 = vmatprep.subr.mxu1 %v7168_v11  ;;  %v2121_v42 = vand.u32 127, %v2120_v39 }
0x1236   :  { %6220 = vmatpush3.msra.mxu1 %v7127_v45  ;;  %6211 = vmatpush3.msra.mxu0 %v7355_v53  ;;  %v7130_v53 = vld [vmem:[%s8916_s2] sm:$0xff] }
0x1237   :  { %6221 = vmatprep.subr.mxu1 %v7168_v11  ;;  %6212 = vmatprep.subr.mxu0 %v7168_v11  ;;  %v7850_v45 = vcvt.s32.f32 %v2121_v42 }
0x1238   :  { %6222 = vmatpush3.msra.mxu1 %v7128_v52  ;;  %6213 = vmatpush3.msra.mxu0 %v7362_v54  ;;  %v7856_v52 = vld [vmem:[%s8921_s6 + $0x8] sm:$0xff] }
0x1239   :  { %6223 = vmatprep.subr.mxu1 %v7168_v11  ;;  %6214 = vmatprep.subr.mxu0 %v7168_v11  ;;  %vm2124_vm2 = vcmp.eq.f32.partialorder %v7850_v45, 16.0  ;;  %vm2123_vm3 = vcmp.lt.f32.partialorder %v7850_v45, 17.0 }
0x123a   :  { %6224 = vmatpush3.msra.mxu1 %v7129_v46  ;;  %6215 = vmatpush3.msra.mxu0 %v7369_v55  ;;  %v7863_v46 = vld [vmem:[%s8921_s6] sm:$0xff] }
0x123b   :  { %6225 = vmatprep.subr.mxu1 %v7168_v11  ;;  %6227 = vmatprep.mubr.msk.f32.mxu1 %vm7169_vm0, %v7168_v11 }
0x123c   :  { %6226 = vmatpush3.msra.mxu1 %v7130_v53  ;;  %6216 = vmatprep.mubr.msk.f32.mxu0 %vm7169_vm0, %v7168_v11  ;;  %v7170_v53 = vmov 1.0  }
0x123d   :  { %6241 = vmatprep.subr.mxu1 %v7168_v11  ;;  %6230 = vmatprep.subr.mxu0 %v7168_v11 }
0x12ed   :  { %v1710_v54 = vpop.f32.mrf.mxu1 }
0x12ef   :  { %v6185_v47 = vpop.f32.mrf.mxu1 }
0x12f2   :  { %v1785_v55 = vpop.f32.mrf.mxu0 }
0x12f3   :  { %v1786_v48 = vadd.f32 %v1785_v55, %v1710_v54 }
0x12f4   :  { %v6196_v50 = vpop.f32.mrf.mxu0 }
0x12f5   :  { %v1789_v56 = vadd.f32 %v7699_v51, %v1786_v48  ;;  %v1882_v57 = vpop.f32.mrf.mxu1 }
0x12f6   :  { %v1886_v58 = vadd.f32 %v5512_v49, %v1882_v57 }
0x12f7   :  { %6971 = vtanh.f32 %v1789_v56  ;;  %v6207_v59 = vpop.f32.mrf.mxu1  ;;  %v5511_v62 = vmul.f32 -1.442695, %v1789_v56 }
0x12f8   :  { %6973 = vtanh.f32 %v1886_v58  ;;  %v5514_v63 = vmul.f32 -1.442695, %v1886_v58 }
0x12f9   :  { %6975 = vpow2.f32 %v5511_v62 }
0x12fa   :  { %6977 = vpow2.f32 %v5514_v63 }
0x1304   :  { %v6972_v60 = vpop.eup %6971 }
0x1305   :  { %v6974_v61 = vpop.eup %6973  ;;  %1799 = vrot.lane.b32.xlu1 %v6972_v60, %s7166_s27 }
0x1306   :  { %1896 = vrot.lane.b32.xlu0 %v6974_v61, %s7166_s27  ;;  %v6976_v0 = vpop.eup %6975 }
0x1307   :  { %v6978_v1 = vpop.eup %6977  ;;  %v1793_v12 = vadd.f32 1.0, %v6976_v0 }
0x1308   :  { %v1890_v13 = vadd.f32 1.0, %v6978_v1 }
0x1309   :  { %6979 = vrcp.f32 %v1793_v12 }
0x130a   :  { %6981 = vrcp.f32 %v1890_v13 }
0x1316   :  { %v6980_v15 = vpop.eup %6979 }
0x1317   :  { %v6982_v19 = vpop.eup %6981  ;;  %v1797_v16 = vmul.f32 %v6980_v15, %v7633_v29  ;;  %v7746_v29 = vld [vmem:[%s8920_s7 + $0x8] sm:$0xff] }
0x1318   :  { %v1894_v4 = vmul.f32 %v6982_v19, %v7637_v32  ;;  %v7767_v32 = vld [vmem:[%s8921_s6 + $0x60] sm:$0xff] }
0x1377   :  { %v1800_v17 = vpop.permute.xlu1 %1799 }
0x1378   :  { %v1897_v14 = vpop.permute.xlu0 %1896  ;;  %v1802_v2 = vmul.f32 %v6980_v15, %v1800_v17 }
0x1379   :  { %v1899_v3 = vmul.f32 %v6982_v19, %v1897_v14 }
0x137a   :  { %1804 = vrot.lane.b32.xlu1 %v1802_v2, %s7167_s28 }
0x137b   :  { %1901 = vrot.lane.b32.xlu0 %v1899_v3, %s7167_s28 }
0x13ec   :  { %v1805_v5 = vpop.permute.xlu1 %1804 }
0x13ed   :  { %v1902_v18 = vpop.permute.xlu0 %1901  ;;  %v7708_v6 = vadd.f32 %v1805_v5, %v1797_v16 }
0x13ee   :  { %v7710_v7 = vadd.f32 %v1902_v18, %v1894_v4 }
0x13ef   :  { %6983 = vtanh.f32 %v7708_v6 }
0x13f0   :  { %6985 = vtanh.f32 %v7710_v7 }
0x13fc   :  { %v6984_v24 = vpop.eup %6983 }
0x13fd   :  { %v6986_v8 = vpop.eup %6985  ;;  %1810 = vrot.lane.b32.xlu1 %v6984_v24, %s7166_s27 }
0x13fe   :  { %1907 = vrot.lane.b32.xlu0 %v6986_v8, %s7166_s27 }
0x146f   :  { %v1811_v9 = vpop.permute.xlu1 %1810 }
0x1470   :  { %v1908_v10 = vpop.permute.xlu0 %1907  ;;  %v1813_v20 = vmul.f32 %v6980_v15, %v1811_v9 }
0x1471   :  { %v1910_v21 = vmul.f32 %v6982_v19, %v1908_v10  ;;  %v7921_v10 = vld [vmem:[%s8922_s9 + $0x18] sm:$0xff] }
0x1472   :  { %1912 = vrot.lane.b32.xlu1 %v1813_v20, %s7167_s28  ;;  %v7940_v20 = vld [vmem:[%s8922_s9] sm:$0xff] }
0x1473   :  { %1987 = vrot.lane.b32.xlu0 %v1910_v21, %s7167_s28 }
0x14e4   :  { %v1913_v23 = vpop.permute.xlu1 %1912 }
0x14e5   :  { %v1988_v26 = vpop.permute.xlu0 %1987  ;;  %6217 = vmatmul.mubr.msk.f32.vlgmr.msra.gmra.mxu0 %vm85_vm1, %v1913_v23 }
0x14e6   :  { %6228 = vmatmul.mubr.msk.f32.vlgmr.msra.gmra.mxu1 %vm85_vm1, %v1988_v26  ;;  %6231 = vmatpush3.msra.mxu0 %v7721_v22 }
0x14e7   :  { %6242 = vmatpush3.msra.mxu1 %v7726_v25  ;;  %6232 = vmatprep.subr.mxu0 %v7168_v11 }
0x14e8   :  { %6243 = vmatprep.subr.mxu1 %v7168_v11  ;;  %6233 = vmatpush3.msra.mxu0 %v7732_v27 }
0x14e9   :  { %6244 = vmatpush3.msra.mxu1 %v7739_v28  ;;  %6234 = vmatprep.subr.mxu0 %v7168_v11 }
0x14ea   :  { %6245 = vmatprep.subr.mxu1 %v7168_v11  ;;  %6235 = vmatpush3.msra.mxu0 %v7746_v29 }
0x14eb   :  { %6246 = vmatpush3.msra.mxu1 %v7753_v30  ;;  %6236 = vmatprep.subr.mxu0 %v7168_v11 }
0x14ec   :  { %6247 = vmatprep.subr.mxu1 %v7168_v11  ;;  %6237 = vmatpush3.msra.mxu0 %v7760_v31 }
0x14ed   :  { %6238 = vmatprep.mubr.msk.f32.mxu0 %vm7169_vm0, %v7168_v11  ;;  %6248 = vmatpush3.msra.mxu1 %v7767_v32 }
0x14ee   :  { %6239 = vmatmul.mubr.msk.f32.vlgmr.msra.gmra.mxu0 %vm85_vm1, %v1988_v26  ;;  %6249 = vmatprep.subr.mxu1 %v7168_v11 }
0x14ef   :  { %6250 = vmatpush3.msra.mxu1 %v7776_v33  ;;  %6273 = vmatprep.mubr.msk.f32.mxu1 %vm7169_vm0, %v7168_v11 }
0x14f0   :  { %6251 = vmatprep.subr.mxu1 %v7168_v11  ;;  %6276 = vmatprep.subr.mxu0 %v7168_v11 }
0x14f1   :  { %6252 = vmatpush3.msra.mxu1 %v7786_v34  ;;  %6284 = vmatprep.mubr.msk.f32.mxu0 %vm7169_vm0, %v7168_v11 }
0x14f2   :  { %6253 = vmatprep.subr.mxu1 %v7168_v11  ;;  %6277 = vmatpush3.msra.mxu0 %v7921_v10 }
0x14f3   :  { %6254 = vmatpush3.msra.mxu1 %v7795_v35  ;;  %6278 = vmatprep.subr.mxu0 %v7168_v11 }
0x14f4   :  { %6255 = vmatprep.subr.mxu1 %v7168_v11 }
0x14f5   :  { %6256 = vmatpush3.msra.mxu1 %v7805_v36 }
0x14f6   :  { %6257 = vmatprep.subr.mxu1 %v7168_v11 }
0x14f7   :  { %6258 = vmatpush3.msra.mxu1 %v7812_v37 }
0x14f8   :  { %6259 = vmatprep.subr.mxu1 %v7168_v11 }
0x14f9   :  { %6260 = vmatpush3.msra.mxu1 %v7819_v38 }
0x14fa   :  { %6261 = vmatprep.subr.mxu1 %v7168_v11 }
0x14fb   :  { %6262 = vmatpush3.msra.mxu1 %v7826_v40 }
0x14fc   :  { %6263 = vmatprep.subr.mxu1 %v7168_v11 }
0x14fd   :  { %6264 = vmatpush3.msra.mxu1 %v7833_v41 }
0x14fe   :  { %6265 = vmatprep.subr.mxu1 %v7168_v11 }
0x14ff   :  { %6266 = vmatpush3.msra.mxu1 %v7840_v43 }
0x1500   :  { %6267 = vmatprep.subr.mxu1 %v7168_v11 }
0x1501   :  { %6268 = vmatpush3.msra.mxu1 %v7847_v44 }
0x1502   :  { %6269 = vmatprep.subr.mxu1 %v7168_v11 }
0x1503   :  { %6270 = vmatpush3.msra.mxu1 %v7856_v52 }
0x1504   :  { %6271 = vmatprep.subr.mxu1 %v7168_v11 }
0x1505   :  { %6272 = vmatpush3.msra.mxu1 %v7863_v46 }
0x1506   :  { %6274 = vmatmul.mubr.msk.f32.vlgmr.msra.gmra.mxu1 %vm2124_vm2, %v7170_v53  ;;  %6320 = vmatprep.subr.mxu1 %v7168_v11  ;;  %v7952_v53 = vld [vmem:[%s8923_s8 + $0x18] sm:$0xff] }
0x1507   :  { %6321 = vmatpush3.msra.mxu1 %v7726_v25  ;;  %6352 = vmatprep.mubr.msk.f32.mxu1 %vm7169_vm0, %v7168_v11 }
0x1508   :  { %6322 = vmatprep.subr.mxu1 %v7168_v11 }
0x1509   :  { %6323 = vmatpush3.msra.mxu1 %v7739_v28 }
0x150a   :  { %6324 = vmatprep.subr.mxu1 %v7168_v11 }
0x150b   :  { %6325 = vmatpush3.msra.mxu1 %v7753_v30 }
0x150c   :  { %6326 = vmatprep.subr.mxu1 %v7168_v11 }
0x150d   :  { %6327 = vmatpush3.msra.mxu1 %v7767_v32 }
0x150e   :  { %6328 = vmatprep.subr.mxu1 %v7168_v11 }
0x150f   :  { %6329 = vmatpush3.msra.mxu1 %v7776_v33 }
0x1510   :  { %6330 = vmatprep.subr.mxu1 %v7168_v11 }
0x1511   :  { %6331 = vmatpush3.msra.mxu1 %v7786_v34 }
0x1512   :  { %6332 = vmatprep.subr.mxu1 %v7168_v11 }
0x1513   :  { %6333 = vmatpush3.msra.mxu1 %v7795_v35 }
0x1514   :  { %6334 = vmatprep.subr.mxu1 %v7168_v11 }
0x1515   :  { %6335 = vmatpush3.msra.mxu1 %v7805_v36 }
0x1516   :  { %6336 = vmatprep.subr.mxu1 %v7168_v11 }
0x1517   :  { %6337 = vmatpush3.msra.mxu1 %v7812_v37 }
0x1518   :  { %6338 = vmatprep.subr.mxu1 %v7168_v11 }
0x1519   :  { %6339 = vmatpush3.msra.mxu1 %v7819_v38 }
0x151a   :  { %6340 = vmatprep.subr.mxu1 %v7168_v11 }
0x151b   :  { %6341 = vmatpush3.msra.mxu1 %v7826_v40 }
0x151c   :  { %6342 = vmatprep.subr.mxu1 %v7168_v11 }
0x151d   :  { %6343 = vmatpush3.msra.mxu1 %v7833_v41 }
0x151e   :  { %6344 = vmatprep.subr.mxu1 %v7168_v11 }
0x151f   :  { %6345 = vmatpush3.msra.mxu1 %v7840_v43 }
0x1520   :  { %6346 = vmatprep.subr.mxu1 %v7168_v11 }
0x1521   :  { %6347 = vmatpush3.msra.mxu1 %v7847_v44 }
0x1522   :  { %6348 = vmatprep.subr.mxu1 %v7168_v11 }
0x1523   :  { %6349 = vmatpush3.msra.mxu1 %v7856_v52 }
0x1524   :  { %6350 = vmatprep.subr.mxu1 %v7168_v11 }
0x1525   :  { %6351 = vmatpush3.msra.mxu1 %v7863_v46 }
0x1526   :  { %6399 = vmatprep.subr.mxu1 %v7168_v11 }
0x15a5   :  { %v1982_v54 = vpop.f32.mrf.mxu0 }
0x15a6   :  { %v2057_v47 = vpop.f32.mrf.mxu1 }
0x15a7   :  { %v2058_v55 = vadd.f32 %v2057_v47, %v1982_v54  ;;  %v6218_v48 = vpop.f32.mrf.mxu0  ;;  %v7958_v47 = vld [vmem:[%s8923_s8 + $0x10] sm:$0xff] }
0x15a8   :  { %v6229_v49 = vpop.f32.mrf.mxu1  ;;  %v7974_v48 = vld [vmem:[%s8923_s8] sm:$0xff] }
0x15a9   :  { %v2061_v50 = vadd.f32 %v7699_v51, %v2058_v55  ;;  %v7967_v55 = vld [vmem:[%s8923_s8 + $0x8] sm:$0xff] }
0x15ab   :  { %6987 = vtanh.f32 %v2061_v50  ;;  %v5517_v63 = vmul.f32 -1.442695, %v2061_v50 }
0x15ae   :  { %v2193_v56 = vpop.f32.mrf.mxu0 }
0x15b0   :  { %v6240_v57 = vpop.f32.mrf.mxu0 }
0x15b1   :  { %v7986_v57 = vld [vmem:[%s8924_s10] sm:$0xff] }
0x15b8   :  { %v6988_v58 = vpop.eup %6987 }
0x15b9   :  { %2071 = vrot.lane.b32.xlu0 %v6988_v58, %s7166_s27 }
0x15c6   :  { %v2263_v59 = vpop.f32.mrf.mxu1 }
0x15c7   :  { %v2264_v60 = vadd.f32 %v2263_v59, %v2193_v56 }
0x15c8   :  { %v6275_v61 = vpop.f32.mrf.mxu1 }
0x15c9   :  { %6989 = vtanh.f32 %v2264_v60  ;;  %v5521_v12 = vmul.f32 -1.442695, %v2264_v60 }
0x15ca   :  { %6991 = vpow2.f32 %v5517_v63 }
0x15d6   :  { %v6990_v62 = vpop.eup %6989 }
0x15d7   :  { %2276 = vrot.lane.b32.xlu1 %v6990_v62, %s7166_s27  ;;  %v6992_v0 = vpop.eup %6991 }
0x15d8   :  { %v2065_v1 = vadd.f32 1.0, %v6992_v0 }
0x15da   :  { %6993 = vrcp.f32 %v2065_v1 }
0x15db   :  { %6995 = vpow2.f32 %v5521_v12 }
0x15e7   :  { %v6994_v51 = vpop.eup %6993 }
0x15e8   :  { %v6996_v17 = vpop.eup %6995  ;;  %v2069_v16 = vmul.f32 %v6994_v51, %v7708_v6  ;;  %v7926_v6 = vld [vmem:[%s8922_s9 + $0x10] sm:$0xff] }
0x15e9   :  { %v2270_v19 = vadd.f32 1.0, %v6996_v17  ;;  %6279 = vmatpush3.msra.mxu0 %v7926_v6 }
0x15ea   :  { %6280 = vmatprep.subr.mxu0 %v7168_v11 }
0x15eb   :  { %6997 = vrcp.f32 %v2270_v19 }
0x15f8   :  { %v6998_v14 = vpop.eup %6997 }
0x15f9   :  { %v2274_v24 = vmul.f32 %v6998_v14, %v7710_v7  ;;  %v7933_v7 = vld [vmem:[%s8922_s9 + $0x8] sm:$0xff] }
0x15fa   :  { %6281 = vmatpush3.msra.mxu0 %v7933_v7 }
0x15fb   :  { %6282 = vmatprep.subr.mxu0 %v7168_v11 }
0x15fc   :  { %6283 = vmatpush3.msra.mxu0 %v7940_v20 }
0x15fd   :  { %6287 = vmatprep.subr.mxu0 %v7168_v11 }
0x162b   :  { %v2072_v13 = vpop.permute.xlu0 %2071 }
0x162c   :  { %v2074_v15 = vmul.f32 %v6994_v51, %v2072_v13 }
0x162e   :  { %2076 = vrot.lane.b32.xlu0 %v2074_v15, %s7167_s28 }
0x1649   :  { %v2277_v2 = vpop.permute.xlu1 %2276 }
0x164a   :  { %v2279_v3 = vmul.f32 %v6998_v14, %v2277_v2  ;;  %v8003_v2 = vld [vmem:[%s8925_s11 + $0x10] sm:$0xff] }
0x164c   :  { %2281 = vrot.lane.b32.xlu1 %v2279_v3, %s7167_s28  ;;  %v8010_v3 = vld [vmem:[%s8925_s11 + $0x8] sm:$0xff] }
0x16a0   :  { %v2077_v4 = vpop.permute.xlu0 %2076 }
0x16a1   :  { %v7910_v5 = vadd.f32 %v2077_v4, %v2069_v16  ;;  %v8017_v16 = vld [vmem:[%s8925_s11] sm:$0xff] }
0x16a3   :  { %6999 = vtanh.f32 %v7910_v5 }
0x16b0   :  { %v7000_v18 = vpop.eup %6999 }
0x16b1   :  { %2082 = vrot.lane.b32.xlu0 %v7000_v18, %s7166_s27 }
0x16be   :  { %v2282_v8 = vpop.permute.xlu1 %2281 }
0x16bf   :  { %v7915_v9 = vadd.f32 %v2282_v8, %v2274_v24  ;;  %v8061_v8 = vld [vmem:[%s8926_s12] sm:$0xff] }
0x16c1   :  { %7001 = vtanh.f32 %v7915_v9 }
0x16ce   :  { %v7002_v21 = vpop.eup %7001 }
0x16cf   :  { %2287 = vrot.lane.b32.xlu1 %v7002_v21, %s7166_s27 }
0x1723   :  { %v2083_v23 = vpop.permute.xlu0 %2082 }
0x1724   :  { %v2085_v26 = vmul.f32 %v6994_v51, %v2083_v23 }
0x1726   :  { %2292 = vrot.lane.b32.xlu0 %v2085_v26, %s7167_s28 }
0x1741   :  { %v2288_v39 = vpop.permute.xlu1 %2287 }
0x1742   :  { %v2290_v42 = vmul.f32 %v6998_v14, %v2288_v39  ;;  %v7998_v14 = vld [vmem:[%s8925_s11 + $0x18] sm:$0xff] }
0x1744   :  { %2367 = vrot.lane.b32.xlu1 %v2290_v42, %s7167_s28 }
0x1798   :  { %v2293_v54 = vpop.permute.xlu0 %2292 }
0x1799   :  { %6285 = vmatmul.mubr.msk.f32.vlgmr.msra.gmra.mxu0 %vm85_vm1, %v2293_v54 }
0x179a   :  { %6288 = vmatpush3.msra.mxu0 %v7952_v53  ;;  %6295 = vmatprep.mubr.msk.f32.mxu0 %vm7169_vm0, %v7168_v11 }
0x179b   :  { %6289 = vmatprep.subr.mxu0 %v7168_v11 }
0x179c   :  { %6290 = vmatpush3.msra.mxu0 %v7958_v47 }
0x179d   :  { %6291 = vmatprep.subr.mxu0 %v7168_v11 }
0x179e   :  { %6292 = vmatpush3.msra.mxu0 %v7967_v55 }
0x179f   :  { %6293 = vmatprep.subr.mxu0 %v7168_v11 }
0x17a0   :  { %6294 = vmatpush3.msra.mxu0 %v7974_v48 }
0x17a1   :  { %6298 = vmatprep.subr.mxu0 %v7168_v11 }
0x17b6   :  { %v2368_v49 = vpop.permute.xlu1 %2367 }
0x17b7   :  { %6296 = vmatmul.mubr.msk.f32.vlgmr.msra.gmra.mxu0 %vm85_vm1, %v2368_v49 }
0x17b8   :  { %6306 = vmatprep.mubr.msk.f32.mxu0 %vm7169_vm0, %v7168_v11  ;;  %6299 = vmatpush3.msra.mxu0 %v7998_v14 }
0x17b9   :  { %6300 = vmatprep.subr.mxu0 %v7168_v11 }
0x17ba   :  { %6301 = vmatpush3.msra.mxu0 %v8003_v2 }
0x17bb   :  { %6302 = vmatprep.subr.mxu0 %v7168_v11 }
0x17bc   :  { %6303 = vmatpush3.msra.mxu0 %v8010_v3 }
0x17bd   :  { %6304 = vmatprep.subr.mxu0 %v7168_v11 }
0x17be   :  { %6305 = vmatpush3.msra.mxu0 %v8017_v16 }
0x17bf   :  { %6309 = vmatprep.subr.mxu0 %v7168_v11 }
0x1859   :  { %v2362_v50 = vpop.f32.mrf.mxu0 }
0x185b   :  { %v6286_v56 = vpop.f32.mrf.mxu0 }
0x1877   :  { %v2437_v58 = vpop.f32.mrf.mxu0 }
0x1878   :  { %v2438_v59 = vadd.f32 %v2437_v58, %v2362_v50 }
0x1879   :  { %v6297_v60 = vpop.f32.mrf.mxu0 }
0x187a   :  { %v2441_v61 = vadd.f32 %v2438_v59, %v7986_v57 }
0x187c   :  { %7003 = vtanh.f32 %v2441_v61  ;;  %v5524_v63 = vmul.f32 -1.442695, %v2441_v61 }
0x187e   :  { %7005 = vpow2.f32 %v5524_v63 }
0x1889   :  { %v7004_v62 = vpop.eup %7003 }
0x188a   :  { %2451 = vrot.lane.b32.xlu0 %v7004_v62, %s7166_s27 }
0x188b   :  { %v7006_v0 = vpop.eup %7005 }
0x188c   :  { %v2445_v1 = vadd.f32 1.0, %v7006_v0 }
0x188e   :  { %7007 = vrcp.f32 %v2445_v1 }
0x189b   :  { %v7008_v12 = vpop.eup %7007 }
0x189c   :  { %v2449_v15 = vmul.f32 %v7008_v12, %v7910_v5 }
0x18fc   :  { %v2452_v51 = vpop.permute.xlu0 %2451 }
0x18fd   :  { %v2454_v13 = vmul.f32 %v7008_v12, %v2452_v51 }
0x18ff   :  { %2456 = vrot.lane.b32.xlu1 %v2454_v13, %s7167_s28 }
0x1971   :  { %v2457_v17 = vpop.permute.xlu1 %2456 }
0x1972   :  { %v7992_v19 = vadd.f32 %v2457_v17, %v2449_v15 }
0x1974   :  { %7009 = vtanh.f32 %v7992_v19 }
0x1981   :  { %v7010_v4 = vpop.eup %7009 }
0x1982   :  { %2462 = vrot.lane.b32.xlu0 %v7010_v4, %s7166_s27 }
0x19f4   :  { %v2463_v5 = vpop.permute.xlu0 %2462 }
0x19f5   :  { %v2465_v18 = vmul.f32 %v7008_v12, %v2463_v5 }
0x19f7   :  { %2467 = vrot.lane.b32.xlu1 %v2465_v18, %s7167_s28 }
0x1a69   :  { %v2468_v24 = vpop.permute.xlu1 %2467 }
0x1a6a   :  { %6307 = vmatmul.mubr.msk.f32.vlgmr.msra.gmra.mxu0 %vm85_vm1, %v2468_v24 }
0x1a6b   :  { %6310 = vmatpush3.msra.mxu0 %v7721_v22  ;;  %6317 = vmatprep.mubr.msk.f32.mxu0 %vm7169_vm0, %v7168_v11 }
0x1a6c   :  { %6311 = vmatprep.subr.mxu0 %v7168_v11 }
0x1a6d   :  { %6312 = vmatpush3.msra.mxu0 %v7732_v27 }
0x1a6e   :  { %6313 = vmatprep.subr.mxu0 %v7168_v11 }
0x1a6f   :  { %6314 = vmatpush3.msra.mxu0 %v7746_v29 }
0x1a70   :  { %6315 = vmatprep.subr.mxu0 %v7168_v11 }
0x1a71   :  { %6316 = vmatpush3.msra.mxu0 %v7760_v31 }
0x1a72   :  { %6318 = vmatmul.mubr.msk.f32.vlgmr.msra.gmra.mxu0 %vm85_vm1, %v2368_v49  ;;  %6355 = vmatprep.subr.mxu0 %v7168_v11 }
0x1a73   :  { %6356 = vmatpush3.msra.mxu0 %v7921_v10  ;;  %6363 = vmatprep.mubr.msk.f32.mxu0 %vm7169_vm0, %v7168_v11 }
0x1a74   :  { %6357 = vmatprep.subr.mxu0 %v7168_v11 }
0x1a75   :  { %6358 = vmatpush3.msra.mxu0 %v7926_v6 }
0x1a76   :  { %6359 = vmatprep.subr.mxu0 %v7168_v11 }
0x1a77   :  { %6360 = vmatpush3.msra.mxu0 %v7933_v7 }
0x1a78   :  { %6361 = vmatprep.subr.mxu0 %v7168_v11 }
0x1a79   :  { %6362 = vmatpush3.msra.mxu0 %v7940_v20 }
0x1a7a   :  { %6364 = vmatmul.mubr.msk.f32.vlgmr.msra.gmra.mxu0 %vm85_vm1, %v2468_v24  ;;  %6366 = vmatprep.subr.mxu0 %v7168_v11 }
0x1a7b   :  { %6367 = vmatpush3.msra.mxu0 %v7952_v53  ;;  %6374 = vmatprep.mubr.msk.f32.mxu0 %vm7169_vm0, %v7168_v11 }
0x1a7c   :  { %6368 = vmatprep.subr.mxu0 %v7168_v11 }
0x1a7d   :  { %6369 = vmatpush3.msra.mxu0 %v7958_v47 }
0x1a7e   :  { %6370 = vmatprep.subr.mxu0 %v7168_v11 }
0x1a7f   :  { %6371 = vmatpush3.msra.mxu0 %v7967_v55 }
0x1a80   :  { %6372 = vmatprep.subr.mxu0 %v7168_v11 }
0x1a81   :  { %6373 = vmatpush3.msra.mxu0 %v7974_v48 }
0x1a82   :  { %6377 = vmatprep.subr.mxu0 %v7168_v11 }
0x1b2a   :  { %v2537_v21 = vpop.f32.mrf.mxu0 }
0x1b2b   :  { %v2538_v23 = vadd.f32 %v2537_v21, %v8061_v8 }
0x1b2c   :  { %v6308_v26 = vpop.f32.mrf.mxu0 }
0x1b2d   :  { %2541 = vst [vmem:[%s8927_s13] sm:$0xff] %v2538_v23  ;;  %v2542_v39 = vsel %vm2123_vm3, %v2538_v23, -1e+30 }
0x1b2e   :  { %2543 = vmax.xlane.f32.xlu0 %v2542_v39 }
0x1b32   :  { %v2619_v42 = vpop.f32.mrf.mxu0 }
0x1b34   :  { %v6319_v54 = vpop.f32.mrf.mxu0 }
0x1b3a   :  { %v8070_v49 = vpop.f32.mrf.mxu0 }
0x1b3c   :  { %v6365_v50 = vpop.f32.mrf.mxu0 }
0x1bb7   :  { %v2544_v56 = vpop.xlane.xlu0 %2543 }
0x1bb8   :  { %vm2545_vm4 = vcmp.eq.f32.partialorder %v2542_v39, %v2544_v56 }
0x1bb9   :  { %v2546_v58 = vsel %vm2545_vm4, %v7850_v45, 128.0 }
0x1bba   :  { %2547 = vmin.xlane.f32.xlu1 %v2546_v58 }
0x1c43   :  { %v2548_v59 = vpop.xlane.xlu1 %2547 }
0x1c44   :  { %vm2549_vm5 = vcmp.eq.f32.partialorder %v7850_v45, %v2548_v59 }
0x1c45   :  { %v5526_v60 = vsel %vm2549_vm5, 1.0, %v7168_v11 }
0x1c46   :  { %v2552_v61 = vsel %vm2123_vm3, %v5526_v60, %v2538_v23 }
0x1c47   :  { %6353 = vmatmul.mubr.f32.vlgmr.msra.gmra.mxu1 %v2552_v61 }
0x1c48   :  { %6400 = vmatpush3.msra.mxu1 %v7726_v25  ;;  %6431 = vmatprep.mubr.msk.f32.mxu1 %vm7169_vm0, %v7168_v11 }
0x1c49   :  { %6401 = vmatprep.subr.mxu1 %v7168_v11 }
0x1c4a   :  { %6402 = vmatpush3.msra.mxu1 %v7739_v28 }
0x1c4b   :  { %6403 = vmatprep.subr.mxu1 %v7168_v11 }
0x1c4c   :  { %6404 = vmatpush3.msra.mxu1 %v7753_v30 }
0x1c4d   :  { %6405 = vmatprep.subr.mxu1 %v7168_v11 }
0x1c4e   :  { %6406 = vmatpush3.msra.mxu1 %v7767_v32 }
0x1c4f   :  { %6407 = vmatprep.subr.mxu1 %v7168_v11 }
0x1c50   :  { %6408 = vmatpush3.msra.mxu1 %v7776_v33 }
0x1c51   :  { %6409 = vmatprep.subr.mxu1 %v7168_v11 }
0x1c52   :  { %6410 = vmatpush3.msra.mxu1 %v7786_v34 }
0x1c53   :  { %6411 = vmatprep.subr.mxu1 %v7168_v11 }
0x1c54   :  { %6412 = vmatpush3.msra.mxu1 %v7795_v35 }
0x1c55   :  { %6413 = vmatprep.subr.mxu1 %v7168_v11 }
0x1c56   :  { %6414 = vmatpush3.msra.mxu1 %v7805_v36 }
0x1c57   :  { %6415 = vmatprep.subr.mxu1 %v7168_v11 }
0x1c58   :  { %6416 = vmatpush3.msra.mxu1 %v7812_v37 }
0x1c59   :  { %6417 = vmatprep.subr.mxu1 %v7168_v11 }
0x1c5a   :  { %6418 = vmatpush3.msra.mxu1 %v7819_v38 }
0x1c5b   :  { %6419 = vmatprep.subr.mxu1 %v7168_v11 }
0x1c5c   :  { %6420 = vmatpush3.msra.mxu1 %v7826_v40 }
0x1c5d   :  { %6421 = vmatprep.subr.mxu1 %v7168_v11 }
0x1c5e   :  { %6422 = vmatpush3.msra.mxu1 %v7833_v41 }
0x1c5f   :  { %6423 = vmatprep.subr.mxu1 %v7168_v11 }
0x1c60   :  { %6424 = vmatpush3.msra.mxu1 %v7840_v43 }
0x1c61   :  { %6425 = vmatprep.subr.mxu1 %v7168_v11 }
0x1c62   :  { %6426 = vmatpush3.msra.mxu1 %v7847_v44 }
0x1c63   :  { %6427 = vmatprep.subr.mxu1 %v7168_v11 }
0x1c64   :  { %6428 = vmatpush3.msra.mxu1 %v7856_v52 }
0x1c65   :  { %6429 = vmatprep.subr.mxu1 %v7168_v11 }
0x1c66   :  { %6430 = vmatpush3.msra.mxu1 %v7863_v46 }
0x1c67   :  { %6478 = vmatprep.subr.mxu1 %v7168_v11 }
0x1d07   :  { %v2689_v62 = vpop.f32.mrf.mxu1 }
0x1d08   :  { %v2690_v63 = vadd.f32 %v2689_v62, %v2619_v42 }
0x1d09   :  { %v6354_v0 = vpop.f32.mrf.mxu1 }
0x1d0a   :  { %7011 = vtanh.f32 %v2690_v63  ;;  %v5528_v12 = vmul.f32 -1.442695, %v2690_v63 }
0x1d0c   :  { %7013 = vpow2.f32 %v5528_v12 }
0x1d17   :  { %v7012_v1 = vpop.eup %7011 }
0x1d18   :  { %2702 = vrot.lane.b32.xlu0 %v7012_v1, %s7166_s27 }
0x1d19   :  { %v7014_v51 = vpop.eup %7013 }
0x1d1a   :  { %v2696_v13 = vadd.f32 1.0, %v7014_v51 }
0x1d1c   :  { %7015 = vrcp.f32 %v2696_v13 }
0x1d29   :  { %v7016_v15 = vpop.eup %7015 }
0x1d2a   :  { %v2700_v5 = vmul.f32 %v7016_v15, %v7915_v9 }
0x1d8a   :  { %v2703_v17 = vpop.permute.xlu0 %2702 }
0x1d8b   :  { %v2705_v4 = vmul.f32 %v7016_v15, %v2703_v17 }
0x1d8d   :  { %2707 = vrot.lane.b32.xlu1 %v2705_v4, %s7167_s28 }
0x1dff   :  { %v2708_v18 = vpop.permute.xlu1 %2707 }
0x1e00   :  { %v8114_v24 = vadd.f32 %v2708_v18, %v2700_v5 }
0x1e02   :  { %7017 = vtanh.f32 %v8114_v24 }
0x1e0f   :  { %v7018_v21 = vpop.eup %7017 }
0x1e10   :  { %2713 = vrot.lane.b32.xlu0 %v7018_v21, %s7166_s27 }
0x1e82   :  { %v2714_v23 = vpop.permute.xlu0 %2713 }
0x1e83   :  { %v2716_v26 = vmul.f32 %v7016_v15, %v2714_v23 }
0x1e85   :  { %2788 = vrot.lane.b32.xlu1 %v2716_v26, %s7167_s28 }
0x1ef7   :  { %v2789_v39 = vpop.permute.xlu1 %2788 }
0x1ef8   :  { %6375 = vmatmul.mubr.msk.f32.vlgmr.msra.gmra.mxu0 %vm85_vm1, %v2789_v39 }
0x1ef9   :  { %6378 = vmatpush3.msra.mxu0 %v7998_v14  ;;  %6385 = vmatprep.mubr.msk.f32.mxu0 %vm7169_vm0, %v7168_v11 }
0x1efa   :  { %6379 = vmatprep.subr.mxu0 %v7168_v11 }
0x1efb   :  { %6380 = vmatpush3.msra.mxu0 %v8003_v2 }
0x1efc   :  { %6381 = vmatprep.subr.mxu0 %v7168_v11 }
0x1efd   :  { %6382 = vmatpush3.msra.mxu0 %v8010_v3 }
0x1efe   :  { %6383 = vmatprep.subr.mxu0 %v7168_v11 }
0x1eff   :  { %6384 = vmatpush3.msra.mxu0 %v8017_v16 }
0x1f00   :  { %6388 = vmatprep.subr.mxu0 %v7168_v11 }
0x1fb8   :  { %v2858_v9 = vpop.f32.mrf.mxu0 }
0x1fb9   :  { %v2859_v42 = vadd.f32 %v2858_v9, %v8070_v49 }
0x1fba   :  { %v6376_v54 = vpop.f32.mrf.mxu0 }
0x1fbb   :  { %v2862_v50 = vadd.f32 %v2859_v42, %v7986_v57 }
0x1fbd   :  { %7019 = vtanh.f32 %v2862_v50  ;;  %v5531_v58 = vmul.f32 -1.442695, %v2862_v50 }
0x1fbf   :  { %7021 = vpow2.f32 %v5531_v58 }
0x1fca   :  { %v7020_v56 = vpop.eup %7019 }
0x1fcb   :  { %2872 = vrot.lane.b32.xlu0 %v7020_v56, %s7166_s27 }
0x1fcc   :  { %v7022_v59 = vpop.eup %7021 }
0x1fcd   :  { %v2866_v60 = vadd.f32 1.0, %v7022_v59 }
0x1fcf   :  { %7023 = vrcp.f32 %v2866_v60 }
0x1fdc   :  { %v7024_v61 = vpop.eup %7023 }
0x1fdd   :  { %v2870_v0 = vmul.f32 %v7024_v61, %v7992_v19 }
0x203d   :  { %v2873_v62 = vpop.permute.xlu0 %2872 }
0x203e   :  { %v2875_v63 = vmul.f32 %v7024_v61, %v2873_v62 }
0x2040   :  { %2877 = vrot.lane.b32.xlu1 %v2875_v63, %s7167_s28 }
0x20b2   :  { %v2878_v49 = vpop.permute.xlu1 %2877 }
0x20b3   :  { %v8135_v1 = vadd.f32 %v2878_v49, %v2870_v0 }
0x20b5   :  { %7025 = vtanh.f32 %v8135_v1 }
0x20c2   :  { %v7026_v12 = vpop.eup %7025 }
0x20c3   :  { %2883 = vrot.lane.b32.xlu0 %v7026_v12, %s7166_s27 }
0x2135   :  { %v2884_v51 = vpop.permute.xlu0 %2883 }
0x2136   :  { %v2886_v13 = vmul.f32 %v7024_v61, %v2884_v51 }
0x2138   :  { %2888 = vrot.lane.b32.xlu1 %v2886_v13, %s7167_s28 }
0x21aa   :  { %v2889_v15 = vpop.permute.xlu1 %2888 }
0x21ab   :  { %6386 = vmatmul.mubr.msk.f32.vlgmr.msra.gmra.mxu0 %vm85_vm1, %v2889_v15 }
0x21ac   :  { %6389 = vmatpush3.msra.mxu0 %v7721_v22  ;;  %6396 = vmatprep.mubr.msk.f32.mxu0 %vm7169_vm0, %v7168_v11 }
0x21ad   :  { %6390 = vmatprep.subr.mxu0 %v7168_v11 }
0x21ae   :  { %6391 = vmatpush3.msra.mxu0 %v7732_v27 }
0x21af   :  { %6392 = vmatprep.subr.mxu0 %v7168_v11 }
0x21b0   :  { %6393 = vmatpush3.msra.mxu0 %v7746_v29 }
0x21b1   :  { %6394 = vmatprep.subr.mxu0 %v7168_v11 }
0x21b2   :  { %6395 = vmatpush3.msra.mxu0 %v7760_v31 }
0x21b3   :  { %6397 = vmatmul.mubr.msk.f32.vlgmr.msra.gmra.mxu0 %vm85_vm1, %v2789_v39  ;;  %6434 = vmatprep.subr.mxu0 %v7168_v11 }
0x21b4   :  { %6435 = vmatpush3.msra.mxu0 %v7921_v10  ;;  %6442 = vmatprep.mubr.msk.f32.mxu0 %vm7169_vm0, %v7168_v11 }
0x21b5   :  { %6436 = vmatprep.subr.mxu0 %v7168_v11 }
0x21b6   :  { %6437 = vmatpush3.msra.mxu0 %v7926_v6 }
0x21b7   :  { %6438 = vmatprep.subr.mxu0 %v7168_v11 }
0x21b8   :  { %6439 = vmatpush3.msra.mxu0 %v7933_v7 }
0x21b9   :  { %6440 = vmatprep.subr.mxu0 %v7168_v11 }
0x21ba   :  { %6441 = vmatpush3.msra.mxu0 %v7940_v20 }
0x21bb   :  { %6443 = vmatmul.mubr.msk.f32.vlgmr.msra.gmra.mxu0 %vm85_vm1, %v2889_v15  ;;  %6445 = vmatprep.subr.mxu0 %v7168_v11 }
0x21bc   :  { %6446 = vmatpush3.msra.mxu0 %v7952_v53  ;;  %6453 = vmatprep.mubr.msk.f32.mxu0 %vm7169_vm0, %v7168_v11 }
0x21bd   :  { %6447 = vmatprep.subr.mxu0 %v7168_v11 }
0x21be   :  { %6448 = vmatpush3.msra.mxu0 %v7958_v47 }
0x21bf   :  { %6449 = vmatprep.subr.mxu0 %v7168_v11 }
0x21c0   :  { %6450 = vmatpush3.msra.mxu0 %v7967_v55 }
0x21c1   :  { %6451 = vmatprep.subr.mxu0 %v7168_v11 }
0x21c2   :  { %6452 = vmatpush3.msra.mxu0 %v7974_v48 }
0x21c3   :  { %6456 = vmatprep.subr.mxu0 %v7168_v11 }
0x226b   :  { %v2958_v22 = vpop.f32.mrf.mxu0 }
0x226c   :  { %v2959_v27 = vadd.f32 %v2958_v22, %v8061_v8 }
0x226d   :  { %v6387_v29 = vpop.f32.mrf.mxu0 }
0x226e   :  { %5533 = vst [vmem:[%s8927_s13 + $0x8] sm:$0xff] %v2959_v27  ;;  %v2964_v31 = vsel %vm2123_vm3, %v2959_v27, -1e+30 }
0x226f   :  { %2965 = vmax.xlane.f32.xlu0 %v2964_v31 }
0x2273   :  { %v3041_v19 = vpop.f32.mrf.mxu0 }
0x2275   :  { %v6398_v17 = vpop.f32.mrf.mxu0 }
0x227b   :  { %v8179_v4 = vpop.f32.mrf.mxu0 }
0x227d   :  { %v6444_v5 = vpop.f32.mrf.mxu0 }
0x22f8   :  { %v2966_v18 = vpop.xlane.xlu0 %2965 }
0x22f9   :  { %vm2967_vm6 = vcmp.eq.f32.partialorder %v2964_v31, %v2966_v18 }
0x22fa   :  { %v2968_v21 = vsel %vm2967_vm6, %v7850_v45, 128.0 }
0x22fb   :  { %2969 = vmin.xlane.f32.xlu1 %v2968_v21 }
0x2384   :  { %v2970_v23 = vpop.xlane.xlu1 %2969 }
0x2385   :  { %vm2971_vm7 = vcmp.eq.f32.partialorder %v7850_v45, %v2970_v23  ;;  %v5542_v23 = vld [vmem:[%s8928_s5 + $0x10] sm:$0xff] }
0x2386   :  { %v5534_v26 = vsel %vm2971_vm7, 1.0, %v7168_v11 }
0x2387   :  { %v2974_v39 = vsel %vm2123_vm3, %v5534_v26, %v2959_v27  ;;  %v8257_v26 = vld [vmem:[%s8921_s6 + $0x78] sm:$0xff] }
0x2388   :  { %6432 = vmatmul.mubr.f32.vlgmr.msra.gmra.mxu1 %v2974_v39 }
0x2389   :  { %6479 = vmatpush3.msra.mxu1 %v7726_v25  ;;  %6510 = vmatprep.mubr.msk.f32.mxu1 %vm7169_vm0, %v7168_v11 }
0x238a   :  { %6480 = vmatprep.subr.mxu1 %v7168_v11 }
0x238b   :  { %6481 = vmatpush3.msra.mxu1 %v7739_v28 }
0x238c   :  { %6482 = vmatprep.subr.mxu1 %v7168_v11 }
0x238d   :  { %6483 = vmatpush3.msra.mxu1 %v7753_v30 }
0x238e   :  { %6484 = vmatprep.subr.mxu1 %v7168_v11 }
0x238f   :  { %6485 = vmatpush3.msra.mxu1 %v7767_v32 }
0x2390   :  { %6486 = vmatprep.subr.mxu1 %v7168_v11 }
0x2391   :  { %6487 = vmatpush3.msra.mxu1 %v7776_v33 }
0x2392   :  { %6488 = vmatprep.subr.mxu1 %v7168_v11 }
0x2393   :  { %6489 = vmatpush3.msra.mxu1 %v7786_v34 }
0x2394   :  { %6490 = vmatprep.subr.mxu1 %v7168_v11 }
0x2395   :  { %6491 = vmatpush3.msra.mxu1 %v7795_v35 }
0x2396   :  { %6492 = vmatprep.subr.mxu1 %v7168_v11 }
0x2397   :  { %6493 = vmatpush3.msra.mxu1 %v7805_v36 }
0x2398   :  { %6494 = vmatprep.subr.mxu1 %v7168_v11 }
0x2399   :  { %6495 = vmatpush3.msra.mxu1 %v7812_v37 }
0x239a   :  { %6496 = vmatprep.subr.mxu1 %v7168_v11 }
0x239b   :  { %6497 = vmatpush3.msra.mxu1 %v7819_v38 }
0x239c   :  { %6498 = vmatprep.subr.mxu1 %v7168_v11 }
0x239d   :  { %6499 = vmatpush3.msra.mxu1 %v7826_v40 }
0x239e   :  { %6500 = vmatprep.subr.mxu1 %v7168_v11 }
0x239f   :  { %6501 = vmatpush3.msra.mxu1 %v7833_v41 }
0x23a0   :  { %6502 = vmatprep.subr.mxu1 %v7168_v11 }
0x23a1   :  { %6503 = vmatpush3.msra.mxu1 %v7840_v43 }
0x23a2   :  { %6504 = vmatprep.subr.mxu1 %v7168_v11 }
0x23a3   :  { %6505 = vmatpush3.msra.mxu1 %v7847_v44 }
0x23a4   :  { %6506 = vmatprep.subr.mxu1 %v7168_v11 }
0x23a5   :  { %6507 = vmatpush3.msra.mxu1 %v7856_v52 }
0x23a6   :  { %6508 = vmatprep.subr.mxu1 %v7168_v11 }
0x23a7   :  { %6509 = vmatpush3.msra.mxu1 %v7863_v46 }
0x23a8   :  { %6557 = vmatprep.subr.mxu1 %v7168_v11  ;;  %6511 = vmatmul.mubr.f32.vlgmr.msra.gmra.mxu1 %v5542_v23  ;;  %v8463_v23 = vld [vmem:[%s8921_s6 + $0x20] sm:$0xff] }
0x23a9   :  { %6558 = vmatpush3.msra.mxu1 %v8257_v26  ;;  %6589 = vmatprep.mubr.msk.f32.mxu1 %vm7169_vm0, %v7168_v11 }
0x23aa   :  { %6559 = vmatprep.subr.mxu1 %v7168_v11 }
0x2448   :  { %v3111_v25 = vpop.f32.mrf.mxu1 }
0x2449   :  { %v3112_v28 = vadd.f32 %v3111_v25, %v3041_v19 }
0x244a   :  { %v6433_v30 = vpop.f32.mrf.mxu1 }
0x244b   :  { %7027 = vtanh.f32 %v3112_v28  ;;  %v5536_v9 = vmul.f32 -1.442695, %v3112_v28  ;;  %v8273_v28 = vld [vmem:[%s8921_s6 + $0x68] sm:$0xff]  ;;  %v8281_v30 = vld [vmem:[%s8921_s6 + $0x60] sm:$0xff] }
0x244d   :  { %7029 = vpow2.f32 %v5536_v9 }
0x2458   :  { %v7028_v32 = vpop.eup %7027 }
0x2459   :  { %3124 = vrot.lane.b32.xlu0 %v7028_v32, %s7166_s27 }
0x245a   :  { %v7030_v42 = vpop.eup %7029 }
0x245b   :  { %v3118_v54 = vadd.f32 1.0, %v7030_v42 }
0x245d   :  { %7031 = vrcp.f32 %v3118_v54 }
0x246a   :  { %v7032_v50 = vpop.eup %7031 }
0x246b   :  { %v3122_v59 = vmul.f32 %v7032_v50, %v8114_v24 }
0x24cb   :  { %v3125_v56 = vpop.permute.xlu0 %3124 }
0x24cc   :  { %v3127_v58 = vmul.f32 %v7032_v50, %v3125_v56 }
0x24ce   :  { %3129 = vrot.lane.b32.xlu1 %v3127_v58, %s7167_s28 }
0x2540   :  { %v3130_v60 = vpop.permute.xlu1 %3129 }
0x2541   :  { %v8223_v61 = vadd.f32 %v3130_v60, %v3122_v59 }
0x2543   :  { %7033 = vtanh.f32 %v8223_v61 }
0x2550   :  { %v7034_v62 = vpop.eup %7033 }
0x2551   :  { %3135 = vrot.lane.b32.xlu0 %v7034_v62, %s7166_s27 }
0x25c3   :  { %v3136_v63 = vpop.permute.xlu0 %3135 }
0x25c4   :  { %v3138_v0 = vmul.f32 %v7032_v50, %v3136_v63 }
0x25c6   :  { %3210 = vrot.lane.b32.xlu1 %v3138_v0, %s7167_s28 }
0x2638   :  { %v8228_v49 = vpop.permute.xlu1 %3210 }
0x2639   :  { %6454 = vmatmul.mubr.msk.f32.vlgmr.msra.gmra.mxu0 %vm85_vm1, %v8228_v49 }
0x263a   :  { %6457 = vmatpush3.msra.mxu0 %v7998_v14  ;;  %6464 = vmatprep.mubr.msk.f32.mxu0 %vm7169_vm0, %v7168_v11 }
0x263b   :  { %6458 = vmatprep.subr.mxu0 %v7168_v11 }
0x263c   :  { %6459 = vmatpush3.msra.mxu0 %v8003_v2 }
0x263d   :  { %6460 = vmatprep.subr.mxu0 %v7168_v11 }
0x263e   :  { %6461 = vmatpush3.msra.mxu0 %v8010_v3 }
0x263f   :  { %6462 = vmatprep.subr.mxu0 %v7168_v11 }
0x2640   :  { %6463 = vmatpush3.msra.mxu0 %v8017_v16 }
0x2641   :  { %6467 = vmatprep.subr.mxu0 %v7168_v11 }
0x26f9   :  { %v3280_v24 = vpop.f32.mrf.mxu0 }
0x26fa   :  { %v3281_v12 = vadd.f32 %v3280_v24, %v8179_v4 }
0x26fb   :  { %v6455_v51 = vpop.f32.mrf.mxu0 }
0x26fc   :  { %v3284_v13 = vadd.f32 %v3281_v12, %v7986_v57 }
0x26fe   :  { %7035 = vtanh.f32 %v3284_v13  ;;  %v5539_v22 = vmul.f32 -1.442695, %v3284_v13 }
0x2700   :  { %7037 = vpow2.f32 %v5539_v22  ;;  %v5550_v22 = vld [vmem:[%s8928_s5 + $0x18] sm:$0xff] }
0x270b   :  { %v7036_v15 = vpop.eup %7035 }
0x270c   :  { %3294 = vrot.lane.b32.xlu0 %v7036_v15, %s7166_s27 }
0x270d   :  { %v7038_v27 = vpop.eup %7037 }
0x270e   :  { %v3288_v29 = vadd.f32 1.0, %v7038_v27 }
0x2710   :  { %7039 = vrcp.f32 %v3288_v29 }
0x271d   :  { %v7040_v31 = vpop.eup %7039 }
0x271e   :  { %v3292_v5 = vmul.f32 %v7040_v31, %v8135_v1  ;;  %v8266_v1 = vld [vmem:[%s8921_s6 + $0x70] sm:$0xff] }
0x271f   :  { %6560 = vmatpush3.msra.mxu1 %v8266_v1 }
0x2720   :  { %6561 = vmatprep.subr.mxu1 %v7168_v11 }
0x2721   :  { %6562 = vmatpush3.msra.mxu1 %v8273_v28 }
0x2722   :  { %6563 = vmatprep.subr.mxu1 %v7168_v11 }
0x2723   :  { %6564 = vmatpush3.msra.mxu1 %v8281_v30 }
0x2724   :  { %6565 = vmatprep.subr.mxu1 %v7168_v11 }
0x2725   :  { %6566 = vmatpush3.msra.mxu1 %v7776_v33 }
0x2726   :  { %6567 = vmatprep.subr.mxu1 %v7168_v11 }
0x2727   :  { %6568 = vmatpush3.msra.mxu1 %v7786_v34  ;;  %v8313_v34 = vld [vmem:[%s8920_s7 + $0x18] sm:$0xff] }
0x2728   :  { %6569 = vmatprep.subr.mxu1 %v7168_v11 }
0x2729   :  { %6570 = vmatpush3.msra.mxu1 %v7795_v35  ;;  %v8322_v35 = vld [vmem:[%s8920_s7 + $0x10] sm:$0xff] }
0x272a   :  { %6571 = vmatprep.subr.mxu1 %v7168_v11 }
0x272b   :  { %6572 = vmatpush3.msra.mxu1 %v7805_v36  ;;  %v8329_v36 = vld [vmem:[%s8920_s7 + $0x8] sm:$0xff] }
0x272c   :  { %6573 = vmatprep.subr.mxu1 %v7168_v11 }
0x272d   :  { %6574 = vmatpush3.msra.mxu1 %v7812_v37  ;;  %v8336_v37 = vld [vmem:[%s8920_s7] sm:$0xff] }
0x272e   :  { %6575 = vmatprep.subr.mxu1 %v7168_v11 }
0x272f   :  { %6576 = vmatpush3.msra.mxu1 %v7819_v38  ;;  %v3524_v38 = vpop.f32.mrf.mxu1 }
0x2730   :  { %6577 = vmatprep.subr.mxu1 %v7168_v11 }
0x2731   :  { %6578 = vmatpush3.msra.mxu1 %v7826_v40  ;;  %v6512_v40 = vpop.f32.mrf.mxu1 }
0x2732   :  { %6579 = vmatprep.subr.mxu1 %v7168_v11 }
0x2733   :  { %6580 = vmatpush3.msra.mxu1 %v7833_v41 }
0x2734   :  { %6581 = vmatprep.subr.mxu1 %v7168_v11 }
0x2735   :  { %6582 = vmatpush3.msra.mxu1 %v7840_v43 }
0x2736   :  { %6583 = vmatprep.subr.mxu1 %v7168_v11 }
0x2737   :  { %6584 = vmatpush3.msra.mxu1 %v7847_v44 }
0x2738   :  { %6585 = vmatprep.subr.mxu1 %v7168_v11 }
0x2739   :  { %6586 = vmatpush3.msra.mxu1 %v7856_v52 }
0x273a   :  { %6587 = vmatprep.subr.mxu1 %v7168_v11 }
0x273b   :  { %6588 = vmatpush3.msra.mxu1 %v7863_v46 }
0x273c   :  { %6636 = vmatprep.subr.mxu1 %v7168_v11  ;;  %6590 = vmatmul.mubr.f32.vlgmr.msra.gmra.mxu1 %v5550_v22 }
0x273d   :  { %6637 = vmatpush3.msra.mxu1 %v8257_v26  ;;  %6668 = vmatprep.mubr.msk.f32.mxu1 %vm7169_vm0, %v7168_v11 }
0x273e   :  { %6638 = vmatprep.subr.mxu1 %v7168_v11 }
0x273f   :  { %6639 = vmatpush3.msra.mxu1 %v8266_v1 }
0x2740   :  { %6640 = vmatprep.subr.mxu1 %v7168_v11 }
0x2741   :  { %6641 = vmatpush3.msra.mxu1 %v8273_v28 }
0x2742   :  { %6642 = vmatprep.subr.mxu1 %v7168_v11 }
0x2743   :  { %6643 = vmatpush3.msra.mxu1 %v8281_v30 }
0x2744   :  { %6644 = vmatprep.subr.mxu1 %v7168_v11 }
0x277e   :  { %v3295_v19 = vpop.permute.xlu0 %3294 }
0x277f   :  { %v3297_v17 = vmul.f32 %v7040_v31, %v3295_v19  ;;  %v8421_v19 = vld [vmem:[%s8921_s6 + $0x50] sm:$0xff] }
0x2781   :  { %3299 = vrot.lane.b32.xlu1 %v3297_v17, %s7167_s28  ;;  %v8428_v17 = vld [vmem:[%s8921_s6 + $0x48] sm:$0xff] }
0x27f3   :  { %v3300_v4 = vpop.permute.xlu1 %3299 }
0x27f4   :  { %v8247_v18 = vadd.f32 %v3300_v4, %v3292_v5  ;;  %v8435_v5 = vld [vmem:[%s8921_s6 + $0x40] sm:$0xff]  ;;  %v8442_v4 = vld [vmem:[%s8921_s6 + $0x38] sm:$0xff] }
0x27f6   :  { %7041 = vtanh.f32 %v8247_v18 }
0x2803   :  { %v7042_v21 = vpop.eup %7041 }
0x2804   :  { %3305 = vrot.lane.b32.xlu0 %v7042_v21, %s7166_s27  ;;  %v8456_v21 = vld [vmem:[%s8921_s6 + $0x28] sm:$0xff] }
0x2876   :  { %v3306_v39 = vpop.permute.xlu0 %3305 }
0x2877   :  { %v3308_v25 = vmul.f32 %v7040_v31, %v3306_v39  ;;  %v8414_v31 = vld [vmem:[%s8921_s6 + $0x58] sm:$0xff] }
0x2878   :  { %6645 = vmatpush3.msra.mxu1 %v8414_v31  ;;  %v8470_v39 = vld [vmem:[%s8921_s6 + $0x18] sm:$0xff] }
0x2879   :  { %3310 = vrot.lane.b32.xlu1 %v3308_v25, %s7167_s28  ;;  %6646 = vmatprep.subr.mxu1 %v7168_v11  ;;  %v8477_v25 = vld [vmem:[%s8921_s6 + $0x10] sm:$0xff] }
0x287a   :  { %6647 = vmatpush3.msra.mxu1 %v8421_v19 }
0x287b   :  { %6648 = vmatprep.subr.mxu1 %v7168_v11 }
0x287c   :  { %6649 = vmatpush3.msra.mxu1 %v8428_v17 }
0x287d   :  { %6650 = vmatprep.subr.mxu1 %v7168_v11 }
0x287e   :  { %6651 = vmatpush3.msra.mxu1 %v8435_v5 }
0x287f   :  { %6652 = vmatprep.subr.mxu1 %v7168_v11 }
0x2880   :  { %6653 = vmatpush3.msra.mxu1 %v8442_v4 }
0x2881   :  { %6654 = vmatprep.subr.mxu1 %v7168_v11 }
0x28eb   :  { %v3311_v33 = vpop.permute.xlu1 %3310 }
0x28ec   :  { %6465 = vmatmul.mubr.msk.f32.vlgmr.msra.gmra.mxu0 %vm85_vm1, %v3311_v33 }
0x28ed   :  { %6468 = vmatpush3.msra.mxu0 %v8313_v34  ;;  %6475 = vmatprep.mubr.msk.f32.mxu0 %vm7169_vm0, %v7168_v11 }
0x28ee   :  { %6469 = vmatprep.subr.mxu0 %v7168_v11 }
0x28ef   :  { %6470 = vmatpush3.msra.mxu0 %v8322_v35 }
0x28f0   :  { %6471 = vmatprep.subr.mxu0 %v7168_v11 }
0x28f1   :  { %6472 = vmatpush3.msra.mxu0 %v8329_v36 }
0x28f2   :  { %6473 = vmatprep.subr.mxu0 %v7168_v11 }
0x28f3   :  { %6474 = vmatpush3.msra.mxu0 %v8336_v37 }
0x28f4   :  { %6476 = vmatmul.mubr.msk.f32.vlgmr.msra.gmra.mxu0 %vm85_vm1, %v8228_v49  ;;  %6513 = vmatprep.subr.mxu0 %v7168_v11 }
0x28f5   :  { %6514 = vmatpush3.msra.mxu0 %v7921_v10  ;;  %6521 = vmatprep.mubr.msk.f32.mxu0 %vm7169_vm0, %v7168_v11 }
0x28f6   :  { %6515 = vmatprep.subr.mxu0 %v7168_v11 }
0x28f7   :  { %6516 = vmatpush3.msra.mxu0 %v7926_v6 }
0x28f8   :  { %6517 = vmatprep.subr.mxu0 %v7168_v11 }
0x28f9   :  { %6518 = vmatpush3.msra.mxu0 %v7933_v7 }
0x28fa   :  { %6519 = vmatprep.subr.mxu0 %v7168_v11 }
0x28fb   :  { %6520 = vmatpush3.msra.mxu0 %v7940_v20 }
0x28fc   :  { %6522 = vmatmul.mubr.msk.f32.vlgmr.msra.gmra.mxu0 %vm85_vm1, %v3311_v33  ;;  %6524 = vmatprep.subr.mxu0 %v7168_v11  ;;  %v8484_v33 = vld [vmem:[%s8921_s6 + $0x8] sm:$0xff] }
0x28fd   :  { %6525 = vmatpush3.msra.mxu0 %v7952_v53  ;;  %6532 = vmatprep.mubr.msk.f32.mxu0 %vm7169_vm0, %v7168_v11 }
0x28fe   :  { %6526 = vmatprep.subr.mxu0 %v7168_v11 }
0x28ff   :  { %6527 = vmatpush3.msra.mxu0 %v7958_v47 }
0x2900   :  { %6528 = vmatprep.subr.mxu0 %v7168_v11 }
0x2901   :  { %6529 = vmatpush3.msra.mxu0 %v7967_v55 }
0x2902   :  { %6530 = vmatprep.subr.mxu0 %v7168_v11 }
0x2903   :  { %6531 = vmatpush3.msra.mxu0 %v7974_v48 }
0x2904   :  { %6535 = vmatprep.subr.mxu0 %v7168_v11 }
0x29ac   :  { %v3380_v41 = vpop.f32.mrf.mxu0 }
0x29ad   :  { %v3381_v43 = vadd.f32 %v3380_v41, %v8061_v8  ;;  %v8511_v41 = vld [vmem:[%s8922_s9 + $0x18] sm:$0xff] }
0x29ae   :  { %v6466_v44 = vpop.f32.mrf.mxu0 }
0x29af   :  { %5541 = vst [vmem:[%s8927_s13 + $0x10] sm:$0xff] %v3381_v43  ;;  %v8520_v43 = vld [vmem:[%s8922_s9 + $0x10] sm:$0xff]  ;;  %v8527_v44 = vld [vmem:[%s8922_s9 + $0x8] sm:$0xff] }
0x29b4   :  { %v3454_v52 = vpop.f32.mrf.mxu0 }
0x29b5   :  { %v3525_v46 = vadd.f32 %v3524_v38, %v3454_v52  ;;  %v8491_v38 = vld [vmem:[%s8921_s6] sm:$0xff] }
0x29b6   :  { %v6477_v10 = vpop.f32.mrf.mxu0  ;;  %v8534_v52 = vld [vmem:[%s8922_s9] sm:$0xff] }
0x29b7   :  { %7043 = vtanh.f32 %v3525_v46  ;;  %v5544_v53 = vmul.f32 -1.442695, %v3525_v46  ;;  %v8542_v46 = vld [vmem:[%s8923_s8 + $0x18] sm:$0xff]  ;;  %v8551_v10 = vld [vmem:[%s8923_s8 + $0x10] sm:$0xff] }
0x29b9   :  { %7045 = vpow2.f32 %v5544_v53 }
0x29bc   :  { %v3618_v6 = vpop.f32.mrf.mxu0 }
0x29be   :  { %v6523_v7 = vpop.f32.mrf.mxu0 }
0x29bf   :  { %v8565_v7 = vld [vmem:[%s8923_s8] sm:$0xff] }
0x29c4   :  { %v7044_v20 = vpop.eup %7043 }
0x29c5   :  { %3537 = vrot.lane.b32.xlu0 %v7044_v20, %s7166_s27  ;;  %v3937_v20 = vpop.f32.mrf.mxu1 }
0x29c6   :  { %v7046_v47 = vpop.eup %7045 }
0x29c7   :  { %v3531_v55 = vadd.f32 1.0, %v7046_v47  ;;  %v6591_v53 = vpop.f32.mrf.mxu1 }
0x29c9   :  { %7047 = vrcp.f32 %v3531_v55 }
0x29d6   :  { %v7048_v48 = vpop.eup %7047 }
0x29d7   :  { %v3535_v42 = vmul.f32 %v7048_v48, %v8223_v61 }
0x2a37   :  { %v3538_v32 = vpop.permute.xlu0 %3537 }
0x2a38   :  { %v3540_v9 = vmul.f32 %v7048_v48, %v3538_v32 }
0x2a3a   :  { %3542 = vrot.lane.b32.xlu1 %v3540_v9, %s7167_s28 }
0x2aac   :  { %v3543_v54 = vpop.permute.xlu1 %3542 }
0x2aad   :  { %v8370_v50 = vadd.f32 %v3543_v54, %v3535_v42 }
0x2aaf   :  { %7049 = vtanh.f32 %v8370_v50 }
0x2abc   :  { %v7050_v56 = vpop.eup %7049 }
0x2abd   :  { %3548 = vrot.lane.b32.xlu0 %v7050_v56, %s7166_s27 }
0x2b2f   :  { %v3549_v58 = vpop.permute.xlu0 %3548 }
0x2b30   :  { %v3551_v59 = vmul.f32 %v7048_v48, %v3549_v58 }
0x2b32   :  { %3623 = vrot.lane.b32.xlu1 %v3551_v59, %s7167_s28 }
0x2ba4   :  { %v8375_v60 = vpop.permute.xlu1 %3623 }
0x2ba5   :  { %6533 = vmatmul.mubr.msk.f32.vlgmr.msra.gmra.mxu0 %vm85_vm1, %v8375_v60 }
0x2ba6   :  { %6536 = vmatpush3.msra.mxu0 %v7998_v14  ;;  %6543 = vmatprep.mubr.msk.f32.mxu0 %vm7169_vm0, %v7168_v11 }
0x2ba7   :  { %6537 = vmatprep.subr.mxu0 %v7168_v11 }
0x2ba8   :  { %6538 = vmatpush3.msra.mxu0 %v8003_v2 }
0x2ba9   :  { %6539 = vmatprep.subr.mxu0 %v7168_v11 }
0x2baa   :  { %6540 = vmatpush3.msra.mxu0 %v8010_v3 }
0x2bab   :  { %6541 = vmatprep.subr.mxu0 %v7168_v11 }
0x2bac   :  { %6542 = vmatpush3.msra.mxu0 %v8017_v16 }
0x2bad   :  { %6546 = vmatprep.subr.mxu0 %v7168_v11 }
0x2c65   :  { %v3693_v61 = vpop.f32.mrf.mxu0 }
0x2c66   :  { %v3694_v62 = vadd.f32 %v3693_v61, %v3618_v6  ;;  %v8558_v6 = vld [vmem:[%s8923_s8 + $0x8] sm:$0xff] }
0x2c67   :  { %v6534_v14 = vpop.f32.mrf.mxu0 }
0x2c68   :  { %v3697_v63 = vadd.f32 %v3694_v62, %v7986_v57 }
0x2c6a   :  { %7051 = vtanh.f32 %v3697_v63  ;;  %v5547_v2 = vmul.f32 -1.442695, %v3697_v63 }
0x2c6c   :  { %7053 = vpow2.f32 %v5547_v2 }
0x2c77   :  { %v7052_v0 = vpop.eup %7051 }
0x2c78   :  { %3707 = vrot.lane.b32.xlu0 %v7052_v0, %s7166_s27 }
0x2c79   :  { %v7054_v49 = vpop.eup %7053 }
0x2c7a   :  { %v3701_v24 = vadd.f32 1.0, %v7054_v49 }
0x2c7c   :  { %7055 = vrcp.f32 %v3701_v24 }
0x2c89   :  { %v7056_v3 = vpop.eup %7055 }
0x2c8a   :  { %v3705_v16 = vmul.f32 %v7056_v3, %v8247_v18  ;;  %v8449_v18 = vld [vmem:[%s8921_s6 + $0x30] sm:$0xff] }
0x2c8b   :  { %6655 = vmatpush3.msra.mxu1 %v8449_v18 }
0x2c8c   :  { %6656 = vmatprep.subr.mxu1 %v7168_v11 }
0x2c8d   :  { %6657 = vmatpush3.msra.mxu1 %v8456_v21 }
0x2c8e   :  { %6658 = vmatprep.subr.mxu1 %v7168_v11 }
0x2c8f   :  { %6659 = vmatpush3.msra.mxu1 %v8463_v23 }
0x2c90   :  { %6660 = vmatprep.subr.mxu1 %v7168_v11 }
0x2c91   :  { %6661 = vmatpush3.msra.mxu1 %v8470_v39 }
0x2c92   :  { %6662 = vmatprep.subr.mxu1 %v7168_v11 }
0x2c93   :  { %6663 = vmatpush3.msra.mxu1 %v8477_v25 }
0x2c94   :  { %6664 = vmatprep.subr.mxu1 %v7168_v11 }
0x2c95   :  { %6665 = vmatpush3.msra.mxu1 %v8484_v33 }
0x2c96   :  { %6666 = vmatprep.subr.mxu1 %v7168_v11 }
0x2c97   :  { %6667 = vmatpush3.msra.mxu1 %v8491_v38 }
0x2c98   :  { %6715 = vmatprep.subr.mxu1 %v7168_v11 }
0x2cea   :  { %v3708_v12 = vpop.permute.xlu0 %3707 }
0x2ceb   :  { %v3710_v51 = vmul.f32 %v7056_v3, %v3708_v12 }
0x2ced   :  { %3712 = vrot.lane.b32.xlu1 %v3710_v51, %s7167_s28  ;;  %v8585_v51 = vld [vmem:[%s8925_s11 + $0x18] sm:$0xff] }
0x2d5f   :  { %v3713_v13 = vpop.permute.xlu1 %3712 }
0x2d60   :  { %v8393_v15 = vadd.f32 %v3713_v13, %v3705_v16  ;;  %v8601_v16 = vld [vmem:[%s8925_s11 + $0x8] sm:$0xff]  ;;  %v8608_v13 = vld [vmem:[%s8925_s11] sm:$0xff] }
0x2d62   :  { %7057 = vtanh.f32 %v8393_v15 }
0x2d6f   :  { %v7058_v57 = vpop.eup %7057 }
0x2d70   :  { %3718 = vrot.lane.b32.xlu0 %v7058_v57, %s7166_s27 }
0x2de2   :  { %v3719_v27 = vpop.permute.xlu0 %3718 }
0x2de3   :  { %v3721_v29 = vmul.f32 %v7056_v3, %v3719_v27 }
0x2de5   :  { %3723 = vrot.lane.b32.xlu1 %v3721_v29, %s7167_s28  ;;  %v8615_v29 = vld [vmem:[%s8924_s10] sm:$0xff] }
0x2e57   :  { %v3724_v40 = vpop.permute.xlu1 %3723 }
0x2e58   :  { %6544 = vmatmul.mubr.msk.f32.vlgmr.msra.gmra.mxu0 %vm85_vm1, %v3724_v40 }
0x2e59   :  { %6547 = vmatpush3.msra.mxu0 %v8313_v34  ;;  %6554 = vmatprep.mubr.msk.f32.mxu0 %vm7169_vm0, %v7168_v11 }
0x2e5a   :  { %6548 = vmatprep.subr.mxu0 %v7168_v11 }
0x2e5b   :  { %6549 = vmatpush3.msra.mxu0 %v8322_v35 }
0x2e5c   :  { %6550 = vmatprep.subr.mxu0 %v7168_v11 }
0x2e5d   :  { %6551 = vmatpush3.msra.mxu0 %v8329_v36 }
0x2e5e   :  { %6552 = vmatprep.subr.mxu0 %v7168_v11 }
0x2e5f   :  { %6553 = vmatpush3.msra.mxu0 %v8336_v37 }
0x2e60   :  { %6555 = vmatmul.mubr.msk.f32.vlgmr.msra.gmra.mxu0 %vm85_vm1, %v8375_v60  ;;  %6592 = vmatprep.subr.mxu0 %v7168_v11 }
0x2e61   :  { %6593 = vmatpush3.msra.mxu0 %v8511_v41  ;;  %6600 = vmatprep.mubr.msk.f32.mxu0 %vm7169_vm0, %v7168_v11 }
0x2e62   :  { %6594 = vmatprep.subr.mxu0 %v7168_v11 }
0x2e63   :  { %6595 = vmatpush3.msra.mxu0 %v8520_v43 }
0x2e64   :  { %6596 = vmatprep.subr.mxu0 %v7168_v11 }
0x2e65   :  { %6597 = vmatpush3.msra.mxu0 %v8527_v44 }
0x2e66   :  { %6598 = vmatprep.subr.mxu0 %v7168_v11 }
0x2e67   :  { %6599 = vmatpush3.msra.mxu0 %v8534_v52 }
0x2e68   :  { %6601 = vmatmul.mubr.msk.f32.vlgmr.msra.gmra.mxu0 %vm85_vm1, %v3724_v40  ;;  %6603 = vmatprep.subr.mxu0 %v7168_v11 }
0x2e69   :  { %6604 = vmatpush3.msra.mxu0 %v8542_v46  ;;  %6611 = vmatprep.mubr.msk.f32.mxu0 %vm7169_vm0, %v7168_v11 }
0x2e6a   :  { %6605 = vmatprep.subr.mxu0 %v7168_v11 }
0x2e6b   :  { %6606 = vmatpush3.msra.mxu0 %v8551_v10 }
0x2e6c   :  { %6607 = vmatprep.subr.mxu0 %v7168_v11 }
0x2e6d   :  { %6608 = vmatpush3.msra.mxu0 %v8558_v6 }
0x2e6e   :  { %6609 = vmatprep.subr.mxu0 %v7168_v11 }
0x2e6f   :  { %6610 = vmatpush3.msra.mxu0 %v8565_v7 }
0x2e70   :  { %6614 = vmatprep.subr.mxu0 %v7168_v11 }
0x2f18   :  { %v3793_v47 = vpop.f32.mrf.mxu0 }
0x2f19   :  { %v3794_v55 = vadd.f32 %v3793_v47, %v8061_v8 }
0x2f1a   :  { %v6545_v48 = vpop.f32.mrf.mxu0 }
0x2f1b   :  { %5549 = vst [vmem:[%s8927_s13 + $0x18] sm:$0xff] %v3794_v55 }
0x2f20   :  { %v3867_v32 = vpop.f32.mrf.mxu0 }
0x2f21   :  { %v3938_v9 = vadd.f32 %v3937_v20, %v3867_v32 }
0x2f22   :  { %v6556_v42 = vpop.f32.mrf.mxu0 }
0x2f23   :  { %7059 = vtanh.f32 %v3938_v9  ;;  %v5552_v59 = vmul.f32 -1.442695, %v3938_v9 }
0x2f25   :  { %7061 = vpow2.f32 %v5552_v59 }
0x2f28   :  { %v4031_v54 = vpop.f32.mrf.mxu0 }
0x2f2a   :  { %v6602_v56 = vpop.f32.mrf.mxu0 }
0x2f30   :  { %v7060_v58 = vpop.eup %7059 }
0x2f31   :  { %3950 = vrot.lane.b32.xlu0 %v7060_v58, %s7166_s27 }
0x2f32   :  { %v7062_v60 = vpop.eup %7061 }
0x2f33   :  { %v3944_v61 = vadd.f32 1.0, %v7062_v60 }
0x2f35   :  { %7063 = vrcp.f32 %v3944_v61 }
0x2f42   :  { %v7064_v8 = vpop.eup %7063 }
0x2f43   :  { %v3948_v63 = vmul.f32 %v7064_v8, %v8370_v50  ;;  %v8594_v50 = vld [vmem:[%s8925_s11 + $0x10] sm:$0xff] }
0x2fa3   :  { %v3951_v62 = vpop.permute.xlu0 %3950 }
0x2fa4   :  { %v3953_v14 = vmul.f32 %v7064_v8, %v3951_v62 }
0x2fa6   :  { %3955 = vrot.lane.b32.xlu1 %v3953_v14, %s7167_s28 }
0x3018   :  { %v3956_v0 = vpop.permute.xlu1 %3955 }
0x3019   :  { %v8576_v2 = vadd.f32 %v3956_v0, %v3948_v63 }
0x301b   :  { %7065 = vtanh.f32 %v8576_v2 }
0x3028   :  { %v7066_v49 = vpop.eup %7065 }
0x3029   :  { %3961 = vrot.lane.b32.xlu0 %v7066_v49, %s7166_s27 }
0x309b   :  { %v3962_v24 = vpop.permute.xlu0 %3961 }
0x309c   :  { %v3964_v3 = vmul.f32 %v7064_v8, %v3962_v24  ;;  %v8662_v8 = vld [vmem:[%s8926_s12] sm:$0xff] }
0x309e   :  { %4036 = vrot.lane.b32.xlu1 %v3964_v3, %s7167_s28 }
0x3110   :  { %v4037_v12 = vpop.permute.xlu1 %4036 }
0x3111   :  { %6612 = vmatmul.mubr.msk.f32.vlgmr.msra.gmra.mxu0 %vm85_vm1, %v4037_v12 }
0x3112   :  { %6615 = vmatpush3.msra.mxu0 %v8585_v51  ;;  %6622 = vmatprep.mubr.msk.f32.mxu0 %vm7169_vm0, %v7168_v11 }
0x3113   :  { %6616 = vmatprep.subr.mxu0 %v7168_v11 }
0x3114   :  { %6617 = vmatpush3.msra.mxu0 %v8594_v50 }
0x3115   :  { %6618 = vmatprep.subr.mxu0 %v7168_v11 }
0x3116   :  { %6619 = vmatpush3.msra.mxu0 %v8601_v16 }
0x3117   :  { %6620 = vmatprep.subr.mxu0 %v7168_v11 }
0x3118   :  { %6621 = vmatpush3.msra.mxu0 %v8608_v13 }
0x3119   :  { %6625 = vmatprep.subr.mxu0 %v7168_v11 }
0x31d1   :  { %v4106_v57 = vpop.f32.mrf.mxu0 }
0x31d2   :  { %v4107_v22 = vadd.f32 %v4106_v57, %v4031_v54 }
0x31d3   :  { %v6613_v27 = vpop.f32.mrf.mxu0 }
0x31d4   :  { %v4110_v40 = vadd.f32 %v8615_v29, %v4107_v22 }
0x31d6   :  { %7067 = vtanh.f32 %v4110_v40  ;;  %v5555_v53 = vmul.f32 -1.442695, %v4110_v40 }
0x31d8   :  { %7069 = vpow2.f32 %v5555_v53 }
0x31e3   :  { %v7068_v20 = vpop.eup %7067 }
0x31e4   :  { %4120 = vrot.lane.b32.xlu0 %v7068_v20, %s7166_s27 }
0x31e5   :  { %v7070_v47 = vpop.eup %7069 }
0x31e6   :  { %v4114_v55 = vadd.f32 1.0, %v7070_v47 }
0x31e8   :  { %7071 = vrcp.f32 %v4114_v55 }
0x31f5   :  { %v7072_v48 = vpop.eup %7071 }
0x31f6   :  { %v4118_v42 = vmul.f32 %v7072_v48, %v8393_v15 }
0x3256   :  { %v4121_v32 = vpop.permute.xlu0 %4120 }
0x3257   :  { %v4123_v9 = vmul.f32 %v7072_v48, %v4121_v32 }
0x3259   :  { %4125 = vrot.lane.b32.xlu1 %v4123_v9, %s7167_s28 }
0x32cb   :  { %v4126_v54 = vpop.permute.xlu1 %4125 }
0x32cc   :  { %v8621_v56 = vadd.f32 %v4126_v54, %v4118_v42 }
0x32ce   :  { %7073 = vtanh.f32 %v8621_v56 }
0x32db   :  { %v7074_v58 = vpop.eup %7073 }
0x32dc   :  { %4131 = vrot.lane.b32.xlu0 %v7074_v58, %s7166_s27 }
0x334e   :  { %v4132_v59 = vpop.permute.xlu0 %4131 }
0x334f   :  { %v4134_v60 = vmul.f32 %v7072_v48, %v4132_v59 }
0x3351   :  { %4136 = vrot.lane.b32.xlu1 %v4134_v60, %s7167_s28 }
0x33c3   :  { %v4137_v61 = vpop.permute.xlu1 %4136 }
0x33c4   :  { %6623 = vmatmul.mubr.msk.f32.vlgmr.msra.gmra.mxu0 %vm85_vm1, %v4137_v61 }
0x33c5   :  { %6626 = vmatpush3.msra.mxu0 %v8313_v34  ;;  %6633 = vmatprep.mubr.msk.f32.mxu0 %vm7169_vm0, %v7168_v11 }
0x33c6   :  { %6627 = vmatprep.subr.mxu0 %v7168_v11 }
0x33c7   :  { %6628 = vmatpush3.msra.mxu0 %v8322_v35 }
0x33c8   :  { %6629 = vmatprep.subr.mxu0 %v7168_v11 }
0x33c9   :  { %6630 = vmatpush3.msra.mxu0 %v8329_v36 }
0x33ca   :  { %6631 = vmatprep.subr.mxu0 %v7168_v11 }
0x33cb   :  { %6632 = vmatpush3.msra.mxu0 %v8336_v37 }
0x33cc   :  { %6634 = vmatmul.mubr.msk.f32.vlgmr.msra.gmra.mxu0 %vm85_vm1, %v4037_v12  ;;  %6671 = vmatprep.subr.mxu0 %v7168_v11 }
0x33cd   :  { %6672 = vmatpush3.msra.mxu0 %v8511_v41  ;;  %6679 = vmatprep.mubr.msk.f32.mxu0 %vm7169_vm0, %v7168_v11 }
0x33ce   :  { %6673 = vmatprep.subr.mxu0 %v7168_v11 }
0x33cf   :  { %6674 = vmatpush3.msra.mxu0 %v8520_v43 }
0x33d0   :  { %6675 = vmatprep.subr.mxu0 %v7168_v11 }
0x33d1   :  { %6676 = vmatpush3.msra.mxu0 %v8527_v44 }
0x33d2   :  { %6677 = vmatprep.subr.mxu0 %v7168_v11 }
0x33d3   :  { %6678 = vmatpush3.msra.mxu0 %v8534_v52 }
0x33d4   :  { %6680 = vmatmul.mubr.msk.f32.vlgmr.msra.gmra.mxu0 %vm85_vm1, %v4137_v61  ;;  %6682 = vmatprep.subr.mxu0 %v7168_v11 }
0x33d5   :  { %6683 = vmatpush3.msra.mxu0 %v8542_v46  ;;  %6690 = vmatprep.mubr.msk.f32.mxu0 %vm7169_vm0, %v7168_v11 }
0x33d6   :  { %6684 = vmatprep.subr.mxu0 %v7168_v11 }
0x33d7   :  { %6685 = vmatpush3.msra.mxu0 %v8551_v10 }
0x33d8   :  { %6686 = vmatprep.subr.mxu0 %v7168_v11 }
0x33d9   :  { %6687 = vmatpush3.msra.mxu0 %v8558_v6 }
0x33da   :  { %6688 = vmatprep.subr.mxu0 %v7168_v11 }
0x33db   :  { %6689 = vmatpush3.msra.mxu0 %v8565_v7 }
0x33dc   :  { %6693 = vmatprep.subr.mxu0 %v7168_v11 }
0x3484   :  { %v4206_v15 = vpop.f32.mrf.mxu0 }
0x3485   :  { %v4207_v62 = vadd.f32 %v8662_v8, %v4206_v15 }
0x3486   :  { %v6624_v14 = vpop.f32.mrf.mxu0 }
0x3487   :  { %5557 = vst [vmem:[%s8927_s13 + $0x20] sm:$0xff] %v4207_v62  ;;  %v4212_v63 = vsel %vm2123_vm3, %v4207_v62, -1e+30 }
0x3488   :  { %4213 = vmax.xlane.f32.xlu0 %v4212_v63 }
0x348c   :  { %v4289_v0 = vpop.f32.mrf.mxu0 }
0x348e   :  { %v6635_v49 = vpop.f32.mrf.mxu0 }
0x3494   :  { %v8670_v24 = vpop.f32.mrf.mxu0 }
0x3496   :  { %v6681_v3 = vpop.f32.mrf.mxu0 }
0x3511   :  { %v4214_v12 = vpop.xlane.xlu0 %4213 }
0x3512   :  { %vm4215_vm8 = vcmp.eq.f32.partialorder %v4212_v63, %v4214_v12 }
0x3513   :  { %v4216_v57 = vsel %vm4215_vm8, %v7850_v45, 128.0 }
0x3514   :  { %4217 = vmin.xlane.f32.xlu1 %v4216_v57 }
0x359d   :  { %v4218_v22 = vpop.xlane.xlu1 %4217 }
0x359e   :  { %vm4219_vm9 = vcmp.eq.f32.partialorder %v7850_v45, %v4218_v22 }
0x359f   :  { %v5558_v27 = vsel %vm4219_vm9, 1.0, %v7168_v11 }
0x35a0   :  { %v4222_v40 = vsel %vm2123_vm3, %v5558_v27, %v4207_v62 }
0x35a1   :  { %6669 = vmatmul.mubr.f32.vlgmr.msra.gmra.mxu1 %v4222_v40 }
0x35a2   :  { %6716 = vmatpush3.msra.mxu1 %v8257_v26  ;;  %6747 = vmatprep.mubr.msk.f32.mxu1 %vm7169_vm0, %v7168_v11 }
0x35a3   :  { %6717 = vmatprep.subr.mxu1 %v7168_v11 }
0x35a4   :  { %6718 = vmatpush3.msra.mxu1 %v8266_v1 }
0x35a5   :  { %6719 = vmatprep.subr.mxu1 %v7168_v11 }
0x35a6   :  { %6720 = vmatpush3.msra.mxu1 %v8273_v28 }
0x35a7   :  { %6721 = vmatprep.subr.mxu1 %v7168_v11 }
0x35a8   :  { %6722 = vmatpush3.msra.mxu1 %v8281_v30 }
0x35a9   :  { %6723 = vmatprep.subr.mxu1 %v7168_v11 }
0x35aa   :  { %6724 = vmatpush3.msra.mxu1 %v8414_v31 }
0x35ab   :  { %6725 = vmatprep.subr.mxu1 %v7168_v11 }
0x35ac   :  { %6726 = vmatpush3.msra.mxu1 %v8421_v19 }
0x35ad   :  { %6727 = vmatprep.subr.mxu1 %v7168_v11 }
0x35ae   :  { %6728 = vmatpush3.msra.mxu1 %v8428_v17 }
0x35af   :  { %6729 = vmatprep.subr.mxu1 %v7168_v11 }
0x35b0   :  { %6730 = vmatpush3.msra.mxu1 %v8435_v5 }
0x35b1   :  { %6731 = vmatprep.subr.mxu1 %v7168_v11 }
0x35b2   :  { %6732 = vmatpush3.msra.mxu1 %v8442_v4 }
0x35b3   :  { %6733 = vmatprep.subr.mxu1 %v7168_v11 }
0x35b4   :  { %6734 = vmatpush3.msra.mxu1 %v8449_v18 }
0x35b5   :  { %6735 = vmatprep.subr.mxu1 %v7168_v11 }
0x35b6   :  { %6736 = vmatpush3.msra.mxu1 %v8456_v21 }
0x35b7   :  { %6737 = vmatprep.subr.mxu1 %v7168_v11 }
0x35b8   :  { %6738 = vmatpush3.msra.mxu1 %v8463_v23 }
0x35b9   :  { %6739 = vmatprep.subr.mxu1 %v7168_v11 }
0x35ba   :  { %6740 = vmatpush3.msra.mxu1 %v8470_v39 }
0x35bb   :  { %6741 = vmatprep.subr.mxu1 %v7168_v11 }
0x35bc   :  { %6742 = vmatpush3.msra.mxu1 %v8477_v25 }
0x35bd   :  { %6743 = vmatprep.subr.mxu1 %v7168_v11 }
0x35be   :  { %6744 = vmatpush3.msra.mxu1 %v8484_v33 }
0x35bf   :  { %6745 = vmatprep.subr.mxu1 %v7168_v11 }
0x35c0   :  { %6746 = vmatpush3.msra.mxu1 %v8491_v38 }
0x35c1   :  { %6794 = vmatprep.subr.mxu1 %v7168_v11 }
0x3661   :  { %v4359_v20 = vpop.f32.mrf.mxu1 }
0x3662   :  { %v4360_v53 = vadd.f32 %v4359_v20, %v4289_v0 }
0x3663   :  { %v6670_v47 = vpop.f32.mrf.mxu1 }
0x3664   :  { %7075 = vtanh.f32 %v4360_v53  ;;  %v5560_v48 = vmul.f32 -1.442695, %v4360_v53 }
0x3666   :  { %7077 = vpow2.f32 %v5560_v48 }
0x3671   :  { %v7076_v55 = vpop.eup %7075 }
0x3672   :  { %4372 = vrot.lane.b32.xlu0 %v7076_v55, %s7166_s27 }
0x3673   :  { %v7078_v32 = vpop.eup %7077 }
0x3674   :  { %v4366_v9 = vadd.f32 1.0, %v7078_v32  ;;  %v5566_v32 = vld [vmem:[%s8928_s5 + $0x28] sm:$0xff] }
0x3675   :  { %6748 = vmatmul.mubr.f32.vlgmr.msra.gmra.mxu1 %v5566_v32 }
0x3676   :  { %7079 = vrcp.f32 %v4366_v9  ;;  %6795 = vmatpush3.msra.mxu1 %v8257_v26  ;;  %6826 = vmatprep.mubr.msk.f32.mxu1 %vm7169_vm0, %v7168_v11 }
0x3677   :  { %6796 = vmatprep.subr.mxu1 %v7168_v11 }
0x3678   :  { %6797 = vmatpush3.msra.mxu1 %v8266_v1 }
0x3679   :  { %6798 = vmatprep.subr.mxu1 %v7168_v11 }
0x367a   :  { %6799 = vmatpush3.msra.mxu1 %v8273_v28 }
0x367b   :  { %6800 = vmatprep.subr.mxu1 %v7168_v11 }
0x367c   :  { %6801 = vmatpush3.msra.mxu1 %v8281_v30 }
0x367d   :  { %6802 = vmatprep.subr.mxu1 %v7168_v11 }
0x367e   :  { %6803 = vmatpush3.msra.mxu1 %v8414_v31 }
0x367f   :  { %6804 = vmatprep.subr.mxu1 %v7168_v11 }
0x3680   :  { %6805 = vmatpush3.msra.mxu1 %v8421_v19 }
0x3681   :  { %6806 = vmatprep.subr.mxu1 %v7168_v11 }
0x3682   :  { %6807 = vmatpush3.msra.mxu1 %v8428_v17 }
0x3683   :  { %v7080_v42 = vpop.eup %7079  ;;  %6808 = vmatprep.subr.mxu1 %v7168_v11 }
0x3684   :  { %v4370_v59 = vmul.f32 %v7080_v42, %v8576_v2  ;;  %6809 = vmatpush3.msra.mxu1 %v8435_v5 }
0x3685   :  { %6810 = vmatprep.subr.mxu1 %v7168_v11 }
0x3686   :  { %6811 = vmatpush3.msra.mxu1 %v8442_v4 }
0x3687   :  { %6812 = vmatprep.subr.mxu1 %v7168_v11 }
0x3688   :  { %6813 = vmatpush3.msra.mxu1 %v8449_v18 }
0x3689   :  { %6814 = vmatprep.subr.mxu1 %v7168_v11 }
0x368a   :  { %6815 = vmatpush3.msra.mxu1 %v8456_v21 }
0x368b   :  { %6816 = vmatprep.subr.mxu1 %v7168_v11 }
0x368c   :  { %6817 = vmatpush3.msra.mxu1 %v8463_v23 }
0x368d   :  { %6818 = vmatprep.subr.mxu1 %v7168_v11 }
0x368e   :  { %6819 = vmatpush3.msra.mxu1 %v8470_v39 }
0x368f   :  { %6820 = vmatprep.subr.mxu1 %v7168_v11 }
0x3690   :  { %6821 = vmatpush3.msra.mxu1 %v8477_v25 }
0x3691   :  { %6822 = vmatprep.subr.mxu1 %v7168_v11 }
0x3692   :  { %6823 = vmatpush3.msra.mxu1 %v8484_v33 }
0x3693   :  { %6824 = vmatprep.subr.mxu1 %v7168_v11 }
0x3694   :  { %6825 = vmatpush3.msra.mxu1 %v8491_v38 }
0x36e4   :  { %v4373_v54 = vpop.permute.xlu0 %4372 }
0x36e5   :  { %v4375_v58 = vmul.f32 %v7080_v42, %v4373_v54 }
0x36e7   :  { %4377 = vrot.lane.b32.xlu1 %v4375_v58, %s7167_s28 }
0x3735   :  { %v4772_v1 = vpop.f32.mrf.mxu1 }
0x3737   :  { %v6749_v28 = vpop.f32.mrf.mxu1 }
0x3759   :  { %v4378_v60 = vpop.permute.xlu1 %4377 }
0x375a   :  { %v8714_v61 = vadd.f32 %v4378_v60, %v4370_v59 }
0x375c   :  { %7081 = vtanh.f32 %v8714_v61 }
0x3769   :  { %v7082_v15 = vpop.eup %7081 }
0x376a   :  { %4383 = vrot.lane.b32.xlu0 %v7082_v15, %s7166_s27 }
0x37dc   :  { %v4384_v62 = vpop.permute.xlu0 %4383 }
0x37dd   :  { %v4386_v14 = vmul.f32 %v7080_v42, %v4384_v62 }
0x37df   :  { %4458 = vrot.lane.b32.xlu1 %v4386_v14, %s7167_s28 }
0x3851   :  { %v8719_v63 = vpop.permute.xlu1 %4458 }
0x3852   :  { %6691 = vmatmul.mubr.msk.f32.vlgmr.msra.gmra.mxu0 %vm85_vm1, %v8719_v63 }
0x3853   :  { %6694 = vmatpush3.msra.mxu0 %v8585_v51  ;;  %6701 = vmatprep.mubr.msk.f32.mxu0 %vm7169_vm0, %v7168_v11 }
0x3854   :  { %6695 = vmatprep.subr.mxu0 %v7168_v11 }
0x3855   :  { %6696 = vmatpush3.msra.mxu0 %v8594_v50 }
0x3856   :  { %6697 = vmatprep.subr.mxu0 %v7168_v11 }
0x3857   :  { %6698 = vmatpush3.msra.mxu0 %v8601_v16 }
0x3858   :  { %6699 = vmatprep.subr.mxu0 %v7168_v11 }
0x3859   :  { %6700 = vmatpush3.msra.mxu0 %v8608_v13 }
0x385a   :  { %6704 = vmatprep.subr.mxu0 %v7168_v11 }
0x3912   :  { %v4528_v2 = vpop.f32.mrf.mxu0 }
0x3913   :  { %v4529_v0 = vadd.f32 %v4528_v2, %v8670_v24 }
0x3914   :  { %v6692_v49 = vpop.f32.mrf.mxu0 }
0x3915   :  { %v4532_v3 = vadd.f32 %v8615_v29, %v4529_v0 }
0x3917   :  { %7083 = vtanh.f32 %v4532_v3  ;;  %v5563_v57 = vmul.f32 -1.442695, %v4532_v3 }
0x3919   :  { %7085 = vpow2.f32 %v5563_v57 }
0x3924   :  { %v7084_v12 = vpop.eup %7083 }
0x3925   :  { %4542 = vrot.lane.b32.xlu0 %v7084_v12, %s7166_s27 }
0x3926   :  { %v7086_v22 = vpop.eup %7085 }
0x3927   :  { %v4536_v27 = vadd.f32 1.0, %v7086_v22 }
0x3929   :  { %7087 = vrcp.f32 %v4536_v27 }
0x3936   :  { %v7088_v40 = vpop.eup %7087 }
0x3937   :  { %v4540_v47 = vmul.f32 %v7088_v40, %v8621_v56 }
0x3997   :  { %v4543_v20 = vpop.permute.xlu0 %4542 }
0x3998   :  { %v4545_v53 = vmul.f32 %v7088_v40, %v4543_v20 }
0x399a   :  { %4547 = vrot.lane.b32.xlu1 %v4545_v53, %s7167_s28 }
0x3a0c   :  { %v4548_v24 = vpop.permute.xlu1 %4547 }
0x3a0d   :  { %v8738_v55 = vadd.f32 %v4548_v24, %v4540_v47 }
0x3a0f   :  { %7089 = vtanh.f32 %v8738_v55 }
0x3a1c   :  { %v7090_v48 = vpop.eup %7089 }
0x3a1d   :  { %4553 = vrot.lane.b32.xlu0 %v7090_v48, %s7166_s27 }
0x3a8f   :  { %v4554_v56 = vpop.permute.xlu0 %4553 }
0x3a90   :  { %v4556_v9 = vmul.f32 %v7088_v40, %v4554_v56 }
0x3a92   :  { %4558 = vrot.lane.b32.xlu1 %v4556_v9, %s7167_s28 }
0x3b04   :  { %v4559_v26 = vpop.permute.xlu1 %4558 }
0x3b05   :  { %6702 = vmatmul.mubr.msk.f32.vlgmr.msra.gmra.mxu0 %vm85_vm1, %v4559_v26 }
0x3b06   :  { %6705 = vmatpush3.msra.mxu0 %v8313_v34  ;;  %6712 = vmatprep.mubr.msk.f32.mxu0 %vm7169_vm0, %v7168_v11 }
0x3b07   :  { %6706 = vmatprep.subr.mxu0 %v7168_v11 }
0x3b08   :  { %6707 = vmatpush3.msra.mxu0 %v8322_v35 }
0x3b09   :  { %6708 = vmatprep.subr.mxu0 %v7168_v11 }
0x3b0a   :  { %6709 = vmatpush3.msra.mxu0 %v8329_v36 }
0x3b0b   :  { %6710 = vmatprep.subr.mxu0 %v7168_v11 }
0x3b0c   :  { %6711 = vmatpush3.msra.mxu0 %v8336_v37 }
0x3b0d   :  { %6713 = vmatmul.mubr.msk.f32.vlgmr.msra.gmra.mxu0 %vm85_vm1, %v8719_v63  ;;  %6750 = vmatprep.subr.mxu0 %v7168_v11 }
0x3b0e   :  { %6751 = vmatpush3.msra.mxu0 %v8511_v41  ;;  %6758 = vmatprep.mubr.msk.f32.mxu0 %vm7169_vm0, %v7168_v11 }
0x3b0f   :  { %6752 = vmatprep.subr.mxu0 %v7168_v11 }
0x3b10   :  { %6753 = vmatpush3.msra.mxu0 %v8520_v43 }
0x3b11   :  { %6754 = vmatprep.subr.mxu0 %v7168_v11 }
0x3b12   :  { %6755 = vmatpush3.msra.mxu0 %v8527_v44 }
0x3b13   :  { %6756 = vmatprep.subr.mxu0 %v7168_v11 }
0x3b14   :  { %6757 = vmatpush3.msra.mxu0 %v8534_v52 }
0x3b15   :  { %6759 = vmatmul.mubr.msk.f32.vlgmr.msra.gmra.mxu0 %vm85_vm1, %v4559_v26  ;;  %6761 = vmatprep.subr.mxu0 %v7168_v11 }
0x3b16   :  { %6762 = vmatpush3.msra.mxu0 %v8542_v46  ;;  %6769 = vmatprep.mubr.msk.f32.mxu0 %vm7169_vm0, %v7168_v11 }
0x3b17   :  { %6763 = vmatprep.subr.mxu0 %v7168_v11 }
0x3b18   :  { %6764 = vmatpush3.msra.mxu0 %v8551_v10 }
0x3b19   :  { %6765 = vmatprep.subr.mxu0 %v7168_v11 }
0x3b1a   :  { %6766 = vmatpush3.msra.mxu0 %v8558_v6 }
0x3b1b   :  { %6767 = vmatprep.subr.mxu0 %v7168_v11 }
0x3b1c   :  { %6768 = vmatpush3.msra.mxu0 %v8565_v7 }
0x3b1d   :  { %6772 = vmatprep.subr.mxu0 %v7168_v11 }
0x3bc5   :  { %v4628_v30 = vpop.f32.mrf.mxu0 }
0x3bc6   :  { %v4629_v31 = vadd.f32 %v8662_v8, %v4628_v30 }
0x3bc7   :  { %v6703_v19 = vpop.f32.mrf.mxu0 }
0x3bc8   :  { %5565 = vst [vmem:[%s8927_s13 + $0x28] sm:$0xff] %v4629_v31 }
0x3bcd   :  { %v4702_v17 = vpop.f32.mrf.mxu0 }
0x3bce   :  { %v4773_v5 = vadd.f32 %v4772_v1, %v4702_v17 }
0x3bcf   :  { %v6714_v4 = vpop.f32.mrf.mxu0 }
0x3bd0   :  { %7091 = vtanh.f32 %v4773_v5  ;;  %v5568_v39 = vmul.f32 -1.442695, %v4773_v5 }
0x3bd2   :  { %7093 = vpow2.f32 %v5568_v39 }
0x3bd5   :  { %v4866_v18 = vpop.f32.mrf.mxu0 }
0x3bd7   :  { %v6760_v21 = vpop.f32.mrf.mxu0 }
0x3bdd   :  { %v7092_v23 = vpop.eup %7091 }
0x3bde   :  { %4785 = vrot.lane.b32.xlu0 %v7092_v23, %s7166_s27 }
0x3bdf   :  { %v7094_v25 = vpop.eup %7093 }
0x3be0   :  { %v4779_v33 = vadd.f32 1.0, %v7094_v25 }
0x3be2   :  { %7095 = vrcp.f32 %v4779_v33 }
0x3bef   :  { %v7096_v38 = vpop.eup %7095 }
0x3bf0   :  { %v4783_v58 = vmul.f32 %v7096_v38, %v8714_v61 }
0x3c50   :  { %v4786_v42 = vpop.permute.xlu0 %4785 }
0x3c51   :  { %v4788_v54 = vmul.f32 %v7096_v38, %v4786_v42 }
0x3c53   :  { %4790 = vrot.lane.b32.xlu1 %v4788_v54, %s7167_s28 }
0x3cc5   :  { %v4791_v59 = vpop.permute.xlu1 %4790 }
0x3cc6   :  { %v8820_v60 = vadd.f32 %v4791_v59, %v4783_v58 }
0x3cc8   :  { %7097 = vtanh.f32 %v8820_v60 }
0x3cd5   :  { %v7098_v15 = vpop.eup %7097 }
0x3cd6   :  { %4796 = vrot.lane.b32.xlu0 %v7098_v15, %s7166_s27 }
0x3d48   :  { %v4797_v62 = vpop.permute.xlu0 %4796 }
0x3d49   :  { %v4799_v14 = vmul.f32 %v7096_v38, %v4797_v62 }
0x3d4b   :  { %4871 = vrot.lane.b32.xlu1 %v4799_v14, %s7167_s28 }
0x3dbd   :  { %v4872_v63 = vpop.permute.xlu1 %4871 }
0x3dbe   :  { %6770 = vmatmul.mubr.msk.f32.vlgmr.msra.gmra.mxu0 %vm85_vm1, %v4872_v63 }
0x3dbf   :  { %6773 = vmatpush3.msra.mxu0 %v8585_v51  ;;  %6780 = vmatprep.mubr.msk.f32.mxu0 %vm7169_vm0, %v7168_v11 }
0x3dc0   :  { %6774 = vmatprep.subr.mxu0 %v7168_v11 }
0x3dc1   :  { %6775 = vmatpush3.msra.mxu0 %v8594_v50 }
0x3dc2   :  { %6776 = vmatprep.subr.mxu0 %v7168_v11 }
0x3dc3   :  { %6777 = vmatpush3.msra.mxu0 %v8601_v16 }
0x3dc4   :  { %6778 = vmatprep.subr.mxu0 %v7168_v11 }
0x3dc5   :  { %6779 = vmatpush3.msra.mxu0 %v8608_v13 }
0x3dc6   :  { %6783 = vmatprep.subr.mxu0 %v7168_v11 }
0x3e7e   :  { %v4941_v61 = vpop.f32.mrf.mxu0 }
0x3e7f   :  { %v4942_v2 = vadd.f32 %v4941_v61, %v4866_v18 }
0x3e80   :  { %v6771_v0 = vpop.f32.mrf.mxu0 }
0x3e81   :  { %v4945_v49 = vadd.f32 %v8615_v29, %v4942_v2 }
0x3e83   :  { %7099 = vtanh.f32 %v4945_v49  ;;  %v5571_v12 = vmul.f32 -1.442695, %v4945_v49 }
0x3e85   :  { %7101 = vpow2.f32 %v5571_v12 }
0x3e90   :  { %v7100_v3 = vpop.eup %7099 }
0x3e91   :  { %4955 = vrot.lane.b32.xlu0 %v7100_v3, %s7166_s27 }
0x3e92   :  { %v7102_v57 = vpop.eup %7101 }
0x3e93   :  { %v4949_v22 = vadd.f32 1.0, %v7102_v57 }
0x3e95   :  { %7103 = vrcp.f32 %v4949_v22 }
0x3ea2   :  { %v7104_v27 = vpop.eup %7103 }
0x3ea3   :  { %v4953_v53 = vmul.f32 %v7104_v27, %v8738_v55 }
0x3f03   :  { %v4956_v40 = vpop.permute.xlu0 %4955 }
0x3f04   :  { %v4958_v20 = vmul.f32 %v7104_v27, %v4956_v40 }
0x3f06   :  { %4960 = vrot.lane.b32.xlu1 %v4958_v20, %s7167_s28 }
0x3f78   :  { %v4961_v47 = vpop.permute.xlu1 %4960 }
0x3f79   :  { %v8840_v24 = vadd.f32 %v4961_v47, %v4953_v53 }
0x3f7b   :  { %7105 = vtanh.f32 %v8840_v24 }
0x3f88   :  { %v7106_v48 = vpop.eup %7105 }
0x3f89   :  { %4966 = vrot.lane.b32.xlu0 %v7106_v48, %s7166_s27 }
0x3ffb   :  { %v4967_v32 = vpop.permute.xlu0 %4966 }
0x3ffc   :  { %v4969_v56 = vmul.f32 %v7104_v27, %v4967_v32 }
0x3ffe   :  { %4971 = vrot.lane.b32.xlu1 %v4969_v56, %s7167_s28 }
0x4070   :  { %v4972_v9 = vpop.permute.xlu1 %4971 }
0x4071   :  { %6781 = vmatmul.mubr.msk.f32.vlgmr.msra.gmra.mxu0 %vm85_vm1, %v4972_v9 }
0x4072   :  { %6784 = vmatpush3.msra.mxu0 %v8313_v34  ;;  %6791 = vmatprep.mubr.msk.f32.mxu0 %vm7169_vm0, %v7168_v11 }
0x4073   :  { %6785 = vmatprep.subr.mxu0 %v7168_v11 }
0x4074   :  { %6786 = vmatpush3.msra.mxu0 %v8322_v35 }
0x4075   :  { %6787 = vmatprep.subr.mxu0 %v7168_v11 }
0x4076   :  { %6788 = vmatpush3.msra.mxu0 %v8329_v36 }
0x4077   :  { %6789 = vmatprep.subr.mxu0 %v7168_v11 }
0x4078   :  { %6790 = vmatpush3.msra.mxu0 %v8336_v37 }
0x4079   :  { %6792 = vmatmul.mubr.msk.f32.vlgmr.msra.gmra.mxu0 %vm85_vm1, %v4872_v63  ;;  %6829 = vmatprep.subr.mxu0 %v7168_v11 }
0x407a   :  { %6830 = vmatpush3.msra.mxu0 %v8511_v41  ;;  %6837 = vmatprep.mubr.msk.f32.mxu0 %vm7169_vm0, %v7168_v11 }
0x407b   :  { %6831 = vmatprep.subr.mxu0 %v7168_v11 }
0x407c   :  { %6832 = vmatpush3.msra.mxu0 %v8520_v43 }
0x407d   :  { %6833 = vmatprep.subr.mxu0 %v7168_v11 }
0x407e   :  { %6834 = vmatpush3.msra.mxu0 %v8527_v44 }
0x407f   :  { %6835 = vmatprep.subr.mxu0 %v7168_v11 }
0x4080   :  { %6836 = vmatpush3.msra.mxu0 %v8534_v52 }
0x4081   :  { %6838 = vmatmul.mubr.msk.f32.vlgmr.msra.gmra.mxu0 %vm85_vm1, %v4972_v9  ;;  %6840 = vmatprep.subr.mxu0 %v7168_v11 }
0x4082   :  { %6841 = vmatpush3.msra.mxu0 %v8542_v46  ;;  %6848 = vmatprep.mubr.msk.f32.mxu0 %vm7169_vm0, %v7168_v11 }
0x4083   :  { %6842 = vmatprep.subr.mxu0 %v7168_v11 }
0x4084   :  { %6843 = vmatpush3.msra.mxu0 %v8551_v10 }
0x4085   :  { %6844 = vmatprep.subr.mxu0 %v7168_v11 }
0x4086   :  { %6845 = vmatpush3.msra.mxu0 %v8558_v6 }
0x4087   :  { %6846 = vmatprep.subr.mxu0 %v7168_v11 }
0x4088   :  { %6847 = vmatpush3.msra.mxu0 %v8565_v7 }
0x4089   :  { %6851 = vmatprep.subr.mxu0 %v7168_v11 }
0x4131   :  { %v5041_v34 = vpop.f32.mrf.mxu0 }
0x4132   :  { %v5042_v35 = vadd.f32 %v8662_v8, %v5041_v34 }
0x4133   :  { %v6782_v36 = vpop.f32.mrf.mxu0 }
0x4134   :  { %5573 = vst [vmem:[%s8927_s13 + $0x30] sm:$0xff] %v5042_v35  ;;  %v5047_v37 = vsel %vm2123_vm3, %v5042_v35, -1e+30 }
0x4135   :  { %5048 = vmax.xlane.f32.xlu0 %v5047_v37 }
0x4139   :  { %v5124_v41 = vpop.f32.mrf.mxu0 }
0x413b   :  { %v6793_v43 = vpop.f32.mrf.mxu0 }
0x4141   :  { %v5288_v44 = vpop.f32.mrf.mxu0 }
0x4143   :  { %v6839_v52 = vpop.f32.mrf.mxu0 }
0x41be   :  { %v5049_v46 = vpop.xlane.xlu0 %5048 }
0x41bf   :  { %vm5050_vm10 = vcmp.eq.f32.partialorder %v5047_v37, %v5049_v46 }
0x41c0   :  { %v5051_v10 = vsel %vm5050_vm10, %v7850_v45, 128.0 }
0x41c1   :  { %5052 = vmin.xlane.f32.xlu1 %v5051_v10 }
0x424a   :  { %v5053_v6 = vpop.xlane.xlu1 %5052 }
0x424b   :  { %vm5054_vm11 = vcmp.eq.f32.partialorder %v7850_v45, %v5053_v6 }
0x424c   :  { %v5574_v7 = vsel %vm5054_vm11, 1.0, %v7168_v11 }
0x424d   :  { %v5057_v55 = vsel %vm2123_vm3, %v5574_v7, %v5042_v35 }
0x424e   :  { %6827 = vmatmul.mubr.f32.vlgmr.msra.gmra.mxu1 %v5057_v55 }
0x430e   :  { %v5194_v26 = vpop.f32.mrf.mxu1 }
0x430f   :  { %v5195_v1 = vadd.f32 %v5194_v26, %v5124_v41 }
0x4310   :  { %v6828_v28 = vpop.f32.mrf.mxu1 }
0x4311   :  { %7107 = vtanh.f32 %v5195_v1  ;;  %v5576_v31 = vmul.f32 -1.442695, %v5195_v1 }
0x4313   :  { %7109 = vpow2.f32 %v5576_v31 }
0x431e   :  { %v7108_v30 = vpop.eup %7107 }
0x431f   :  { %5207 = vrot.lane.b32.xlu0 %v7108_v30, %s7166_s27 }
0x4320   :  { %v7110_v19 = vpop.eup %7109 }
0x4321   :  { %v5201_v17 = vadd.f32 1.0, %v7110_v19 }
0x4323   :  { %7111 = vrcp.f32 %v5201_v17 }
0x4330   :  { %v7112_v5 = vpop.eup %7111 }
0x4331   :  { %v5205_v45 = vmul.f32 %v7112_v5, %v8820_v60 }
0x4391   :  { %v5208_v4 = vpop.permute.xlu0 %5207 }
0x4392   :  { %v5210_v18 = vmul.f32 %v7112_v5, %v5208_v4 }
0x4394   :  { %5212 = vrot.lane.b32.xlu1 %v5210_v18, %s7167_s28 }
0x4406   :  { %v5213_v21 = vpop.permute.xlu1 %5212 }
0x4407   :  { %v5215_v23 = vadd.f32 %v5213_v21, %v5205_v45 }
0x4409   :  { %7113 = vtanh.f32 %v5215_v23 }
0x4416   :  { %v7114_v39 = vpop.eup %7113 }
0x4417   :  { %5218 = vrot.lane.b32.xlu0 %v7114_v39, %s7166_s27 }
0x4489   :  { %v5219_v25 = vpop.permute.xlu0 %5218 }
0x448a   :  { %v5221_v33 = vmul.f32 %v7112_v5, %v5219_v25 }
0x448c   :  { %5293 = vrot.lane.b32.xlu1 %v5221_v33, %s7167_s28 }
0x44fe   :  { %v5294_v38 = vpop.permute.xlu1 %5293 }
0x44ff   :  { %6849 = vmatmul.mubr.msk.f32.vlgmr.msra.gmra.mxu0 %vm85_vm1, %v5294_v38 }
0x4500   :  { %6852 = vmatpush3.msra.mxu0 %v8585_v51  ;;  %6859 = vmatprep.mubr.msk.f32.mxu0 %vm7169_vm0, %v7168_v11 }
0x4501   :  { %6853 = vmatprep.subr.mxu0 %v7168_v11 }
0x4502   :  { %6854 = vmatpush3.msra.mxu0 %v8594_v50 }
0x4503   :  { %6855 = vmatprep.subr.mxu0 %v7168_v11 }
0x4504   :  { %6856 = vmatpush3.msra.mxu0 %v8601_v16 }
0x4505   :  { %6857 = vmatprep.subr.mxu0 %v7168_v11 }
0x4506   :  { %6858 = vmatpush3.msra.mxu0 %v8608_v13 }
0x45bf   :  { %v5363_v42 = vpop.f32.mrf.mxu0 }
0x45c0   :  { %v5364_v54 = vadd.f32 %v5363_v42, %v5288_v44 }
0x45c1   :  { %v6850_v58 = vpop.f32.mrf.mxu0 }
0x45c2   :  { %v5367_v51 = vadd.f32 %v8615_v29, %v5364_v54 }
0x45c4   :  { %7115 = vtanh.f32 %v5367_v51  ;;  %v5579_v60 = vmul.f32 -1.442695, %v5367_v51 }
0x45c6   :  { %7117 = vpow2.f32 %v5579_v60 }
0x45d1   :  { %v7116_v59 = vpop.eup %7115 }
0x45d2   :  { %5377 = vrot.lane.b32.xlu0 %v7116_v59, %s7166_s27 }
0x45d3   :  { %v7118_v50 = vpop.eup %7117 }
0x45d4   :  { %v5371_v15 = vadd.f32 1.0, %v7118_v50 }
0x45d6   :  { %7119 = vrcp.f32 %v5371_v15 }
0x45e3   :  { %v7120_v62 = vpop.eup %7119 }
0x45e4   :  { %v5375_v11 = vmul.f32 %v7120_v62, %v8840_v24 }
0x4644   :  { %v5378_v16 = vpop.permute.xlu0 %5377 }
0x4645   :  { %v5380_v14 = vmul.f32 %v7120_v62, %v5378_v16 }
0x4647   :  { %5382 = vrot.lane.b32.xlu1 %v5380_v14, %s7167_s28 }
0x46b9   :  { %v5383_v13 = vpop.permute.xlu1 %5382 }
0x46ba   :  { %v5385_v63 = vadd.f32 %v5383_v13, %v5375_v11 }
0x46bc   :  { %7121 = vtanh.f32 %v5385_v63 }
0x46c9   :  { %v7122_v29 = vpop.eup %7121 }
0x46ca   :  { %5388 = vrot.lane.b32.xlu0 %v7122_v29, %s7166_s27 }
0x473c   :  { %v5389_v61 = vpop.permute.xlu0 %5388 }
0x473d   :  { %v5391_v2 = vmul.f32 %v7120_v62, %v5389_v61 }
0x473f   :  { %5393 = vrot.lane.b32.xlu1 %v5391_v2, %s7167_s28 }
0x47b1   :  { %v5394_v0 = vpop.permute.xlu1 %5393 }
0x47b2   :  { %6860 = vmatmul.mubr.msk.f32.vlgmr.msra.gmra.mxu0 %vm85_vm1, %v5394_v0 }
0x4872   :  { %v5463_v49 = vpop.f32.mrf.mxu0 }
0x4873   :  { %v5464_v3 = vadd.f32 %v8662_v8, %v5463_v49 }
0x4874   :  { %v6861_v12 = vpop.f32.mrf.mxu0 }
0x4875   :  { %5581 = vst [vmem:[%s8927_s13 + $0x38] sm:$0xff] %v5464_v3 }

</bundles_post_ra>
